<compile_context>
chip_gen: v6e
topology: v6e:2x2x1
jax: 0.10.0
libtpu: 0.0.40
codegen_flags: <defaults>
</compile_context>

<pallas_src>
import functools
import math

import jax
import jax.numpy as jnp
from jax.experimental import pallas as pl
from jax.experimental.pallas import tpu as pltpu


# ------------------------------ in-kernel helpers ------------------------------

def _softplus(x):
    # softplus(x) = log1p(exp(x)) with the torch threshold=20 passthrough.
    # Accurate log1p via the Goldberg/Kahan compensation using only exp/log/div.
    e = jnp.exp(jnp.minimum(x, 20.0))
    u = 1.0 + e
    log1p_e = jnp.where(u == 1.0, e, jnp.log(u) * (e / (u - 1.0)))
    return jnp.where(x > 20.0, x, log1p_e)


def _erf(x):
    # Abramowitz & Stegun 7.1.26 polynomial, |err| <= 1.5e-7 (f32-accurate).
    # TODO(synk): exact lax.erf used by torch.nn.GELU replaced by this polynomial.
    p = 0.3275911
    a1, a2, a3, a4, a5 = (0.254829592, -0.284496736, 1.421413741,
                          -1.453152027, 1.061405429)
    ax = jnp.abs(x)
    t = 1.0 / (1.0 + p * ax)
    poly = ((((a5 * t + a4) * t + a3) * t + a2) * t + a1) * t
    y = 1.0 - poly * jnp.exp(-ax * ax)
    return jnp.where(x >= 0.0, y, -y)


def _gelu(x):
    return 0.5 * x * (1.0 + _erf(x * 0.7071067811865476))


def _silu(x):
    return x * jax.nn.sigmoid(x)


def _layer_norm(v, w, b, eps=1e-12):   # nn.LayerNorm(d_model, eps=1e-12)
    mu = jnp.mean(v, axis=-1, keepdims=True)
    c = v - mu
    var = jnp.mean(c * c, axis=-1, keepdims=True)
    return c * jax.lax.rsqrt(var + eps) * w + b


# ---------------------------------- kernel ----------------------------------

KERNEL_PARAM_ORDER = [
    "win", "wconv", "bconv", "wxprojf", "bdt",
    "alogT", "dvec", "wout",
    "ln1_w", "ln1_b", "w1", "b1", "w2", "b2", "ln2_w", "ln2_b",
]
# Large matmul weights are pre-cast to bf16 in the wrapper (bf16 MXU path, f32 accum).
BF16_PARAMS = {"win", "wxprojf", "wout", "w1", "w2"}


def mamba_layer_kernel(
    x_ref,
    win_ref, wconv_ref, bconv_ref, wxproj_ref, bdt_ref,
    alogT_ref, dvec_ref, wout_ref,
    ln1w_ref, ln1b_ref,
    w1_ref, b1_ref, w2_ref, b2_ref, ln2w_ref, ln2b_ref,
    out_ref,
    *scratch,
    num_layers):
    f32 = jnp.float32
    bf16 = jnp.bfloat16

    Bt, L, D = x_ref.shape
    d_inner = wout_ref.shape[0]
    d_state = alogT_ref.shape[0]
    d_conv = wconv_ref.shape[0]
    N = Bt * L

    dA_bufs = scratch[:Bt]      # per-row exp(dt*A) staging
    h_bufs = scratch[Bt:]       # per-row dBu staging; overwritten in place with h_t

    def mxu(a, w_ref):          # bf16 operands, f32 accumulation
        return jnp.dot(a.astype(bf16), w_ref[...], preferred_element_type=f32)

    # ---------------- Mamba block ----------------
    xf = x_ref[...].reshape(N, D)                       # (Bt*L, d_model)

    # fused in_proj (no bias): [x-half | z-half] in one matmul, sliced afterwards
    xz = mxu(xf, win_ref)                               # (N, 2*d_inner)
    xin = xz[:, :d_inner]
    z = xz[:, d_inner:]

    # depthwise causal conv1d (kernel d_conv, left zero pad) + SiLU, per batch row.
    # Shifted copies via XLU rolls + causal mask (no pad-concat / unaligned slices).
    wc = wconv_ref[...]                                 # (d_conv, d_inner)
    row = jax.lax.broadcasted_iota(jnp.int32, (L, 1), 0)
    u_rows = []
    for b in range(Bt):
        xb = xin[b * L:(b + 1) * L]                     # (L, d_inner)
        acc = wc[d_conv - 1:d_conv, :] * xb             # tap j = 0
        for j in range(1, d_conv):
            shifted = pltpu.roll(xb, shift=j, axis=0)   # row t <- xb[t - j] (wrapped)
            shifted = jnp.where(row >= j, shifted, 0.0)  # zero wrapped rows (causal pad)
            acc = acc + wc[d_conv - 1 - j:d_conv - j, :] * shifted
        u_rows.append(acc)
    # TODO(synk): pltpu.roll along the sublane axis is only validated for L % 8 == 0.
    u = _silu(jnp.concatenate(u_rows, axis=0) + bconv_ref[...])      # (N, d_inner)

    # fused x_proj (+ folded dt_proj) -> [dt | B | C] in one matmul
    proj = mxu(u, wxproj_ref)                           # (N, d_inner + 2*d_state)
    dt = _softplus(proj[:, :d_inner] + bdt_ref[...])    # (N, d_inner)
    Bm = proj[:, d_inner:d_inner + d_state]             # (N, d_state)
    Cm = proj[:, d_inner + d_state:]                    # (N, d_state)

    # selective scan:  h_t = exp(dt_t*A) * h_{t-1} + dt_t*B_t*u_t ;  y_t = C_t.h_t + D*u_t
    # Batched precompute of the decay and input term; the serial loop carries Bt
    # independent (d_state, d_inner) states and overwrites the dBu staging with h_t.
    At = -jnp.exp(alogT_ref[...])                       # (d_state, d_inner)
    du = dt * u                                         # (N, d_inner)
    for b in range(Bt):
        sl = slice(b * L, (b + 1) * L)
        dt_b, du_b, Bm_b = dt[sl], du[sl], Bm[sl]
        # TODO(synk): check lowered MLIR for this lane->sublane broadcast of Bm/Cm; if it
        # emits per-row shuffles, add one bulk XLU transpose of Bm/Cm first.
        dA_bufs[b][...] = jnp.exp(dt_b[:, None, :] * At[None, :, :])   # (L, d_state, d_inner)
        h_bufs[b][...] = Bm_b[:, :, None] * du_b[:, None, :]           # dBu staging

    def scan_step(t, carry):
        new = []
        for b in range(Bt):
            h_b = dA_bufs[b][t] * carry[b] + h_bufs[b][t]
            h_bufs[b][t] = h_b                          # reuse buffer as h_t history
            new.append(h_b)
        return tuple(new)

    init = tuple(jnp.zeros((d_state, d_inner), f32) for _ in range(Bt))
    unroll = max(c for c in (8, 4, 2, 1) if L % c == 0)
    jax.lax.fori_loop(0, L, scan_step, init, unroll=unroll)

    # y_t = C_t . h_t  (batched multiply-reduce over d_state), then skip + gate + out_proj
    y_rows = []
    for b in range(Bt):
        Cm_b = Cm[b * L:(b + 1) * L]                    # (L, d_state)
        y_rows.append(jnp.sum(Cm_b[:, :, None] * h_bufs[b][...], axis=1))
    y = jnp.concatenate(y_rows, axis=0)                 # (N, d_inner)
    y = y + u * dvec_ref[...]
    y = y * _silu(z)
    m_out = mxu(y, wout_ref)                            # (N, d_model)

    # ---------------- MambaLayer glue (dropout == identity in eval mode) ----------------
    if num_layers == 1:
        h1 = _layer_norm(m_out, ln1w_ref[...], ln1b_ref[...])
    else:
        h1 = _layer_norm(m_out + xf, ln1w_ref[...], ln1b_ref[...])

    # ---------------- FeedForward (GELU MLP + residual LayerNorm) ----------------
    f = _gelu(mxu(h1, w1_ref) + b1_ref[...])
    f = mxu(f, w2_ref) + b2_ref[...]
    out = _layer_norm(f + h1, ln2w_ref[...], ln2b_ref[...])

    out_ref[...] = out.reshape(Bt, L, D).astype(out_ref.dtype)


# ---------------------------------- wrapper ----------------------------------

def mamba_layer(x, params, num_layers):
    B, L, D = x.shape
    d_inner = params["wout"].shape[0]
    d_state = params["alogT"].shape[0]
    dt_rank = params["wdt"].shape[0]

    # Rows per grid program: largest of 8/4/2/1 dividing B whose scan scratch
    # (2 * Bt * L * d_state * d_inner f32) stays under a ~24 MiB budget.
    Bt = 1
    for bt in (8, 4, 2):
        if B % bt == 0 and 2 * bt * L * d_state * d_inner * 4 <= (24 << 20):
            Bt = bt
            break
    # TODO(synk): for long sequences add a second grid axis over sequence chunks
    # ("arbitrary") carrying h_t and the conv tail in persistent VMEM scratch, and set
    # vmem_limit_bytes explicitly — required on v7x (64 MiB VMEM) at realistic L/d_inner.
    # TODO(synk): pad d_model/d_inner to multiples of 128 (lane-dense stores/slices) and
    # optionally emit bf16 activations at the call boundary for v5e's HBM bandwidth.

    # Fold dt_proj into x_proj: one (d_inner, d_inner + 2*d_state) weight, laid out [dt|B|C].
    wxprojf = jnp.concatenate(
        [params["wxproj"][:, :dt_rank] @ params["wdt"], params["wxproj"][:, dt_rank:]],
        axis=1)
    kp = dict(params, wxprojf=wxprojf)

    weights = [kp[k].astype(jnp.bfloat16) if k in BF16_PARAMS else kp[k]
               for k in KERNEL_PARAM_ORDER]

    kernel = functools.partial(mamba_layer_kernel, num_layers=num_layers)

    # Advisory cost estimate so XLA schedules surrounding ops around the call correctly.
    flops = int(2 * B * L * (D * 2 * d_inner + d_inner * (d_inner + 2 * d_state)
                             + d_inner * D + 8 * D * D)
                + 6 * B * L * d_state * d_inner)
    transcendentals = int(B * L * (d_state * d_inner + 6 * d_inner + 6 * D))
    bytes_accessed = int(8 * B * L * D
                         + sum(int(w.size) * w.dtype.itemsize for w in weights))
    cost = pl.CostEstimate(flops=flops, transcendentals=transcendentals,
                           bytes_accessed=bytes_accessed)

    def run(single_buffer_weights):
        def wspec(a):
            nd = a.ndim
            idx = lambda b, _nd=nd: (0,) * _nd
            if single_buffer_weights:
                # Grid-invariant weights: one resident VMEM buffer instead of two.
                return pl.BlockSpec(a.shape, idx, pipeline_mode=pl.Buffered(1))
            return pl.BlockSpec(a.shape, idx)

        in_specs = [pl.BlockSpec((Bt, L, D), lambda b: (b, 0, 0))]
        in_specs += [wspec(w) for w in weights]
        out_spec = pl.BlockSpec((Bt, L, D), lambda b: (b, 0, 0))

        return pl.pallas_call(
            kernel,
            out_shape=jax.ShapeDtypeStruct((B, L, D), jnp.float32),
            grid=(B // Bt,),                            # one program per Bt batch rows
            in_specs=in_specs,
            out_specs=out_spec,
            scratch_shapes=(
                [pltpu.VMEM((L, d_state, d_inner), jnp.float32) for _ in range(Bt)]    # dA
                + [pltpu.VMEM((L, d_state, d_inner), jnp.float32) for _ in range(Bt)]  # dBu/h
            ),
            compiler_params=pltpu.CompilerParams(
                dimension_semantics=("parallel",)),     # shard batch chunks across TCs
            cost_estimate=cost,
        )(x, *weights)

    try:
        return run(True)
    except Exception:
        # pipeline_mode / pl.Buffered(1) not supported by this jax build: fall back to
        # default double-buffered weight specs (correctness unaffected).
        return run(False)


# ----------------------------- parameter init (synthetic) -----------------------------

def init_params(key, d_model, d_state, d_conv, expand):
    d_inner = expand * d_model
    dt_rank = math.ceil(d_model / 16)
    ks = jax.random.split(key, 11)

    def lin(k, shape, scale=0.02):
        return (scale * jax.random.normal(k, shape)).astype(jnp.float32)

    W_in = lin(ks[0], (2 * d_inner, d_model))                 # in_proj.weight
    conv_w = lin(ks[1], (d_inner, 1, d_conv), 0.1)            # conv1d.weight (depthwise)
    conv_b = lin(ks[2], (d_inner,), 0.1)                      # conv1d.bias
    W_xproj = lin(ks[3], (dt_rank + 2 * d_state, d_inner))    # x_proj.weight
    W_dt = lin(ks[4], (d_inner, dt_rank), 0.1)                # dt_proj.weight
    b_dt = lin(ks[5], (d_inner,), 0.1)                        # dt_proj.bias
    A_log = jnp.log(jnp.broadcast_to(
        jnp.arange(1, d_state + 1, dtype=jnp.float32), (d_inner, d_state)))
    Dv = jnp.ones((d_inner,), jnp.float32)
    W_out = lin(ks[6], (d_model, d_inner))                    # out_proj.weight
    W1 = lin(ks[7], (4 * d_model, d_model))                   # ffn.w_1
    b1 = lin(ks[8], (4 * d_model,), 0.02)
    W2 = lin(ks[9], (d_model, 4 * d_model))                   # ffn.w_2
    b2 = lin(ks[10], (d_model,), 0.02)

    return dict(
        win=W_in.T,                                           # (d_model, 2*d_inner)
        wconv=conv_w[:, 0, :].T,                              # (d_conv, d_inner)
        bconv=conv_b[None, :],
        wxproj=W_xproj.T,                                     # (d_inner, dt_rank + 2*d_state)
        wdt=W_dt.T, bdt=b_dt[None, :],                        # (dt_rank, d_inner), (1, d_inner)
        alogT=A_log.T,                                        # (d_state, d_inner)
        dvec=Dv[None, :],
        wout=W_out.T,                                         # (d_inner, d_model)
        ln1_w=jnp.ones((1, d_model), jnp.float32), ln1_b=jnp.zeros((1, d_model), jnp.float32),
        w1=W1.T, b1=b1[None, :], w2=W2.T, b2=b2[None, :],
        ln2_w=jnp.ones((1, d_model), jnp.float32), ln2_b=jnp.zeros((1, d_model), jnp.float32),
    )


# ----------------------------- pure-JAX reference -----------------------------

def ref_forward(x, p, num_layers):
    def ln(v, w, b):
        mu = v.mean(-1, keepdims=True)
        var = ((v - mu) ** 2).mean(-1, keepdims=True)
        return (v - mu) * jax.lax.rsqrt(var + 1e-12) * w + b

    d_inner = p["wout"].shape[0]
    d_state = p["alogT"].shape[0]
    dt_rank = p["wdt"].shape[0]
    d_conv = p["wconv"].shape[0]

    def one(xb):
        L = xb.shape[0]
        xz = xb @ p["win"]
        xin, z = xz[:, :d_inner], xz[:, d_inner:]
        xpad = jnp.concatenate([jnp.zeros((d_conv - 1, d_inner), jnp.float32), xin], 0)
        conv = sum(p["wconv"][k:k + 1] * xpad[k:k + L] for k in range(d_conv)) + p["bconv"]
        u = jax.nn.silu(conv)
        proj = u @ p["wxproj"]
        dt_in = proj[:, :dt_rank]
        Bm = proj[:, dt_rank:dt_rank + d_state]
        Cm = proj[:, dt_rank + d_state:]
        dt = jax.nn.softplus(dt_in @ p["wdt"] + p["bdt"])
        A = -jnp.exp(p["alogT"]).T                             # (d_inner, d_state)

        def step(h, inp):
            dt_t, u_t, B_t, C_t = inp
            dA = jnp.exp(dt_t[:, None] * A)
            h = dA * h + (dt_t * u_t)[:, None] * B_t[None, :]
            y_t = h @ C_t + p["dvec"][0] * u_t
            return h, y_t

        _, ys = jax.lax.scan(step, jnp.zeros((d_inner, d_state), jnp.float32),
                             (dt, u, Bm, Cm))
        y = ys * jax.nn.silu(z)
        m_out = y @ p["wout"]
        res = m_out if num_layers == 1 else m_out + xb
        h1 = ln(res, p["ln1_w"], p["ln1_b"])
        f = jax.nn.gelu(h1 @ p["w1"] + p["b1"], approximate=False)
        f = f @ p["w2"] + p["b2"]
        return ln(f + h1, p["ln2_w"], p["ln2_b"])

    return jax.vmap(one)(x)


# ------------------------------------ main ------------------------------------

if __name__ == "__main__":
    B, L = 2, 8
    d_model, d_state, d_conv, expand = 32, 16, 4, 2
    num_layers = 2                      # exercises the residual branch

    key = jax.random.PRNGKey(0)
    kx, kp = jax.random.split(key)
    x = jax.random.normal(kx, (B, L, d_model), dtype=jnp.float32)
    params = init_params(kp, d_model, d_state, d_conv, expand)

    out = jax.block_until_ready(mamba_layer(x, params, num_layers))
    ref = jax.block_until_ready(ref_forward(x, params, num_layers))

    assert out.shape == (B, L, d_model)
    max_err = float(jnp.max(jnp.abs(out - ref)))
    # bf16 MXU operands (f32 accumulation) + erf polynomial: differences vs. the pure-f32
    # reference are at the bf16 input-rounding level (~1e-3 on LayerNorm-scale outputs).
    assert max_err < 1e-2, f"kernel/reference mismatch: {max_err}"
    print("KERNEL_OK")
</pallas_src>

<mosaic_0001>
module attributes {stable_mosaic.version = 11 : i64} {
  func.func @mamba_layer_kernel(%arg0: i32, %arg1: memref<2x8x32xf32, #tpu.memory_space<vmem>>, %arg2: memref<32x128xbf16, #tpu.memory_space<vmem>>, %arg3: memref<4x64xf32, #tpu.memory_space<vmem>>, %arg4: memref<1x64xf32, #tpu.memory_space<vmem>>, %arg5: memref<64x96xbf16, #tpu.memory_space<vmem>>, %arg6: memref<1x64xf32, #tpu.memory_space<vmem>>, %arg7: memref<16x64xf32, #tpu.memory_space<vmem>>, %arg8: memref<1x64xf32, #tpu.memory_space<vmem>>, %arg9: memref<64x32xbf16, #tpu.memory_space<vmem>>, %arg10: memref<1x32xf32, #tpu.memory_space<vmem>>, %arg11: memref<1x32xf32, #tpu.memory_space<vmem>>, %arg12: memref<32x128xbf16, #tpu.memory_space<vmem>>, %arg13: memref<1x128xf32, #tpu.memory_space<vmem>>, %arg14: memref<128x32xbf16, #tpu.memory_space<vmem>>, %arg15: memref<1x32xf32, #tpu.memory_space<vmem>>, %arg16: memref<1x32xf32, #tpu.memory_space<vmem>>, %arg17: memref<1x32xf32, #tpu.memory_space<vmem>>, %arg18: memref<2x8x32xf32, #tpu.memory_space<vmem>>, %arg19: memref<8x16x64xf32, #tpu.memory_space<vmem>>, %arg20: memref<8x16x64xf32, #tpu.memory_space<vmem>>, %arg21: memref<8x16x64xf32, #tpu.memory_space<vmem>>, %arg22: memref<8x16x64xf32, #tpu.memory_space<vmem>>) attributes {dimension_semantics = [#tpu.dimension_semantics<parallel>], iteration_bounds = array<i64: 1>, scalar_prefetch = 0 : i64, scratch_operands = 4 : i64, tpu.core_type = #tpu.core_type<tc>, window_params = [{transform_indices = @transform_0, window_bounds = array<i64: 2, 8, 32>}, {pipeline_mode = #tpu.pipeline_mode<synchronous>, transform_indices = @transform_1, window_bounds = array<i64: 32, 128>}, {pipeline_mode = #tpu.pipeline_mode<synchronous>, transform_indices = @transform_2, window_bounds = array<i64: 4, 64>}, {pipeline_mode = #tpu.pipeline_mode<synchronous>, transform_indices = @transform_3, window_bounds = array<i64: 1, 64>}, {pipeline_mode = #tpu.pipeline_mode<synchronous>, transform_indices = @transform_4, window_bounds = array<i64: 64, 96>}, {pipeline_mode = #tpu.pipeline_mode<synchronous>, transform_indices = @transform_5, window_bounds = array<i64: 1, 64>}, {pipeline_mode = #tpu.pipeline_mode<synchronous>, transform_indices = @transform_6, window_bounds = array<i64: 16, 64>}, {pipeline_mode = #tpu.pipeline_mode<synchronous>, transform_indices = @transform_7, window_bounds = array<i64: 1, 64>}, {pipeline_mode = #tpu.pipeline_mode<synchronous>, transform_indices = @transform_8, window_bounds = array<i64: 64, 32>}, {pipeline_mode = #tpu.pipeline_mode<synchronous>, transform_indices = @transform_9, window_bounds = array<i64: 1, 32>}, {pipeline_mode = #tpu.pipeline_mode<synchronous>, transform_indices = @transform_10, window_bounds = array<i64: 1, 32>}, {pipeline_mode = #tpu.pipeline_mode<synchronous>, transform_indices = @transform_11, window_bounds = array<i64: 32, 128>}, {pipeline_mode = #tpu.pipeline_mode<synchronous>, transform_indices = @transform_12, window_bounds = array<i64: 1, 128>}, {pipeline_mode = #tpu.pipeline_mode<synchronous>, transform_indices = @transform_13, window_bounds = array<i64: 128, 32>}, {pipeline_mode = #tpu.pipeline_mode<synchronous>, transform_indices = @transform_14, window_bounds = array<i64: 1, 32>}, {pipeline_mode = #tpu.pipeline_mode<synchronous>, transform_indices = @transform_15, window_bounds = array<i64: 1, 32>}, {pipeline_mode = #tpu.pipeline_mode<synchronous>, transform_indices = @transform_16, window_bounds = array<i64: 1, 32>}, {transform_indices = @transform_17, window_bounds = array<i64: 2, 8, 32>}]} {
    %c0 = arith.constant 0 : index
    %c0_0 = arith.constant 0 : index
    %c0_1 = arith.constant 0 : index
    %0 = vector.load %arg1[%c0, %c0_0, %c0_1] : memref<2x8x32xf32, #tpu.memory_space<vmem>>, vector<2x8x32xf32>
    %1 = vector.shape_cast %0 : vector<2x8x32xf32> to vector<16x32xf32>
    %2 = arith.truncf %1 : vector<16x32xf32> to vector<16x32xbf16>
    %c0_2 = arith.constant 0 : index
    %c0_3 = arith.constant 0 : index
    %3 = vector.load %arg2[%c0_2, %c0_3] : memref<32x128xbf16, #tpu.memory_space<vmem>>, vector<32x128xbf16>
    %cst = arith.constant dense<0.000000e+00> : vector<16x128xf32>
    %4 = tpu.matmul %2, %3, %cst {dimension_numbers = #tpu.dot_dimension_numbers<[1], [0], [0], [1], [0, 0, 1, 1], [], []>} : vector<16x32xbf16>, vector<32x128xbf16>, vector<16x128xf32> -> vector<16x128xf32>
    %5 = vector.extract_strided_slice %4 {offsets = [0, 0], sizes = [16, 64], strides = [1, 1]} : vector<16x128xf32> to vector<16x64xf32>
    %6 = vector.extract_strided_slice %4 {offsets = [0, 64], sizes = [16, 64], strides = [1, 1]} : vector<16x128xf32> to vector<16x64xf32>
    %c0_4 = arith.constant 0 : index
    %c0_5 = arith.constant 0 : index
    %7 = vector.load %arg3[%c0_4, %c0_5] : memref<4x64xf32, #tpu.memory_space<vmem>>, vector<4x64xf32>
    %8 = tpu.iota {dimensions = array<i32: 0>} : vector<8x1xi32>
    %9 = vector.extract_strided_slice %5 {offsets = [0, 0], sizes = [8, 64], strides = [1, 1]} : vector<16x64xf32> to vector<8x64xf32>
    %10 = vector.extract_strided_slice %7 {offsets = [3, 0], sizes = [1, 64], strides = [1, 1]} : vector<4x64xf32> to vector<1x64xf32>
    %11 = vector.broadcast %10 : vector<1x64xf32> to vector<8x64xf32>
    %12 = arith.mulf %11, %9 : vector<8x64xf32>
    %c1_i32 = arith.constant 1 : i32
    %13 = tpu.dynamic_rotate %9 by %c1_i32 dim 0 : vector<8x64xf32>, i32 -> vector<8x64xf32>
    %c1_i32_6 = arith.constant 1 : i32
    %14 = vector.broadcast %c1_i32_6 : i32 to vector<8x1xi32>
    %15 = arith.cmpi sge, %8, %14 : vector<8x1xi32>
    %cst_7 = arith.constant 0.000000e+00 : f32
    %16 = vector.shape_cast %15 : vector<8x1xi1> to vector<8x1xi1>
    %17 = vector.broadcast %16 : vector<8x1xi1> to vector<8x64xi1>
    %18 = vector.broadcast %cst_7 : f32 to vector<8x64xf32>
    %19 = arith.select %17, %13, %18 : vector<8x64xi1>, vector<8x64xf32>
    %20 = vector.extract_strided_slice %7 {offsets = [2, 0], sizes = [1, 64], strides = [1, 1]} : vector<4x64xf32> to vector<1x64xf32>
    %21 = vector.broadcast %20 : vector<1x64xf32> to vector<8x64xf32>
    %22 = arith.mulf %21, %19 : vector<8x64xf32>
    %23 = arith.addf %12, %22 : vector<8x64xf32>
    %c2_i32 = arith.constant 2 : i32
    %24 = tpu.dynamic_rotate %9 by %c2_i32 dim 0 : vector<8x64xf32>, i32 -> vector<8x64xf32>
    %c2_i32_8 = arith.constant 2 : i32
    %25 = vector.broadcast %c2_i32_8 : i32 to vector<8x1xi32>
    %26 = arith.cmpi sge, %8, %25 : vector<8x1xi32>
    %cst_9 = arith.constant 0.000000e+00 : f32
    %27 = vector.shape_cast %26 : vector<8x1xi1> to vector<8x1xi1>
    %28 = vector.broadcast %27 : vector<8x1xi1> to vector<8x64xi1>
    %29 = vector.broadcast %cst_9 : f32 to vector<8x64xf32>
    %30 = arith.select %28, %24, %29 : vector<8x64xi1>, vector<8x64xf32>
    %31 = vector.extract_strided_slice %7 {offsets = [1, 0], sizes = [1, 64], strides = [1, 1]} : vector<4x64xf32> to vector<1x64xf32>
    %32 = vector.broadcast %31 : vector<1x64xf32> to vector<8x64xf32>
    %33 = arith.mulf %32, %30 : vector<8x64xf32>
    %34 = arith.addf %23, %33 : vector<8x64xf32>
    %c3_i32 = arith.constant 3 : i32
    %35 = tpu.dynamic_rotate %9 by %c3_i32 dim 0 : vector<8x64xf32>, i32 -> vector<8x64xf32>
    %c3_i32_10 = arith.constant 3 : i32
    %36 = vector.broadcast %c3_i32_10 : i32 to vector<8x1xi32>
    %37 = arith.cmpi sge, %8, %36 : vector<8x1xi32>
    %cst_11 = arith.constant 0.000000e+00 : f32
    %38 = vector.shape_cast %37 : vector<8x1xi1> to vector<8x1xi1>
    %39 = vector.broadcast %38 : vector<8x1xi1> to vector<8x64xi1>
    %40 = vector.broadcast %cst_11 : f32 to vector<8x64xf32>
    %41 = arith.select %39, %35, %40 : vector<8x64xi1>, vector<8x64xf32>
    %42 = vector.extract_strided_slice %7 {offsets = [0, 0], sizes = [1, 64], strides = [1, 1]} : vector<4x64xf32> to vector<1x64xf32>
    %43 = vector.broadcast %42 : vector<1x64xf32> to vector<8x64xf32>
    %44 = arith.mulf %43, %41 : vector<8x64xf32>
    %45 = arith.addf %34, %44 : vector<8x64xf32>
    %46 = vector.extract_strided_slice %5 {offsets = [8, 0], sizes = [8, 64], strides = [1, 1]} : vector<16x64xf32> to vector<8x64xf32>
    %47 = vector.extract_strided_slice %7 {offsets = [3, 0], sizes = [1, 64], strides = [1, 1]} : vector<4x64xf32> to vector<1x64xf32>
    %48 = vector.broadcast %47 : vector<1x64xf32> to vector<8x64xf32>
    %49 = arith.mulf %48, %46 : vector<8x64xf32>
    %c1_i32_12 = arith.constant 1 : i32
    %50 = tpu.dynamic_rotate %46 by %c1_i32_12 dim 0 : vector<8x64xf32>, i32 -> vector<8x64xf32>
    %c1_i32_13 = arith.constant 1 : i32
    %51 = vector.broadcast %c1_i32_13 : i32 to vector<8x1xi32>
    %52 = arith.cmpi sge, %8, %51 : vector<8x1xi32>
    %cst_14 = arith.constant 0.000000e+00 : f32
    %53 = vector.shape_cast %52 : vector<8x1xi1> to vector<8x1xi1>
    %54 = vector.broadcast %53 : vector<8x1xi1> to vector<8x64xi1>
    %55 = vector.broadcast %cst_14 : f32 to vector<8x64xf32>
    %56 = arith.select %54, %50, %55 : vector<8x64xi1>, vector<8x64xf32>
    %57 = vector.extract_strided_slice %7 {offsets = [2, 0], sizes = [1, 64], strides = [1, 1]} : vector<4x64xf32> to vector<1x64xf32>
    %58 = vector.broadcast %57 : vector<1x64xf32> to vector<8x64xf32>
    %59 = arith.mulf %58, %56 : vector<8x64xf32>
    %60 = arith.addf %49, %59 : vector<8x64xf32>
    %c2_i32_15 = arith.constant 2 : i32
    %61 = tpu.dynamic_rotate %46 by %c2_i32_15 dim 0 : vector<8x64xf32>, i32 -> vector<8x64xf32>
    %c2_i32_16 = arith.constant 2 : i32
    %62 = vector.broadcast %c2_i32_16 : i32 to vector<8x1xi32>
    %63 = arith.cmpi sge, %8, %62 : vector<8x1xi32>
    %cst_17 = arith.constant 0.000000e+00 : f32
    %64 = vector.shape_cast %63 : vector<8x1xi1> to vector<8x1xi1>
    %65 = vector.broadcast %64 : vector<8x1xi1> to vector<8x64xi1>
    %66 = vector.broadcast %cst_17 : f32 to vector<8x64xf32>
    %67 = arith.select %65, %61, %66 : vector<8x64xi1>, vector<8x64xf32>
    %68 = vector.extract_strided_slice %7 {offsets = [1, 0], sizes = [1, 64], strides = [1, 1]} : vector<4x64xf32> to vector<1x64xf32>
    %69 = vector.broadcast %68 : vector<1x64xf32> to vector<8x64xf32>
    %70 = arith.mulf %69, %67 : vector<8x64xf32>
    %71 = arith.addf %60, %70 : vector<8x64xf32>
    %c3_i32_18 = arith.constant 3 : i32
    %72 = tpu.dynamic_rotate %46 by %c3_i32_18 dim 0 : vector<8x64xf32>, i32 -> vector<8x64xf32>
    %c3_i32_19 = arith.constant 3 : i32
    %73 = vector.broadcast %c3_i32_19 : i32 to vector<8x1xi32>
    %74 = arith.cmpi sge, %8, %73 : vector<8x1xi32>
    %cst_20 = arith.constant 0.000000e+00 : f32
    %75 = vector.shape_cast %74 : vector<8x1xi1> to vector<8x1xi1>
    %76 = vector.broadcast %75 : vector<8x1xi1> to vector<8x64xi1>
    %77 = vector.broadcast %cst_20 : f32 to vector<8x64xf32>
    %78 = arith.select %76, %72, %77 : vector<8x64xi1>, vector<8x64xf32>
    %79 = vector.extract_strided_slice %7 {offsets = [0, 0], sizes = [1, 64], strides = [1, 1]} : vector<4x64xf32> to vector<1x64xf32>
    %80 = vector.broadcast %79 : vector<1x64xf32> to vector<8x64xf32>
    %81 = arith.mulf %80, %78 : vector<8x64xf32>
    %82 = arith.addf %71, %81 : vector<8x64xf32>
    %83 = tpu.concatenate %45, %82 in 0 : vector<8x64xf32>, vector<8x64xf32> -> vector<16x64xf32>
    %c0_21 = arith.constant 0 : index
    %c0_22 = arith.constant 0 : index
    %84 = vector.load %arg4[%c0_21, %c0_22] : memref<1x64xf32, #tpu.memory_space<vmem>>, vector<1x64xf32>
    %85 = vector.broadcast %84 : vector<1x64xf32> to vector<16x64xf32>
    %86 = arith.addf %83, %85 : vector<16x64xf32>
    %87 = arith.negf %86 : vector<16x64xf32>
    %88 = math.exp %87 : vector<16x64xf32>
    %cst_23 = arith.constant 1.000000e+00 : f32
    %89 = vector.broadcast %cst_23 : f32 to vector<16x64xf32>
    %90 = arith.addf %89, %88 : vector<16x64xf32>
    %91 = arith.divf %89, %90 : vector<16x64xf32>
    %92 = arith.mulf %86, %91 : vector<16x64xf32>
    %93 = arith.truncf %92 : vector<16x64xf32> to vector<16x64xbf16>
    %c0_24 = arith.constant 0 : index
    %c0_25 = arith.constant 0 : index
    %94 = vector.load %arg5[%c0_24, %c0_25] : memref<64x96xbf16, #tpu.memory_space<vmem>>, vector<64x96xbf16>
    %cst_26 = arith.constant dense<0.000000e+00> : vector<16x96xf32>
    %95 = tpu.matmul %93, %94, %cst_26 {dimension_numbers = #tpu.dot_dimension_numbers<[1], [0], [0], [1], [0, 0, 1, 1], [], []>} : vector<16x64xbf16>, vector<64x96xbf16>, vector<16x96xf32> -> vector<16x96xf32>
    %96 = vector.extract_strided_slice %95 {offsets = [0, 0], sizes = [16, 64], strides = [1, 1]} : vector<16x96xf32> to vector<16x64xf32>
    %c0_27 = arith.constant 0 : index
    %c0_28 = arith.constant 0 : index
    %97 = vector.load %arg6[%c0_27, %c0_28] : memref<1x64xf32, #tpu.memory_space<vmem>>, vector<1x64xf32>
    %98 = vector.broadcast %97 : vector<1x64xf32> to vector<16x64xf32>
    %99 = arith.addf %96, %98 : vector<16x64xf32>
    %cst_29 = arith.constant 2.000000e+01 : f32
    %100 = vector.broadcast %cst_29 : f32 to vector<16x64xf32>
    %101 = arith.minimumf %99, %100 : vector<16x64xf32>
    %102 = math.exp %101 : vector<16x64xf32>
    %cst_30 = arith.constant 1.000000e+00 : f32
    %103 = vector.broadcast %cst_30 : f32 to vector<16x64xf32>
    %104 = arith.addf %103, %102 : vector<16x64xf32>
    %cst_31 = arith.constant 1.000000e+00 : f32
    %105 = vector.broadcast %cst_31 : f32 to vector<16x64xf32>
    %106 = arith.cmpf oeq, %104, %105 : vector<16x64xf32>
    %107 = math.log %104 : vector<16x64xf32>
    %cst_32 = arith.constant 1.000000e+00 : f32
    %108 = vector.broadcast %cst_32 : f32 to vector<16x64xf32>
    %109 = arith.subf %104, %108 : vector<16x64xf32>
    %110 = arith.divf %102, %109 : vector<16x64xf32>
    %111 = arith.mulf %107, %110 : vector<16x64xf32>
    %112 = arith.select %106, %102, %111 : vector<16x64xi1>, vector<16x64xf32>
    %cst_33 = arith.constant 2.000000e+01 : f32
    %113 = vector.broadcast %cst_33 : f32 to vector<16x64xf32>
    %114 = arith.cmpf ogt, %99, %113 : vector<16x64xf32>
    %115 = arith.select %114, %99, %112 : vector<16x64xi1>, vector<16x64xf32>
    %116 = vector.extract_strided_slice %95 {offsets = [0, 64], sizes = [16, 16], strides = [1, 1]} : vector<16x96xf32> to vector<16x16xf32>
    %117 = vector.extract_strided_slice %95 {offsets = [0, 80], sizes = [16, 16], strides = [1, 1]} : vector<16x96xf32> to vector<16x16xf32>
    %c0_34 = arith.constant 0 : index
    %c0_35 = arith.constant 0 : index
    %118 = vector.load %arg7[%c0_34, %c0_35] : memref<16x64xf32, #tpu.memory_space<vmem>>, vector<16x64xf32>
    %119 = math.exp %118 : vector<16x64xf32>
    %cst_36 = arith.constant 0.000000e+00 : f32
    %120 = vector.broadcast %cst_36 : f32 to vector<16x64xf32>
    %121 = arith.subf %120, %119 : vector<16x64xf32>
    %122 = arith.mulf %115, %92 : vector<16x64xf32>
    %123 = vector.extract_strided_slice %115 {offsets = [0, 0], sizes = [8, 64], strides = [1, 1]} : vector<16x64xf32> to vector<8x64xf32>
    %124 = vector.extract_strided_slice %122 {offsets = [0, 0], sizes = [8, 64], strides = [1, 1]} : vector<16x64xf32> to vector<8x64xf32>
    %125 = vector.extract_strided_slice %116 {offsets = [0, 0], sizes = [8, 16], strides = [1, 1]} : vector<16x16xf32> to vector<8x16xf32>
    %126 = vector.shape_cast %123 : vector<8x64xf32> to vector<8x1x64xf32>
    %127 = vector.shape_cast %121 : vector<16x64xf32> to vector<1x16x64xf32>
    %128 = vector.broadcast %126 : vector<8x1x64xf32> to vector<8x16x64xf32>
    %129 = vector.broadcast %127 : vector<1x16x64xf32> to vector<8x16x64xf32>
    %130 = arith.mulf %128, %129 : vector<8x16x64xf32>
    %131 = math.exp %130 : vector<8x16x64xf32>
    %c0_37 = arith.constant 0 : index
    %c0_38 = arith.constant 0 : index
    %c0_39 = arith.constant 0 : index
    %132 = vector.load %arg19[%c0_37, %c0_38, %c0_39] : memref<8x16x64xf32, #tpu.memory_space<vmem>>, vector<8x16x64xf32>
    tpu.vector_store %arg19[%c0_37, %c0_38, %c0_39], %131 {strides = array<i32>} : memref<8x16x64xf32, #tpu.memory_space<vmem>>, vector<8x16x64xf32>,
    %133 = vector.shape_cast %125 : vector<8x16xf32> to vector<8x16x1xf32>
    %134 = vector.shape_cast %124 : vector<8x64xf32> to vector<8x1x64xf32>
    %135 = vector.broadcast %133 : vector<8x16x1xf32> to vector<8x16x64xf32>
    %136 = vector.broadcast %134 : vector<8x1x64xf32> to vector<8x16x64xf32>
    %137 = arith.mulf %135, %136 : vector<8x16x64xf32>
    %c0_40 = arith.constant 0 : index
    %c0_41 = arith.constant 0 : index
    %c0_42 = arith.constant 0 : index
    %138 = vector.load %arg21[%c0_40, %c0_41, %c0_42] : memref<8x16x64xf32, #tpu.memory_space<vmem>>, vector<8x16x64xf32>
    tpu.vector_store %arg21[%c0_40, %c0_41, %c0_42], %137 {strides = array<i32>} : memref<8x16x64xf32, #tpu.memory_space<vmem>>, vector<8x16x64xf32>,
    %139 = vector.extract_strided_slice %115 {offsets = [8, 0], sizes = [8, 64], strides = [1, 1]} : vector<16x64xf32> to vector<8x64xf32>
    %140 = vector.extract_strided_slice %122 {offsets = [8, 0], sizes = [8, 64], strides = [1, 1]} : vector<16x64xf32> to vector<8x64xf32>
    %141 = vector.extract_strided_slice %116 {offsets = [8, 0], sizes = [8, 16], strides = [1, 1]} : vector<16x16xf32> to vector<8x16xf32>
    %142 = vector.shape_cast %139 : vector<8x64xf32> to vector<8x1x64xf32>
    %143 = vector.shape_cast %121 : vector<16x64xf32> to vector<1x16x64xf32>
    %144 = vector.broadcast %142 : vector<8x1x64xf32> to vector<8x16x64xf32>
    %145 = vector.broadcast %143 : vector<1x16x64xf32> to vector<8x16x64xf32>
    %146 = arith.mulf %144, %145 : vector<8x16x64xf32>
    %147 = math.exp %146 : vector<8x16x64xf32>
    %c0_43 = arith.constant 0 : index
    %c0_44 = arith.constant 0 : index
    %c0_45 = arith.constant 0 : index
    %148 = vector.load %arg20[%c0_43, %c0_44, %c0_45] : memref<8x16x64xf32, #tpu.memory_space<vmem>>, vector<8x16x64xf32>
    tpu.vector_store %arg20[%c0_43, %c0_44, %c0_45], %147 {strides = array<i32>} : memref<8x16x64xf32, #tpu.memory_space<vmem>>, vector<8x16x64xf32>,
    %149 = vector.shape_cast %141 : vector<8x16xf32> to vector<8x16x1xf32>
    %150 = vector.shape_cast %140 : vector<8x64xf32> to vector<8x1x64xf32>
    %151 = vector.broadcast %149 : vector<8x16x1xf32> to vector<8x16x64xf32>
    %152 = vector.broadcast %150 : vector<8x1x64xf32> to vector<8x16x64xf32>
    %153 = arith.mulf %151, %152 : vector<8x16x64xf32>
    %c0_46 = arith.constant 0 : index
    %c0_47 = arith.constant 0 : index
    %c0_48 = arith.constant 0 : index
    %154 = vector.load %arg22[%c0_46, %c0_47, %c0_48] : memref<8x16x64xf32, #tpu.memory_space<vmem>>, vector<8x16x64xf32>
    tpu.vector_store %arg22[%c0_46, %c0_47, %c0_48], %153 {strides = array<i32>} : memref<8x16x64xf32, #tpu.memory_space<vmem>>, vector<8x16x64xf32>,
    %cst_49 = arith.constant 0.000000e+00 : f32
    %155 = vector.broadcast %cst_49 : f32 to vector<16x64xf32>
    %cst_50 = arith.constant 0.000000e+00 : f32
    %156 = vector.broadcast %cst_50 : f32 to vector<16x64xf32>
    %c0_i32 = arith.constant 0 : i32
    %157 = arith.index_cast %c0_i32 : i32 to index
    %c0_51 = arith.constant 0 : index
    %c0_52 = arith.constant 0 : index
    %158 = vector.load %arg19[%157, %c0_51, %c0_52] : memref<8x16x64xf32, #tpu.memory_space<vmem>>, vector<1x16x64xf32>
    %159 = vector.shape_cast %158 : vector<1x16x64xf32> to vector<16x64xf32>
    %160 = arith.mulf %159, %155 : vector<16x64xf32>
    %161 = arith.index_cast %c0_i32 : i32 to index
    %c0_53 = arith.constant 0 : index
    %c0_54 = arith.constant 0 : index
    %162 = vector.load %arg21[%161, %c0_53, %c0_54] : memref<8x16x64xf32, #tpu.memory_space<vmem>>, vector<1x16x64xf32>
    %163 = vector.shape_cast %162 : vector<1x16x64xf32> to vector<16x64xf32>
    %164 = arith.addf %160, %163 : vector<16x64xf32>
    %165 = arith.index_cast %c0_i32 : i32 to index
    %c0_55 = arith.constant 0 : index
    %c0_56 = arith.constant 0 : index
    %166 = vector.load %arg21[%165, %c0_55, %c0_56] : memref<8x16x64xf32, #tpu.memory_space<vmem>>, vector<1x16x64xf32>
    %167 = vector.shape_cast %166 : vector<1x16x64xf32> to vector<16x64xf32>
    %168 = vector.shape_cast %164 : vector<16x64xf32> to vector<1x16x64xf32>
    tpu.vector_store %arg21[%165, %c0_55, %c0_56], %168 {strides = array<i32>} : memref<8x16x64xf32, #tpu.memory_space<vmem>>, vector<1x16x64xf32>,
    %169 = arith.index_cast %c0_i32 : i32 to index
    %c0_57 = arith.constant 0 : index
    %c0_58 = arith.constant 0 : index
    %170 = vector.load %arg20[%169, %c0_57, %c0_58] : memref<8x16x64xf32, #tpu.memory_space<vmem>>, vector<1x16x64xf32>
    %171 = vector.shape_cast %170 : vector<1x16x64xf32> to vector<16x64xf32>
    %172 = arith.mulf %171, %156 : vector<16x64xf32>
    %173 = arith.index_cast %c0_i32 : i32 to index
    %c0_59 = arith.constant 0 : index
    %c0_60 = arith.constant 0 : index
    %174 = vector.load %arg22[%173, %c0_59, %c0_60] : memref<8x16x64xf32, #tpu.memory_space<vmem>>, vector<1x16x64xf32>
    %175 = vector.shape_cast %174 : vector<1x16x64xf32> to vector<16x64xf32>
    %176 = arith.addf %172, %175 : vector<16x64xf32>
    %177 = arith.index_cast %c0_i32 : i32 to index
    %c0_61 = arith.constant 0 : index
    %c0_62 = arith.constant 0 : index
    %178 = vector.load %arg22[%177, %c0_61, %c0_62] : memref<8x16x64xf32, #tpu.memory_space<vmem>>, vector<1x16x64xf32>
    %179 = vector.shape_cast %178 : vector<1x16x64xf32> to vector<16x64xf32>
    %180 = vector.shape_cast %176 : vector<16x64xf32> to vector<1x16x64xf32>
    tpu.vector_store %arg22[%177, %c0_61, %c0_62], %180 {strides = array<i32>} : memref<8x16x64xf32, #tpu.memory_space<vmem>>, vector<1x16x64xf32>,
    %c1_i32_63 = arith.constant 1 : i32
    %181 = arith.index_cast %c1_i32_63 : i32 to index
    %c0_64 = arith.constant 0 : index
    %c0_65 = arith.constant 0 : index
    %182 = vector.load %arg19[%181, %c0_64, %c0_65] : memref<8x16x64xf32, #tpu.memory_space<vmem>>, vector<1x16x64xf32>
    %183 = vector.shape_cast %182 : vector<1x16x64xf32> to vector<16x64xf32>
    %184 = arith.mulf %183, %164 : vector<16x64xf32>
    %185 = arith.index_cast %c1_i32_63 : i32 to index
    %c0_66 = arith.constant 0 : index
    %c0_67 = arith.constant 0 : index
    %186 = vector.load %arg21[%185, %c0_66, %c0_67] : memref<8x16x64xf32, #tpu.memory_space<vmem>>, vector<1x16x64xf32>
    %187 = vector.shape_cast %186 : vector<1x16x64xf32> to vector<16x64xf32>
    %188 = arith.addf %184, %187 : vector<16x64xf32>
    %189 = arith.index_cast %c1_i32_63 : i32 to index
    %c0_68 = arith.constant 0 : index
    %c0_69 = arith.constant 0 : index
    %190 = vector.load %arg21[%189, %c0_68, %c0_69] : memref<8x16x64xf32, #tpu.memory_space<vmem>>, vector<1x16x64xf32>
    %191 = vector.shape_cast %190 : vector<1x16x64xf32> to vector<16x64xf32>
    %192 = vector.shape_cast %188 : vector<16x64xf32> to vector<1x16x64xf32>
    tpu.vector_store %arg21[%189, %c0_68, %c0_69], %192 {strides = array<i32>} : memref<8x16x64xf32, #tpu.memory_space<vmem>>, vector<1x16x64xf32>,
    %193 = arith.index_cast %c1_i32_63 : i32 to index
    %c0_70 = arith.constant 0 : index
    %c0_71 = arith.constant 0 : index
    %194 = vector.load %arg20[%193, %c0_70, %c0_71] : memref<8x16x64xf32, #tpu.memory_space<vmem>>, vector<1x16x64xf32>
    %195 = vector.shape_cast %194 : vector<1x16x64xf32> to vector<16x64xf32>
    %196 = arith.mulf %195, %176 : vector<16x64xf32>
    %197 = arith.index_cast %c1_i32_63 : i32 to index
    %c0_72 = arith.constant 0 : index
    %c0_73 = arith.constant 0 : index
    %198 = vector.load %arg22[%197, %c0_72, %c0_73] : memref<8x16x64xf32, #tpu.memory_space<vmem>>, vector<1x16x64xf32>
    %199 = vector.shape_cast %198 : vector<1x16x64xf32> to vector<16x64xf32>
    %200 = arith.addf %196, %199 : vector<16x64xf32>
    %201 = arith.index_cast %c1_i32_63 : i32 to index
    %c0_74 = arith.constant 0 : index
    %c0_75 = arith.constant 0 : index
    %202 = vector.load %arg22[%201, %c0_74, %c0_75] : memref<8x16x64xf32, #tpu.memory_space<vmem>>, vector<1x16x64xf32>
    %203 = vector.shape_cast %202 : vector<1x16x64xf32> to vector<16x64xf32>
    %204 = vector.shape_cast %200 : vector<16x64xf32> to vector<1x16x64xf32>
    tpu.vector_store %arg22[%201, %c0_74, %c0_75], %204 {strides = array<i32>} : memref<8x16x64xf32, #tpu.memory_space<vmem>>, vector<1x16x64xf32>,
    %c2_i32_76 = arith.constant 2 : i32
    %205 = arith.index_cast %c2_i32_76 : i32 to index
    %c0_77 = arith.constant 0 : index
    %c0_78 = arith.constant 0 : index
    %206 = vector.load %arg19[%205, %c0_77, %c0_78] : memref<8x16x64xf32, #tpu.memory_space<vmem>>, vector<1x16x64xf32>
    %207 = vector.shape_cast %206 : vector<1x16x64xf32> to vector<16x64xf32>
    %208 = arith.mulf %207, %188 : vector<16x64xf32>
    %209 = arith.index_cast %c2_i32_76 : i32 to index
    %c0_79 = arith.constant 0 : index
    %c0_80 = arith.constant 0 : index
    %210 = vector.load %arg21[%209, %c0_79, %c0_80] : memref<8x16x64xf32, #tpu.memory_space<vmem>>, vector<1x16x64xf32>
    %211 = vector.shape_cast %210 : vector<1x16x64xf32> to vector<16x64xf32>
    %212 = arith.addf %208, %211 : vector<16x64xf32>
    %213 = arith.index_cast %c2_i32_76 : i32 to index
    %c0_81 = arith.constant 0 : index
    %c0_82 = arith.constant 0 : index
    %214 = vector.load %arg21[%213, %c0_81, %c0_82] : memref<8x16x64xf32, #tpu.memory_space<vmem>>, vector<1x16x64xf32>
    %215 = vector.shape_cast %214 : vector<1x16x64xf32> to vector<16x64xf32>
    %216 = vector.shape_cast %212 : vector<16x64xf32> to vector<1x16x64xf32>
    tpu.vector_store %arg21[%213, %c0_81, %c0_82], %216 {strides = array<i32>} : memref<8x16x64xf32, #tpu.memory_space<vmem>>, vector<1x16x64xf32>,
    %217 = arith.index_cast %c2_i32_76 : i32 to index
    %c0_83 = arith.constant 0 : index
    %c0_84 = arith.constant 0 : index
    %218 = vector.load %arg20[%217, %c0_83, %c0_84] : memref<8x16x64xf32, #tpu.memory_space<vmem>>, vector<1x16x64xf32>
    %219 = vector.shape_cast %218 : vector<1x16x64xf32> to vector<16x64xf32>
    %220 = arith.mulf %219, %200 : vector<16x64xf32>
    %221 = arith.index_cast %c2_i32_76 : i32 to index
    %c0_85 = arith.constant 0 : index
    %c0_86 = arith.constant 0 : index
    %222 = vector.load %arg22[%221, %c0_85, %c0_86] : memref<8x16x64xf32, #tpu.memory_space<vmem>>, vector<1x16x64xf32>
    %223 = vector.shape_cast %222 : vector<1x16x64xf32> to vector<16x64xf32>
    %224 = arith.addf %220, %223 : vector<16x64xf32>
    %225 = arith.index_cast %c2_i32_76 : i32 to index
    %c0_87 = arith.constant 0 : index
    %c0_88 = arith.constant 0 : index
    %226 = vector.load %arg22[%225, %c0_87, %c0_88] : memref<8x16x64xf32, #tpu.memory_space<vmem>>, vector<1x16x64xf32>
    %227 = vector.shape_cast %226 : vector<1x16x64xf32> to vector<16x64xf32>
    %228 = vector.shape_cast %224 : vector<16x64xf32> to vector<1x16x64xf32>
    tpu.vector_store %arg22[%225, %c0_87, %c0_88], %228 {strides = array<i32>} : memref<8x16x64xf32, #tpu.memory_space<vmem>>, vector<1x16x64xf32>,
    %c3_i32_89 = arith.constant 3 : i32
    %229 = arith.index_cast %c3_i32_89 : i32 to index
    %c0_90 = arith.constant 0 : index
    %c0_91 = arith.constant 0 : index
    %230 = vector.load %arg19[%229, %c0_90, %c0_91] : memref<8x16x64xf32, #tpu.memory_space<vmem>>, vector<1x16x64xf32>
    %231 = vector.shape_cast %230 : vector<1x16x64xf32> to vector<16x64xf32>
    %232 = arith.mulf %231, %212 : vector<16x64xf32>
    %233 = arith.index_cast %c3_i32_89 : i32 to index
    %c0_92 = arith.constant 0 : index
    %c0_93 = arith.constant 0 : index
    %234 = vector.load %arg21[%233, %c0_92, %c0_93] : memref<8x16x64xf32, #tpu.memory_space<vmem>>, vector<1x16x64xf32>
    %235 = vector.shape_cast %234 : vector<1x16x64xf32> to vector<16x64xf32>
    %236 = arith.addf %232, %235 : vector<16x64xf32>
    %237 = arith.index_cast %c3_i32_89 : i32 to index
    %c0_94 = arith.constant 0 : index
    %c0_95 = arith.constant 0 : index
    %238 = vector.load %arg21[%237, %c0_94, %c0_95] : memref<8x16x64xf32, #tpu.memory_space<vmem>>, vector<1x16x64xf32>
    %239 = vector.shape_cast %238 : vector<1x16x64xf32> to vector<16x64xf32>
    %240 = vector.shape_cast %236 : vector<16x64xf32> to vector<1x16x64xf32>
    tpu.vector_store %arg21[%237, %c0_94, %c0_95], %240 {strides = array<i32>} : memref<8x16x64xf32, #tpu.memory_space<vmem>>, vector<1x16x64xf32>,
    %241 = arith.index_cast %c3_i32_89 : i32 to index
    %c0_96 = arith.constant 0 : index
    %c0_97 = arith.constant 0 : index
    %242 = vector.load %arg20[%241, %c0_96, %c0_97] : memref<8x16x64xf32, #tpu.memory_space<vmem>>, vector<1x16x64xf32>
    %243 = vector.shape_cast %242 : vector<1x16x64xf32> to vector<16x64xf32>
    %244 = arith.mulf %243, %224 : vector<16x64xf32>
    %245 = arith.index_cast %c3_i32_89 : i32 to index
    %c0_98 = arith.constant 0 : index
    %c0_99 = arith.constant 0 : index
    %246 = vector.load %arg22[%245, %c0_98, %c0_99] : memref<8x16x64xf32, #tpu.memory_space<vmem>>, vector<1x16x64xf32>
    %247 = vector.shape_cast %246 : vector<1x16x64xf32> to vector<16x64xf32>
    %248 = arith.addf %244, %247 : vector<16x64xf32>
    %249 = arith.index_cast %c3_i32_89 : i32 to index
    %c0_100 = arith.constant 0 : index
    %c0_101 = arith.constant 0 : index
    %250 = vector.load %arg22[%249, %c0_100, %c0_101] : memref<8x16x64xf32, #tpu.memory_space<vmem>>, vector<1x16x64xf32>
    %251 = vector.shape_cast %250 : vector<1x16x64xf32> to vector<16x64xf32>
    %252 = vector.shape_cast %248 : vector<16x64xf32> to vector<1x16x64xf32>
    tpu.vector_store %arg22[%249, %c0_100, %c0_101], %252 {strides = array<i32>} : memref<8x16x64xf32, #tpu.memory_space<vmem>>, vector<1x16x64xf32>,
    %c4_i32 = arith.constant 4 : i32
    %253 = arith.index_cast %c4_i32 : i32 to index
    %c0_102 = arith.constant 0 : index
    %c0_103 = arith.constant 0 : index
    %254 = vector.load %arg19[%253, %c0_102, %c0_103] : memref<8x16x64xf32, #tpu.memory_space<vmem>>, vector<1x16x64xf32>
    %255 = vector.shape_cast %254 : vector<1x16x64xf32> to vector<16x64xf32>
    %256 = arith.mulf %255, %236 : vector<16x64xf32>
    %257 = arith.index_cast %c4_i32 : i32 to index
    %c0_104 = arith.constant 0 : index
    %c0_105 = arith.constant 0 : index
    %258 = vector.load %arg21[%257, %c0_104, %c0_105] : memref<8x16x64xf32, #tpu.memory_space<vmem>>, vector<1x16x64xf32>
    %259 = vector.shape_cast %258 : vector<1x16x64xf32> to vector<16x64xf32>
    %260 = arith.addf %256, %259 : vector<16x64xf32>
    %261 = arith.index_cast %c4_i32 : i32 to index
    %c0_106 = arith.constant 0 : index
    %c0_107 = arith.constant 0 : index
    %262 = vector.load %arg21[%261, %c0_106, %c0_107] : memref<8x16x64xf32, #tpu.memory_space<vmem>>, vector<1x16x64xf32>
    %263 = vector.shape_cast %262 : vector<1x16x64xf32> to vector<16x64xf32>
    %264 = vector.shape_cast %260 : vector<16x64xf32> to vector<1x16x64xf32>
    tpu.vector_store %arg21[%261, %c0_106, %c0_107], %264 {strides = array<i32>} : memref<8x16x64xf32, #tpu.memory_space<vmem>>, vector<1x16x64xf32>,
    %265 = arith.index_cast %c4_i32 : i32 to index
    %c0_108 = arith.constant 0 : index
    %c0_109 = arith.constant 0 : index
    %266 = vector.load %arg20[%265, %c0_108, %c0_109] : memref<8x16x64xf32, #tpu.memory_space<vmem>>, vector<1x16x64xf32>
    %267 = vector.shape_cast %266 : vector<1x16x64xf32> to vector<16x64xf32>
    %268 = arith.mulf %267, %248 : vector<16x64xf32>
    %269 = arith.index_cast %c4_i32 : i32 to index
    %c0_110 = arith.constant 0 : index
    %c0_111 = arith.constant 0 : index
    %270 = vector.load %arg22[%269, %c0_110, %c0_111] : memref<8x16x64xf32, #tpu.memory_space<vmem>>, vector<1x16x64xf32>
    %271 = vector.shape_cast %270 : vector<1x16x64xf32> to vector<16x64xf32>
    %272 = arith.addf %268, %271 : vector<16x64xf32>
    %273 = arith.index_cast %c4_i32 : i32 to index
    %c0_112 = arith.constant 0 : index
    %c0_113 = arith.constant 0 : index
    %274 = vector.load %arg22[%273, %c0_112, %c0_113] : memref<8x16x64xf32, #tpu.memory_space<vmem>>, vector<1x16x64xf32>
    %275 = vector.shape_cast %274 : vector<1x16x64xf32> to vector<16x64xf32>
    %276 = vector.shape_cast %272 : vector<16x64xf32> to vector<1x16x64xf32>
    tpu.vector_store %arg22[%273, %c0_112, %c0_113], %276 {strides = array<i32>} : memref<8x16x64xf32, #tpu.memory_space<vmem>>, vector<1x16x64xf32>,
    %c5_i32 = arith.constant 5 : i32
    %277 = arith.index_cast %c5_i32 : i32 to index
    %c0_114 = arith.constant 0 : index
    %c0_115 = arith.constant 0 : index
    %278 = vector.load %arg19[%277, %c0_114, %c0_115] : memref<8x16x64xf32, #tpu.memory_space<vmem>>, vector<1x16x64xf32>
    %279 = vector.shape_cast %278 : vector<1x16x64xf32> to vector<16x64xf32>
    %280 = arith.mulf %279, %260 : vector<16x64xf32>
    %281 = arith.index_cast %c5_i32 : i32 to index
    %c0_116 = arith.constant 0 : index
    %c0_117 = arith.constant 0 : index
    %282 = vector.load %arg21[%281, %c0_116, %c0_117] : memref<8x16x64xf32, #tpu.memory_space<vmem>>, vector<1x16x64xf32>
    %283 = vector.shape_cast %282 : vector<1x16x64xf32> to vector<16x64xf32>
    %284 = arith.addf %280, %283 : vector<16x64xf32>
    %285 = arith.index_cast %c5_i32 : i32 to index
    %c0_118 = arith.constant 0 : index
    %c0_119 = arith.constant 0 : index
    %286 = vector.load %arg21[%285, %c0_118, %c0_119] : memref<8x16x64xf32, #tpu.memory_space<vmem>>, vector<1x16x64xf32>
    %287 = vector.shape_cast %286 : vector<1x16x64xf32> to vector<16x64xf32>
    %288 = vector.shape_cast %284 : vector<16x64xf32> to vector<1x16x64xf32>
    tpu.vector_store %arg21[%285, %c0_118, %c0_119], %288 {strides = array<i32>} : memref<8x16x64xf32, #tpu.memory_space<vmem>>, vector<1x16x64xf32>,
    %289 = arith.index_cast %c5_i32 : i32 to index
    %c0_120 = arith.constant 0 : index
    %c0_121 = arith.constant 0 : index
    %290 = vector.load %arg20[%289, %c0_120, %c0_121] : memref<8x16x64xf32, #tpu.memory_space<vmem>>, vector<1x16x64xf32>
    %291 = vector.shape_cast %290 : vector<1x16x64xf32> to vector<16x64xf32>
    %292 = arith.mulf %291, %272 : vector<16x64xf32>
    %293 = arith.index_cast %c5_i32 : i32 to index
    %c0_122 = arith.constant 0 : index
    %c0_123 = arith.constant 0 : index
    %294 = vector.load %arg22[%293, %c0_122, %c0_123] : memref<8x16x64xf32, #tpu.memory_space<vmem>>, vector<1x16x64xf32>
    %295 = vector.shape_cast %294 : vector<1x16x64xf32> to vector<16x64xf32>
    %296 = arith.addf %292, %295 : vector<16x64xf32>
    %297 = arith.index_cast %c5_i32 : i32 to index
    %c0_124 = arith.constant 0 : index
    %c0_125 = arith.constant 0 : index
    %298 = vector.load %arg22[%297, %c0_124, %c0_125] : memref<8x16x64xf32, #tpu.memory_space<vmem>>, vector<1x16x64xf32>
    %299 = vector.shape_cast %298 : vector<1x16x64xf32> to vector<16x64xf32>
    %300 = vector.shape_cast %296 : vector<16x64xf32> to vector<1x16x64xf32>
    tpu.vector_store %arg22[%297, %c0_124, %c0_125], %300 {strides = array<i32>} : memref<8x16x64xf32, #tpu.memory_space<vmem>>, vector<1x16x64xf32>,
    %c6_i32 = arith.constant 6 : i32
    %301 = arith.index_cast %c6_i32 : i32 to index
    %c0_126 = arith.constant 0 : index
    %c0_127 = arith.constant 0 : index
    %302 = vector.load %arg19[%301, %c0_126, %c0_127] : memref<8x16x64xf32, #tpu.memory_space<vmem>>, vector<1x16x64xf32>
    %303 = vector.shape_cast %302 : vector<1x16x64xf32> to vector<16x64xf32>
    %304 = arith.mulf %303, %284 : vector<16x64xf32>
    %305 = arith.index_cast %c6_i32 : i32 to index
    %c0_128 = arith.constant 0 : index
    %c0_129 = arith.constant 0 : index
    %306 = vector.load %arg21[%305, %c0_128, %c0_129] : memref<8x16x64xf32, #tpu.memory_space<vmem>>, vector<1x16x64xf32>
    %307 = vector.shape_cast %306 : vector<1x16x64xf32> to vector<16x64xf32>
    %308 = arith.addf %304, %307 : vector<16x64xf32>
    %309 = arith.index_cast %c6_i32 : i32 to index
    %c0_130 = arith.constant 0 : index
    %c0_131 = arith.constant 0 : index
    %310 = vector.load %arg21[%309, %c0_130, %c0_131] : memref<8x16x64xf32, #tpu.memory_space<vmem>>, vector<1x16x64xf32>
    %311 = vector.shape_cast %310 : vector<1x16x64xf32> to vector<16x64xf32>
    %312 = vector.shape_cast %308 : vector<16x64xf32> to vector<1x16x64xf32>
    tpu.vector_store %arg21[%309, %c0_130, %c0_131], %312 {strides = array<i32>} : memref<8x16x64xf32, #tpu.memory_space<vmem>>, vector<1x16x64xf32>,
    %313 = arith.index_cast %c6_i32 : i32 to index
    %c0_132 = arith.constant 0 : index
    %c0_133 = arith.constant 0 : index
    %314 = vector.load %arg20[%313, %c0_132, %c0_133] : memref<8x16x64xf32, #tpu.memory_space<vmem>>, vector<1x16x64xf32>
    %315 = vector.shape_cast %314 : vector<1x16x64xf32> to vector<16x64xf32>
    %316 = arith.mulf %315, %296 : vector<16x64xf32>
    %317 = arith.index_cast %c6_i32 : i32 to index
    %c0_134 = arith.constant 0 : index
    %c0_135 = arith.constant 0 : index
    %318 = vector.load %arg22[%317, %c0_134, %c0_135] : memref<8x16x64xf32, #tpu.memory_space<vmem>>, vector<1x16x64xf32>
    %319 = vector.shape_cast %318 : vector<1x16x64xf32> to vector<16x64xf32>
    %320 = arith.addf %316, %319 : vector<16x64xf32>
    %321 = arith.index_cast %c6_i32 : i32 to index
    %c0_136 = arith.constant 0 : index
    %c0_137 = arith.constant 0 : index
    %322 = vector.load %arg22[%321, %c0_136, %c0_137] : memref<8x16x64xf32, #tpu.memory_space<vmem>>, vector<1x16x64xf32>
    %323 = vector.shape_cast %322 : vector<1x16x64xf32> to vector<16x64xf32>
    %324 = vector.shape_cast %320 : vector<16x64xf32> to vector<1x16x64xf32>
    tpu.vector_store %arg22[%321, %c0_136, %c0_137], %324 {strides = array<i32>} : memref<8x16x64xf32, #tpu.memory_space<vmem>>, vector<1x16x64xf32>,
    %c7_i32 = arith.constant 7 : i32
    %325 = arith.index_cast %c7_i32 : i32 to index
    %c0_138 = arith.constant 0 : index
    %c0_139 = arith.constant 0 : index
    %326 = vector.load %arg19[%325, %c0_138, %c0_139] : memref<8x16x64xf32, #tpu.memory_space<vmem>>, vector<1x16x64xf32>
    %327 = vector.shape_cast %326 : vector<1x16x64xf32> to vector<16x64xf32>
    %328 = arith.mulf %327, %308 : vector<16x64xf32>
    %329 = arith.index_cast %c7_i32 : i32 to index
    %c0_140 = arith.constant 0 : index
    %c0_141 = arith.constant 0 : index
    %330 = vector.load %arg21[%329, %c0_140, %c0_141] : memref<8x16x64xf32, #tpu.memory_space<vmem>>, vector<1x16x64xf32>
    %331 = vector.shape_cast %330 : vector<1x16x64xf32> to vector<16x64xf32>
    %332 = arith.addf %328, %331 : vector<16x64xf32>
    %333 = arith.index_cast %c7_i32 : i32 to index
    %c0_142 = arith.constant 0 : index
    %c0_143 = arith.constant 0 : index
    %334 = vector.load %arg21[%333, %c0_142, %c0_143] : memref<8x16x64xf32, #tpu.memory_space<vmem>>, vector<1x16x64xf32>
    %335 = vector.shape_cast %334 : vector<1x16x64xf32> to vector<16x64xf32>
    %336 = vector.shape_cast %332 : vector<16x64xf32> to vector<1x16x64xf32>
    tpu.vector_store %arg21[%333, %c0_142, %c0_143], %336 {strides = array<i32>} : memref<8x16x64xf32, #tpu.memory_space<vmem>>, vector<1x16x64xf32>,
    %337 = arith.index_cast %c7_i32 : i32 to index
    %c0_144 = arith.constant 0 : index
    %c0_145 = arith.constant 0 : index
    %338 = vector.load %arg20[%337, %c0_144, %c0_145] : memref<8x16x64xf32, #tpu.memory_space<vmem>>, vector<1x16x64xf32>
    %339 = vector.shape_cast %338 : vector<1x16x64xf32> to vector<16x64xf32>
    %340 = arith.mulf %339, %320 : vector<16x64xf32>
    %341 = arith.index_cast %c7_i32 : i32 to index
    %c0_146 = arith.constant 0 : index
    %c0_147 = arith.constant 0 : index
    %342 = vector.load %arg22[%341, %c0_146, %c0_147] : memref<8x16x64xf32, #tpu.memory_space<vmem>>, vector<1x16x64xf32>
    %343 = vector.shape_cast %342 : vector<1x16x64xf32> to vector<16x64xf32>
    %344 = arith.addf %340, %343 : vector<16x64xf32>
    %345 = arith.index_cast %c7_i32 : i32 to index
    %c0_148 = arith.constant 0 : index
    %c0_149 = arith.constant 0 : index
    %346 = vector.load %arg22[%345, %c0_148, %c0_149] : memref<8x16x64xf32, #tpu.memory_space<vmem>>, vector<1x16x64xf32>
    %347 = vector.shape_cast %346 : vector<1x16x64xf32> to vector<16x64xf32>
    %348 = vector.shape_cast %344 : vector<16x64xf32> to vector<1x16x64xf32>
    tpu.vector_store %arg22[%345, %c0_148, %c0_149], %348 {strides = array<i32>} : memref<8x16x64xf32, #tpu.memory_space<vmem>>, vector<1x16x64xf32>,
    %c8_i32 = arith.constant 8 : i32
    %349 = vector.extract_strided_slice %117 {offsets = [0, 0], sizes = [8, 16], strides = [1, 1]} : vector<16x16xf32> to vector<8x16xf32>
    %350 = vector.shape_cast %349 : vector<8x16xf32> to vector<8x16x1xf32>
    %c0_150 = arith.constant 0 : index
    %c0_151 = arith.constant 0 : index
    %c0_152 = arith.constant 0 : index
    %351 = vector.load %arg21[%c0_150, %c0_151, %c0_152] : memref<8x16x64xf32, #tpu.memory_space<vmem>>, vector<8x16x64xf32>
    %352 = vector.broadcast %350 : vector<8x16x1xf32> to vector<8x16x64xf32>
    %353 = arith.mulf %352, %351 : vector<8x16x64xf32>
    %cst_153 = arith.constant dense<0.000000e+00> : vector<8x64xf32>
    %354 = vector.multi_reduction <add>, %353, %cst_153 [1] : vector<8x16x64xf32> to vector<8x64xf32>
    %355 = vector.extract_strided_slice %117 {offsets = [8, 0], sizes = [8, 16], strides = [1, 1]} : vector<16x16xf32> to vector<8x16xf32>
    %356 = vector.shape_cast %355 : vector<8x16xf32> to vector<8x16x1xf32>
    %c0_154 = arith.constant 0 : index
    %c0_155 = arith.constant 0 : index
    %c0_156 = arith.constant 0 : index
    %357 = vector.load %arg22[%c0_154, %c0_155, %c0_156] : memref<8x16x64xf32, #tpu.memory_space<vmem>>, vector<8x16x64xf32>
    %358 = vector.broadcast %356 : vector<8x16x1xf32> to vector<8x16x64xf32>
    %359 = arith.mulf %358, %357 : vector<8x16x64xf32>
    %cst_157 = arith.constant dense<0.000000e+00> : vector<8x64xf32>
    %360 = vector.multi_reduction <add>, %359, %cst_157 [1] : vector<8x16x64xf32> to vector<8x64xf32>
    %361 = tpu.concatenate %354, %360 in 0 : vector<8x64xf32>, vector<8x64xf32> -> vector<16x64xf32>
    %c0_158 = arith.constant 0 : index
    %c0_159 = arith.constant 0 : index
    %362 = vector.load %arg8[%c0_158, %c0_159] : memref<1x64xf32, #tpu.memory_space<vmem>>, vector<1x64xf32>
    %363 = vector.broadcast %362 : vector<1x64xf32> to vector<16x64xf32>
    %364 = arith.mulf %92, %363 : vector<16x64xf32>
    %365 = arith.addf %361, %364 : vector<16x64xf32>
    %366 = arith.negf %6 : vector<16x64xf32>
    %367 = math.exp %366 : vector<16x64xf32>
    %cst_160 = arith.constant 1.000000e+00 : f32
    %368 = vector.broadcast %cst_160 : f32 to vector<16x64xf32>
    %369 = arith.addf %368, %367 : vector<16x64xf32>
    %370 = arith.divf %368, %369 : vector<16x64xf32>
    %371 = arith.mulf %6, %370 : vector<16x64xf32>
    %372 = arith.mulf %365, %371 : vector<16x64xf32>
    %373 = arith.truncf %372 : vector<16x64xf32> to vector<16x64xbf16>
    %c0_161 = arith.constant 0 : index
    %c0_162 = arith.constant 0 : index
    %374 = vector.load %arg9[%c0_161, %c0_162] : memref<64x32xbf16, #tpu.memory_space<vmem>>, vector<64x32xbf16>
    %cst_163 = arith.constant dense<0.000000e+00> : vector<16x32xf32>
    %375 = tpu.matmul %373, %374, %cst_163 {dimension_numbers = #tpu.dot_dimension_numbers<[1], [0], [0], [1], [0, 0, 1, 1], [], []>} : vector<16x64xbf16>, vector<64x32xbf16>, vector<16x32xf32> -> vector<16x32xf32>
    %376 = arith.addf %375, %1 : vector<16x32xf32>
    %c0_164 = arith.constant 0 : index
    %c0_165 = arith.constant 0 : index
    %377 = vector.load %arg10[%c0_164, %c0_165] : memref<1x32xf32, #tpu.memory_space<vmem>>, vector<1x32xf32>
    %c0_166 = arith.constant 0 : index
    %c0_167 = arith.constant 0 : index
    %378 = vector.load %arg11[%c0_166, %c0_167] : memref<1x32xf32, #tpu.memory_space<vmem>>, vector<1x32xf32>
    %cst_168 = arith.constant dense<0.000000e+00> : vector<16xf32>
    %379 = vector.multi_reduction <add>, %376, %cst_168 [1] : vector<16x32xf32> to vector<16xf32>
    %380 = vector.shape_cast %379 : vector<16xf32> to vector<16x1xf32>
    %cst_169 = arith.constant 3.200000e+01 : f32
    %381 = vector.broadcast %cst_169 : f32 to vector<16x1xf32>
    %382 = arith.divf %380, %381 : vector<16x1xf32>
    %383 = vector.broadcast %382 : vector<16x1xf32> to vector<16x32xf32>
    %384 = arith.subf %376, %383 : vector<16x32xf32>
    %385 = arith.mulf %384, %384 : vector<16x32xf32>
    %cst_170 = arith.constant dense<0.000000e+00> : vector<16xf32>
    %386 = vector.multi_reduction <add>, %385, %cst_170 [1] : vector<16x32xf32> to vector<16xf32>
    %387 = vector.shape_cast %386 : vector<16xf32> to vector<16x1xf32>
    %cst_171 = arith.constant 3.200000e+01 : f32
    %388 = vector.broadcast %cst_171 : f32 to vector<16x1xf32>
    %389 = arith.divf %387, %388 : vector<16x1xf32>
    %cst_172 = arith.constant 9.99999996E-13 : f32
    %390 = vector.broadcast %cst_172 : f32 to vector<16x1xf32>
    %391 = arith.addf %389, %390 : vector<16x1xf32>
    %392 = math.rsqrt %391 : vector<16x1xf32>
    %393 = vector.broadcast %392 : vector<16x1xf32> to vector<16x32xf32>
    %394 = arith.mulf %384, %393 : vector<16x32xf32>
    %395 = vector.broadcast %377 : vector<1x32xf32> to vector<16x32xf32>
    %396 = arith.mulf %394, %395 : vector<16x32xf32>
    %397 = vector.broadcast %378 : vector<1x32xf32> to vector<16x32xf32>
    %398 = arith.addf %396, %397 : vector<16x32xf32>
    %399 = arith.truncf %398 : vector<16x32xf32> to vector<16x32xbf16>
    %c0_173 = arith.constant 0 : index
    %c0_174 = arith.constant 0 : index
    %400 = vector.load %arg12[%c0_173, %c0_174] : memref<32x128xbf16, #tpu.memory_space<vmem>>, vector<32x128xbf16>
    %cst_175 = arith.constant dense<0.000000e+00> : vector<16x128xf32>
    %401 = tpu.matmul %399, %400, %cst_175 {dimension_numbers = #tpu.dot_dimension_numbers<[1], [0], [0], [1], [0, 0, 1, 1], [], []>} : vector<16x32xbf16>, vector<32x128xbf16>, vector<16x128xf32> -> vector<16x128xf32>
    %c0_176 = arith.constant 0 : index
    %c0_177 = arith.constant 0 : index
    %402 = vector.load %arg13[%c0_176, %c0_177] : memref<1x128xf32, #tpu.memory_space<vmem>>, vector<1x128xf32>
    %403 = vector.broadcast %402 : vector<1x128xf32> to vector<16x128xf32>
    %404 = arith.addf %401, %403 : vector<16x128xf32>
    %cst_178 = arith.constant 5.000000e-01 : f32
    %405 = vector.broadcast %cst_178 : f32 to vector<16x128xf32>
    %406 = arith.mulf %405, %404 : vector<16x128xf32>
    %cst_179 = arith.constant 0.707106769 : f32
    %407 = vector.broadcast %cst_179 : f32 to vector<16x128xf32>
    %408 = arith.mulf %404, %407 : vector<16x128xf32>
    %409 = math.absf %408 : vector<16x128xf32>
    %cst_180 = arith.constant 0.327591091 : f32
    %410 = vector.broadcast %cst_180 : f32 to vector<16x128xf32>
    %411 = arith.mulf %410, %409 : vector<16x128xf32>
    %cst_181 = arith.constant 1.000000e+00 : f32
    %412 = vector.broadcast %cst_181 : f32 to vector<16x128xf32>
    %413 = arith.addf %412, %411 : vector<16x128xf32>
    %cst_182 = arith.constant 1.000000e+00 : f32
    %414 = vector.broadcast %cst_182 : f32 to vector<16x128xf32>
    %415 = arith.divf %414, %413 : vector<16x128xf32>
    %cst_183 = arith.constant 1.06140542 : f32
    %416 = vector.broadcast %cst_183 : f32 to vector<16x128xf32>
    %417 = arith.mulf %416, %415 : vector<16x128xf32>
    %cst_184 = arith.constant -1.45315206 : f32
    %418 = vector.broadcast %cst_184 : f32 to vector<16x128xf32>
    %419 = arith.addf %417, %418 : vector<16x128xf32>
    %420 = arith.mulf %419, %415 : vector<16x128xf32>
    %cst_185 = arith.constant 1.42141378 : f32
    %421 = vector.broadcast %cst_185 : f32 to vector<16x128xf32>
    %422 = arith.addf %420, %421 : vector<16x128xf32>
    %423 = arith.mulf %422, %415 : vector<16x128xf32>
    %cst_186 = arith.constant -0.284496725 : f32
    %424 = vector.broadcast %cst_186 : f32 to vector<16x128xf32>
    %425 = arith.addf %423, %424 : vector<16x128xf32>
    %426 = arith.mulf %425, %415 : vector<16x128xf32>
    %cst_187 = arith.constant 0.254829586 : f32
    %427 = vector.broadcast %cst_187 : f32 to vector<16x128xf32>
    %428 = arith.addf %426, %427 : vector<16x128xf32>
    %429 = arith.mulf %428, %415 : vector<16x128xf32>
    %cst_188 = arith.constant 0.000000e+00 : f32
    %430 = vector.broadcast %cst_188 : f32 to vector<16x128xf32>
    %431 = arith.subf %430, %409 : vector<16x128xf32>
    %432 = arith.mulf %431, %409 : vector<16x128xf32>
    %433 = math.exp %432 : vector<16x128xf32>
    %434 = arith.mulf %429, %433 : vector<16x128xf32>
    %cst_189 = arith.constant 1.000000e+00 : f32
    %435 = vector.broadcast %cst_189 : f32 to vector<16x128xf32>
    %436 = arith.subf %435, %434 : vector<16x128xf32>
    %cst_190 = arith.constant 0.000000e+00 : f32
    %437 = vector.broadcast %cst_190 : f32 to vector<16x128xf32>
    %438 = arith.cmpf oge, %408, %437 : vector<16x128xf32>
    %cst_191 = arith.constant 0.000000e+00 : f32
    %439 = vector.broadcast %cst_191 : f32 to vector<16x128xf32>
    %440 = arith.subf %439, %436 : vector<16x128xf32>
    %441 = arith.select %438, %436, %440 : vector<16x128xi1>, vector<16x128xf32>
    %cst_192 = arith.constant 1.000000e+00 : f32
    %442 = vector.broadcast %cst_192 : f32 to vector<16x128xf32>
    %443 = arith.addf %442, %441 : vector<16x128xf32>
    %444 = arith.mulf %406, %443 : vector<16x128xf32>
    %445 = arith.truncf %444 : vector<16x128xf32> to vector<16x128xbf16>
    %c0_193 = arith.constant 0 : index
    %c0_194 = arith.constant 0 : index
    %446 = vector.load %arg14[%c0_193, %c0_194] : memref<128x32xbf16, #tpu.memory_space<vmem>>, vector<128x32xbf16>
    %cst_195 = arith.constant dense<0.000000e+00> : vector<16x32xf32>
    %447 = tpu.matmul %445, %446, %cst_195 {dimension_numbers = #tpu.dot_dimension_numbers<[1], [0], [0], [1], [0, 0, 1, 1], [], []>} : vector<16x128xbf16>, vector<128x32xbf16>, vector<16x32xf32> -> vector<16x32xf32>
    %c0_196 = arith.constant 0 : index
    %c0_197 = arith.constant 0 : index
    %448 = vector.load %arg15[%c0_196, %c0_197] : memref<1x32xf32, #tpu.memory_space<vmem>>, vector<1x32xf32>
    %449 = vector.broadcast %448 : vector<1x32xf32> to vector<16x32xf32>
    %450 = arith.addf %447, %449 : vector<16x32xf32>
    %451 = arith.addf %450, %398 : vector<16x32xf32>
    %c0_198 = arith.constant 0 : index
    %c0_199 = arith.constant 0 : index
    %452 = vector.load %arg16[%c0_198, %c0_199] : memref<1x32xf32, #tpu.memory_space<vmem>>, vector<1x32xf32>
    %c0_200 = arith.constant 0 : index
    %c0_201 = arith.constant 0 : index
    %453 = vector.load %arg17[%c0_200, %c0_201] : memref<1x32xf32, #tpu.memory_space<vmem>>, vector<1x32xf32>
    %cst_202 = arith.constant dense<0.000000e+00> : vector<16xf32>
    %454 = vector.multi_reduction <add>, %451, %cst_202 [1] : vector<16x32xf32> to vector<16xf32>
    %455 = vector.shape_cast %454 : vector<16xf32> to vector<16x1xf32>
    %cst_203 = arith.constant 3.200000e+01 : f32
    %456 = vector.broadcast %cst_203 : f32 to vector<16x1xf32>
    %457 = arith.divf %455, %456 : vector<16x1xf32>
    %458 = vector.broadcast %457 : vector<16x1xf32> to vector<16x32xf32>
    %459 = arith.subf %451, %458 : vector<16x32xf32>
    %460 = arith.mulf %459, %459 : vector<16x32xf32>
    %cst_204 = arith.constant dense<0.000000e+00> : vector<16xf32>
    %461 = vector.multi_reduction <add>, %460, %cst_204 [1] : vector<16x32xf32> to vector<16xf32>
    %462 = vector.shape_cast %461 : vector<16xf32> to vector<16x1xf32>
    %cst_205 = arith.constant 3.200000e+01 : f32
    %463 = vector.broadcast %cst_205 : f32 to vector<16x1xf32>
    %464 = arith.divf %462, %463 : vector<16x1xf32>
    %cst_206 = arith.constant 9.99999996E-13 : f32
    %465 = vector.broadcast %cst_206 : f32 to vector<16x1xf32>
    %466 = arith.addf %464, %465 : vector<16x1xf32>
    %467 = math.rsqrt %466 : vector<16x1xf32>
    %468 = vector.broadcast %467 : vector<16x1xf32> to vector<16x32xf32>
    %469 = arith.mulf %459, %468 : vector<16x32xf32>
    %470 = vector.broadcast %452 : vector<1x32xf32> to vector<16x32xf32>
    %471 = arith.mulf %469, %470 : vector<16x32xf32>
    %472 = vector.broadcast %453 : vector<1x32xf32> to vector<16x32xf32>
    %473 = arith.addf %471, %472 : vector<16x32xf32>
    %474 = vector.shape_cast %473 : vector<16x32xf32> to vector<2x8x32xf32>
    %c0_207 = arith.constant 0 : index
    %c0_208 = arith.constant 0 : index
    %c0_209 = arith.constant 0 : index
    %475 = vector.load %arg18[%c0_207, %c0_208, %c0_209] : memref<2x8x32xf32, #tpu.memory_space<vmem>>, vector<2x8x32xf32>
    tpu.vector_store %arg18[%c0_207, %c0_208, %c0_209], %474 {strides = array<i32>} : memref<2x8x32xf32, #tpu.memory_space<vmem>>, vector<2x8x32xf32>,
    return
  }
  func.func @transform_0(%arg0: i32) -> (i32, i32, i32) {
    %c0_i32 = arith.constant 0 : i32
    %c0_i32_0 = arith.constant 0 : i32
    %c0_i32_1 = arith.constant 0 : i32
    return %arg0, %c0_i32, %c0_i32_0 : i32, i32, i32
  }
  func.func @transform_1(%arg0: i32) -> (i32, i32) {
    %c0_i32 = arith.constant 0 : i32
    %c0_i32_0 = arith.constant 0 : i32
    %c0_i32_1 = arith.constant 0 : i32
    return %c0_i32, %c0_i32_0 : i32, i32
  }
  func.func @transform_2(%arg0: i32) -> (i32, i32) {
    %c0_i32 = arith.constant 0 : i32
    %c0_i32_0 = arith.constant 0 : i32
    %c0_i32_1 = arith.constant 0 : i32
    return %c0_i32, %c0_i32_0 : i32, i32
  }
  func.func @transform_3(%arg0: i32) -> (i32, i32) {
    %c0_i32 = arith.constant 0 : i32
    %c0_i32_0 = arith.constant 0 : i32
    %c0_i32_1 = arith.constant 0 : i32
    return %c0_i32, %c0_i32_0 : i32, i32
  }
  func.func @transform_4(%arg0: i32) -> (i32, i32) {
    %c0_i32 = arith.constant 0 : i32
    %c0_i32_0 = arith.constant 0 : i32
    %c0_i32_1 = arith.constant 0 : i32
    return %c0_i32, %c0_i32_0 : i32, i32
  }
  func.func @transform_5(%arg0: i32) -> (i32, i32) {
    %c0_i32 = arith.constant 0 : i32
    %c0_i32_0 = arith.constant 0 : i32
    %c0_i32_1 = arith.constant 0 : i32
    return %c0_i32, %c0_i32_0 : i32, i32
  }
  func.func @transform_6(%arg0: i32) -> (i32, i32) {
    %c0_i32 = arith.constant 0 : i32
    %c0_i32_0 = arith.constant 0 : i32
    %c0_i32_1 = arith.constant 0 : i32
    return %c0_i32, %c0_i32_0 : i32, i32
  }
  func.func @transform_7(%arg0: i32) -> (i32, i32) {
    %c0_i32 = arith.constant 0 : i32
    %c0_i32_0 = arith.constant 0 : i32
    %c0_i32_1 = arith.constant 0 : i32
    return %c0_i32, %c0_i32_0 : i32, i32
  }
  func.func @transform_8(%arg0: i32) -> (i32, i32) {
    %c0_i32 = arith.constant 0 : i32
    %c0_i32_0 = arith.constant 0 : i32
    %c0_i32_1 = arith.constant 0 : i32
    return %c0_i32, %c0_i32_0 : i32, i32
  }
  func.func @transform_9(%arg0: i32) -> (i32, i32) {
    %c0_i32 = arith.constant 0 : i32
    %c0_i32_0 = arith.constant 0 : i32
    %c0_i32_1 = arith.constant 0 : i32
    return %c0_i32, %c0_i32_0 : i32, i32
  }
  func.func @transform_10(%arg0: i32) -> (i32, i32) {
    %c0_i32 = arith.constant 0 : i32
    %c0_i32_0 = arith.constant 0 : i32
    %c0_i32_1 = arith.constant 0 : i32
    return %c0_i32, %c0_i32_0 : i32, i32
  }
  func.func @transform_11(%arg0: i32) -> (i32, i32) {
    %c0_i32 = arith.constant 0 : i32
    %c0_i32_0 = arith.constant 0 : i32
    %c0_i32_1 = arith.constant 0 : i32
    return %c0_i32, %c0_i32_0 : i32, i32
  }
  func.func @transform_12(%arg0: i32) -> (i32, i32) {
    %c0_i32 = arith.constant 0 : i32
    %c0_i32_0 = arith.constant 0 : i32
    %c0_i32_1 = arith.constant 0 : i32
    return %c0_i32, %c0_i32_0 : i32, i32
  }
  func.func @transform_13(%arg0: i32) -> (i32, i32) {
    %c0_i32 = arith.constant 0 : i32
    %c0_i32_0 = arith.constant 0 : i32
    %c0_i32_1 = arith.constant 0 : i32
    return %c0_i32, %c0_i32_0 : i32, i32
  }
  func.func @transform_14(%arg0: i32) -> (i32, i32) {
    %c0_i32 = arith.constant 0 : i32
    %c0_i32_0 = arith.constant 0 : i32
    %c0_i32_1 = arith.constant 0 : i32
    return %c0_i32, %c0_i32_0 : i32, i32
  }
  func.func @transform_15(%arg0: i32) -> (i32, i32) {
    %c0_i32 = arith.constant 0 : i32
    %c0_i32_0 = arith.constant 0 : i32
    %c0_i32_1 = arith.constant 0 : i32
    return %c0_i32, %c0_i32_0 : i32, i32
  }
  func.func @transform_16(%arg0: i32) -> (i32, i32) {
    %c0_i32 = arith.constant 0 : i32
    %c0_i32_0 = arith.constant 0 : i32
    %c0_i32_1 = arith.constant 0 : i32
    return %c0_i32, %c0_i32_0 : i32, i32
  }
  func.func @transform_17(%arg0: i32) -> (i32, i32, i32) {
    %c0_i32 = arith.constant 0 : i32
    %c0_i32_0 = arith.constant 0 : i32
    %c0_i32_1 = arith.constant 0 : i32
    return %arg0, %c0_i32, %c0_i32_0 : i32, i32, i32
  }
}

module attributes {stable_mosaic.version = 11 : i64} {
  func.func @mamba_layer_kernel(%arg0: i32, %arg1: memref<2x8x32xf32, #tpu.memory_space<vmem>>, %arg2: memref<32x128xbf16, #tpu.memory_space<vmem>>, %arg3: memref<4x64xf32, #tpu.memory_space<vmem>>, %arg4: memref<1x64xf32, #tpu.memory_space<vmem>>, %arg5: memref<64x96xbf16, #tpu.memory_space<vmem>>, %arg6: memref<1x64xf32, #tpu.memory_space<vmem>>, %arg7: memref<16x64xf32, #tpu.memory_space<vmem>>, %arg8: memref<1x64xf32, #tpu.memory_space<vmem>>, %arg9: memref<64x32xbf16, #tpu.memory_space<vmem>>, %arg10: memref<1x32xf32, #tpu.memory_space<vmem>>, %arg11: memref<1x32xf32, #tpu.memory_space<vmem>>, %arg12: memref<32x128xbf16, #tpu.memory_space<vmem>>, %arg13: memref<1x128xf32, #tpu.memory_space<vmem>>, %arg14: memref<128x32xbf16, #tpu.memory_space<vmem>>, %arg15: memref<1x32xf32, #tpu.memory_space<vmem>>, %arg16: memref<1x32xf32, #tpu.memory_space<vmem>>, %arg17: memref<1x32xf32, #tpu.memory_space<vmem>>, %arg18: memref<2x8x32xf32, #tpu.memory_space<vmem>>, %arg19: memref<8x16x64xf32, #tpu.memory_space<vmem>>, %arg20: memref<8x16x64xf32, #tpu.memory_space<vmem>>, %arg21: memref<8x16x64xf32, #tpu.memory_space<vmem>>, %arg22: memref<8x16x64xf32, #tpu.memory_space<vmem>>) attributes {dimension_semantics = [#tpu.dimension_semantics<parallel>], iteration_bounds = array<i64: 1>, scalar_prefetch = 0 : i64, scratch_operands = 4 : i64, tpu.core_type = #tpu.core_type<tc>, window_params = [{transform_indices = @transform_0, window_bounds = array<i64: 2, 8, 32>}, {pipeline_mode = #tpu.pipeline_mode<synchronous>, transform_indices = @transform_1, window_bounds = array<i64: 32, 128>}, {pipeline_mode = #tpu.pipeline_mode<synchronous>, transform_indices = @transform_2, window_bounds = array<i64: 4, 64>}, {pipeline_mode = #tpu.pipeline_mode<synchronous>, transform_indices = @transform_3, window_bounds = array<i64: 1, 64>}, {pipeline_mode = #tpu.pipeline_mode<synchronous>, transform_indices = @transform_4, window_bounds = array<i64: 64, 96>}, {pipeline_mode = #tpu.pipeline_mode<synchronous>, transform_indices = @transform_5, window_bounds = array<i64: 1, 64>}, {pipeline_mode = #tpu.pipeline_mode<synchronous>, transform_indices = @transform_6, window_bounds = array<i64: 16, 64>}, {pipeline_mode = #tpu.pipeline_mode<synchronous>, transform_indices = @transform_7, window_bounds = array<i64: 1, 64>}, {pipeline_mode = #tpu.pipeline_mode<synchronous>, transform_indices = @transform_8, window_bounds = array<i64: 64, 32>}, {pipeline_mode = #tpu.pipeline_mode<synchronous>, transform_indices = @transform_9, window_bounds = array<i64: 1, 32>}, {pipeline_mode = #tpu.pipeline_mode<synchronous>, transform_indices = @transform_10, window_bounds = array<i64: 1, 32>}, {pipeline_mode = #tpu.pipeline_mode<synchronous>, transform_indices = @transform_11, window_bounds = array<i64: 32, 128>}, {pipeline_mode = #tpu.pipeline_mode<synchronous>, transform_indices = @transform_12, window_bounds = array<i64: 1, 128>}, {pipeline_mode = #tpu.pipeline_mode<synchronous>, transform_indices = @transform_13, window_bounds = array<i64: 128, 32>}, {pipeline_mode = #tpu.pipeline_mode<synchronous>, transform_indices = @transform_14, window_bounds = array<i64: 1, 32>}, {pipeline_mode = #tpu.pipeline_mode<synchronous>, transform_indices = @transform_15, window_bounds = array<i64: 1, 32>}, {pipeline_mode = #tpu.pipeline_mode<synchronous>, transform_indices = @transform_16, window_bounds = array<i64: 1, 32>}, {transform_indices = @transform_17, window_bounds = array<i64: 2, 8, 32>}]} {
    %c0 = arith.constant 0 : index
    %c0_0 = arith.constant 0 : index
    %c0_1 = arith.constant 0 : index
    %0 = vector.load %arg1[%c0, %c0_0, %c0_1] : memref<2x8x32xf32, #tpu.memory_space<vmem>>, vector<2x8x32xf32>
    %1 = vector.shape_cast %0 : vector<2x8x32xf32> to vector<16x32xf32>
    %2 = arith.truncf %1 : vector<16x32xf32> to vector<16x32xbf16>
    %c0_2 = arith.constant 0 : index
    %c0_3 = arith.constant 0 : index
    %3 = vector.load %arg2[%c0_2, %c0_3] : memref<32x128xbf16, #tpu.memory_space<vmem>>, vector<32x128xbf16>
    %cst = arith.constant dense<0.000000e+00> : vector<16x128xf32>
    %4 = tpu.matmul %2, %3, %cst {dimension_numbers = #tpu.dot_dimension_numbers<[1], [0], [0], [1], [0, 0, 1, 1], [], []>} : vector<16x32xbf16>, vector<32x128xbf16>, vector<16x128xf32> -> vector<16x128xf32>
    %5 = vector.extract_strided_slice %4 {offsets = [0, 0], sizes = [16, 64], strides = [1, 1]} : vector<16x128xf32> to vector<16x64xf32>
    %6 = vector.extract_strided_slice %4 {offsets = [0, 64], sizes = [16, 64], strides = [1, 1]} : vector<16x128xf32> to vector<16x64xf32>
    %c0_4 = arith.constant 0 : index
    %c0_5 = arith.constant 0 : index
    %7 = vector.load %arg3[%c0_4, %c0_5] : memref<4x64xf32, #tpu.memory_space<vmem>>, vector<4x64xf32>
    %8 = tpu.iota {dimensions = array<i32: 0>} : vector<8x1xi32>
    %9 = vector.extract_strided_slice %5 {offsets = [0, 0], sizes = [8, 64], strides = [1, 1]} : vector<16x64xf32> to vector<8x64xf32>
    %10 = vector.extract_strided_slice %7 {offsets = [3, 0], sizes = [1, 64], strides = [1, 1]} : vector<4x64xf32> to vector<1x64xf32>
    %11 = vector.broadcast %10 : vector<1x64xf32> to vector<8x64xf32>
    %12 = arith.mulf %11, %9 : vector<8x64xf32>
    %c1_i32 = arith.constant 1 : i32
    %13 = tpu.dynamic_rotate %9 by %c1_i32 dim 0 : vector<8x64xf32>, i32 -> vector<8x64xf32>
    %c1_i32_6 = arith.constant 1 : i32
    %14 = vector.broadcast %c1_i32_6 : i32 to vector<8x1xi32>
    %15 = arith.cmpi sge, %8, %14 : vector<8x1xi32>
    %cst_7 = arith.constant 0.000000e+00 : f32
    %16 = vector.shape_cast %15 : vector<8x1xi1> to vector<8x1xi1>
    %17 = vector.broadcast %16 : vector<8x1xi1> to vector<8x64xi1>
    %18 = vector.broadcast %cst_7 : f32 to vector<8x64xf32>
    %19 = arith.select %17, %13, %18 : vector<8x64xi1>, vector<8x64xf32>
    %20 = vector.extract_strided_slice %7 {offsets = [2, 0], sizes = [1, 64], strides = [1, 1]} : vector<4x64xf32> to vector<1x64xf32>
    %21 = vector.broadcast %20 : vector<1x64xf32> to vector<8x64xf32>
    %22 = arith.mulf %21, %19 : vector<8x64xf32>
    %23 = arith.addf %12, %22 : vector<8x64xf32>
    %c2_i32 = arith.constant 2 : i32
    %24 = tpu.dynamic_rotate %9 by %c2_i32 dim 0 : vector<8x64xf32>, i32 -> vector<8x64xf32>
    %c2_i32_8 = arith.constant 2 : i32
    %25 = vector.broadcast %c2_i32_8 : i32 to vector<8x1xi32>
    %26 = arith.cmpi sge, %8, %25 : vector<8x1xi32>
    %cst_9 = arith.constant 0.000000e+00 : f32
    %27 = vector.shape_cast %26 : vector<8x1xi1> to vector<8x1xi1>
    %28 = vector.broadcast %27 : vector<8x1xi1> to vector<8x64xi1>
    %29 = vector.broadcast %cst_9 : f32 to vector<8x64xf32>
    %30 = arith.select %28, %24, %29 : vector<8x64xi1>, vector<8x64xf32>
    %31 = vector.extract_strided_slice %7 {offsets = [1, 0], sizes = [1, 64], strides = [1, 1]} : vector<4x64xf32> to vector<1x64xf32>
    %32 = vector.broadcast %31 : vector<1x64xf32> to vector<8x64xf32>
    %33 = arith.mulf %32, %30 : vector<8x64xf32>
    %34 = arith.addf %23, %33 : vector<8x64xf32>
    %c3_i32 = arith.constant 3 : i32
    %35 = tpu.dynamic_rotate %9 by %c3_i32 dim 0 : vector<8x64xf32>, i32 -> vector<8x64xf32>
    %c3_i32_10 = arith.constant 3 : i32
    %36 = vector.broadcast %c3_i32_10 : i32 to vector<8x1xi32>
    %37 = arith.cmpi sge, %8, %36 : vector<8x1xi32>
    %cst_11 = arith.constant 0.000000e+00 : f32
    %38 = vector.shape_cast %37 : vector<8x1xi1> to vector<8x1xi1>
    %39 = vector.broadcast %38 : vector<8x1xi1> to vector<8x64xi1>
    %40 = vector.broadcast %cst_11 : f32 to vector<8x64xf32>
    %41 = arith.select %39, %35, %40 : vector<8x64xi1>, vector<8x64xf32>
    %42 = vector.extract_strided_slice %7 {offsets = [0, 0], sizes = [1, 64], strides = [1, 1]} : vector<4x64xf32> to vector<1x64xf32>
    %43 = vector.broadcast %42 : vector<1x64xf32> to vector<8x64xf32>
    %44 = arith.mulf %43, %41 : vector<8x64xf32>
    %45 = arith.addf %34, %44 : vector<8x64xf32>
    %46 = vector.extract_strided_slice %5 {offsets = [8, 0], sizes = [8, 64], strides = [1, 1]} : vector<16x64xf32> to vector<8x64xf32>
    %47 = vector.extract_strided_slice %7 {offsets = [3, 0], sizes = [1, 64], strides = [1, 1]} : vector<4x64xf32> to vector<1x64xf32>
    %48 = vector.broadcast %47 : vector<1x64xf32> to vector<8x64xf32>
    %49 = arith.mulf %48, %46 : vector<8x64xf32>
    %c1_i32_12 = arith.constant 1 : i32
    %50 = tpu.dynamic_rotate %46 by %c1_i32_12 dim 0 : vector<8x64xf32>, i32 -> vector<8x64xf32>
    %c1_i32_13 = arith.constant 1 : i32
    %51 = vector.broadcast %c1_i32_13 : i32 to vector<8x1xi32>
    %52 = arith.cmpi sge, %8, %51 : vector<8x1xi32>
    %cst_14 = arith.constant 0.000000e+00 : f32
    %53 = vector.shape_cast %52 : vector<8x1xi1> to vector<8x1xi1>
    %54 = vector.broadcast %53 : vector<8x1xi1> to vector<8x64xi1>
    %55 = vector.broadcast %cst_14 : f32 to vector<8x64xf32>
    %56 = arith.select %54, %50, %55 : vector<8x64xi1>, vector<8x64xf32>
    %57 = vector.extract_strided_slice %7 {offsets = [2, 0], sizes = [1, 64], strides = [1, 1]} : vector<4x64xf32> to vector<1x64xf32>
    %58 = vector.broadcast %57 : vector<1x64xf32> to vector<8x64xf32>
    %59 = arith.mulf %58, %56 : vector<8x64xf32>
    %60 = arith.addf %49, %59 : vector<8x64xf32>
    %c2_i32_15 = arith.constant 2 : i32
    %61 = tpu.dynamic_rotate %46 by %c2_i32_15 dim 0 : vector<8x64xf32>, i32 -> vector<8x64xf32>
    %c2_i32_16 = arith.constant 2 : i32
    %62 = vector.broadcast %c2_i32_16 : i32 to vector<8x1xi32>
    %63 = arith.cmpi sge, %8, %62 : vector<8x1xi32>
    %cst_17 = arith.constant 0.000000e+00 : f32
    %64 = vector.shape_cast %63 : vector<8x1xi1> to vector<8x1xi1>
    %65 = vector.broadcast %64 : vector<8x1xi1> to vector<8x64xi1>
    %66 = vector.broadcast %cst_17 : f32 to vector<8x64xf32>
    %67 = arith.select %65, %61, %66 : vector<8x64xi1>, vector<8x64xf32>
    %68 = vector.extract_strided_slice %7 {offsets = [1, 0], sizes = [1, 64], strides = [1, 1]} : vector<4x64xf32> to vector<1x64xf32>
    %69 = vector.broadcast %68 : vector<1x64xf32> to vector<8x64xf32>
    %70 = arith.mulf %69, %67 : vector<8x64xf32>
    %71 = arith.addf %60, %70 : vector<8x64xf32>
    %c3_i32_18 = arith.constant 3 : i32
    %72 = tpu.dynamic_rotate %46 by %c3_i32_18 dim 0 : vector<8x64xf32>, i32 -> vector<8x64xf32>
    %c3_i32_19 = arith.constant 3 : i32
    %73 = vector.broadcast %c3_i32_19 : i32 to vector<8x1xi32>
    %74 = arith.cmpi sge, %8, %73 : vector<8x1xi32>
    %cst_20 = arith.constant 0.000000e+00 : f32
    %75 = vector.shape_cast %74 : vector<8x1xi1> to vector<8x1xi1>
    %76 = vector.broadcast %75 : vector<8x1xi1> to vector<8x64xi1>
    %77 = vector.broadcast %cst_20 : f32 to vector<8x64xf32>
    %78 = arith.select %76, %72, %77 : vector<8x64xi1>, vector<8x64xf32>
    %79 = vector.extract_strided_slice %7 {offsets = [0, 0], sizes = [1, 64], strides = [1, 1]} : vector<4x64xf32> to vector<1x64xf32>
    %80 = vector.broadcast %79 : vector<1x64xf32> to vector<8x64xf32>
    %81 = arith.mulf %80, %78 : vector<8x64xf32>
    %82 = arith.addf %71, %81 : vector<8x64xf32>
    %83 = tpu.concatenate %45, %82 in 0 : vector<8x64xf32>, vector<8x64xf32> -> vector<16x64xf32>
    %c0_21 = arith.constant 0 : index
    %c0_22 = arith.constant 0 : index
    %84 = vector.load %arg4[%c0_21, %c0_22] : memref<1x64xf32, #tpu.memory_space<vmem>>, vector<1x64xf32>
    %85 = vector.broadcast %84 : vector<1x64xf32> to vector<16x64xf32>
    %86 = arith.addf %83, %85 : vector<16x64xf32>
    %87 = arith.negf %86 : vector<16x64xf32>
    %88 = math.exp %87 : vector<16x64xf32>
    %cst_23 = arith.constant 1.000000e+00 : f32
    %89 = vector.broadcast %cst_23 : f32 to vector<16x64xf32>
    %90 = arith.addf %89, %88 : vector<16x64xf32>
    %91 = arith.divf %89, %90 : vector<16x64xf32>
    %92 = arith.mulf %86, %91 : vector<16x64xf32>
    %93 = arith.truncf %92 : vector<16x64xf32> to vector<16x64xbf16>
    %c0_24 = arith.constant 0 : index
    %c0_25 = arith.constant 0 : index
    %94 = vector.load %arg5[%c0_24, %c0_25] : memref<64x96xbf16, #tpu.memory_space<vmem>>, vector<64x96xbf16>
    %cst_26 = arith.constant dense<0.000000e+00> : vector<16x96xf32>
    %95 = tpu.matmul %93, %94, %cst_26 {dimension_numbers = #tpu.dot_dimension_numbers<[1], [0], [0], [1], [0, 0, 1, 1], [], []>} : vector<16x64xbf16>, vector<64x96xbf16>, vector<16x96xf32> -> vector<16x96xf32>
    %96 = vector.extract_strided_slice %95 {offsets = [0, 0], sizes = [16, 64], strides = [1, 1]} : vector<16x96xf32> to vector<16x64xf32>
    %c0_27 = arith.constant 0 : index
    %c0_28 = arith.constant 0 : index
    %97 = vector.load %arg6[%c0_27, %c0_28] : memref<1x64xf32, #tpu.memory_space<vmem>>, vector<1x64xf32>
    %98 = vector.broadcast %97 : vector<1x64xf32> to vector<16x64xf32>
    %99 = arith.addf %96, %98 : vector<16x64xf32>
    %cst_29 = arith.constant 2.000000e+01 : f32
    %100 = vector.broadcast %cst_29 : f32 to vector<16x64xf32>
    %101 = arith.minimumf %99, %100 : vector<16x64xf32>
    %102 = math.exp %101 : vector<16x64xf32>
    %cst_30 = arith.constant 1.000000e+00 : f32
    %103 = vector.broadcast %cst_30 : f32 to vector<16x64xf32>
    %104 = arith.addf %103, %102 : vector<16x64xf32>
    %cst_31 = arith.constant 1.000000e+00 : f32
    %105 = vector.broadcast %cst_31 : f32 to vector<16x64xf32>
    %106 = arith.cmpf oeq, %104, %105 : vector<16x64xf32>
    %107 = math.log %104 : vector<16x64xf32>
    %cst_32 = arith.constant 1.000000e+00 : f32
    %108 = vector.broadcast %cst_32 : f32 to vector<16x64xf32>
    %109 = arith.subf %104, %108 : vector<16x64xf32>
    %110 = arith.divf %102, %109 : vector<16x64xf32>
    %111 = arith.mulf %107, %110 : vector<16x64xf32>
    %112 = arith.select %106, %102, %111 : vector<16x64xi1>, vector<16x64xf32>
    %cst_33 = arith.constant 2.000000e+01 : f32
    %113 = vector.broadcast %cst_33 : f32 to vector<16x64xf32>
    %114 = arith.cmpf ogt, %99, %113 : vector<16x64xf32>
    %115 = arith.select %114, %99, %112 : vector<16x64xi1>, vector<16x64xf32>
    %116 = vector.extract_strided_slice %95 {offsets = [0, 64], sizes = [16, 16], strides = [1, 1]} : vector<16x96xf32> to vector<16x16xf32>
    %117 = vector.extract_strided_slice %95 {offsets = [0, 80], sizes = [16, 16], strides = [1, 1]} : vector<16x96xf32> to vector<16x16xf32>
    %c0_34 = arith.constant 0 : index
    %c0_35 = arith.constant 0 : index
    %118 = vector.load %arg7[%c0_34, %c0_35] : memref<16x64xf32, #tpu.memory_space<vmem>>, vector<16x64xf32>
    %119 = math.exp %118 : vector<16x64xf32>
    %cst_36 = arith.constant 0.000000e+00 : f32
    %120 = vector.broadcast %cst_36 : f32 to vector<16x64xf32>
    %121 = arith.subf %120, %119 : vector<16x64xf32>
    %122 = arith.mulf %115, %92 : vector<16x64xf32>
    %123 = vector.extract_strided_slice %115 {offsets = [0, 0], sizes = [8, 64], strides = [1, 1]} : vector<16x64xf32> to vector<8x64xf32>
    %124 = vector.extract_strided_slice %122 {offsets = [0, 0], sizes = [8, 64], strides = [1, 1]} : vector<16x64xf32> to vector<8x64xf32>
    %125 = vector.extract_strided_slice %116 {offsets = [0, 0], sizes = [8, 16], strides = [1, 1]} : vector<16x16xf32> to vector<8x16xf32>
    %126 = vector.shape_cast %123 : vector<8x64xf32> to vector<8x1x64xf32>
    %127 = vector.shape_cast %121 : vector<16x64xf32> to vector<1x16x64xf32>
    %128 = vector.broadcast %126 : vector<8x1x64xf32> to vector<8x16x64xf32>
    %129 = vector.broadcast %127 : vector<1x16x64xf32> to vector<8x16x64xf32>
    %130 = arith.mulf %128, %129 : vector<8x16x64xf32>
    %131 = math.exp %130 : vector<8x16x64xf32>
    %c0_37 = arith.constant 0 : index
    %c0_38 = arith.constant 0 : index
    %c0_39 = arith.constant 0 : index
    %132 = vector.load %arg19[%c0_37, %c0_38, %c0_39] : memref<8x16x64xf32, #tpu.memory_space<vmem>>, vector<8x16x64xf32>
    tpu.vector_store %arg19[%c0_37, %c0_38, %c0_39], %131 {strides = array<i32>} : memref<8x16x64xf32, #tpu.memory_space<vmem>>, vector<8x16x64xf32>,
    %133 = vector.shape_cast %125 : vector<8x16xf32> to vector<8x16x1xf32>
    %134 = vector.shape_cast %124 : vector<8x64xf32> to vector<8x1x64xf32>
    %135 = vector.broadcast %133 : vector<8x16x1xf32> to vector<8x16x64xf32>
    %136 = vector.broadcast %134 : vector<8x1x64xf32> to vector<8x16x64xf32>
    %137 = arith.mulf %135, %136 : vector<8x16x64xf32>
    %c0_40 = arith.constant 0 : index
    %c0_41 = arith.constant 0 : index
    %c0_42 = arith.constant 0 : index
    %138 = vector.load %arg21[%c0_40, %c0_41, %c0_42] : memref<8x16x64xf32, #tpu.memory_space<vmem>>, vector<8x16x64xf32>
    tpu.vector_store %arg21[%c0_40, %c0_41, %c0_42], %137 {strides = array<i32>} : memref<8x16x64xf32, #tpu.memory_space<vmem>>, vector<8x16x64xf32>,
    %139 = vector.extract_strided_slice %115 {offsets = [8, 0], sizes = [8, 64], strides = [1, 1]} : vector<16x64xf32> to vector<8x64xf32>
    %140 = vector.extract_strided_slice %122 {offsets = [8, 0], sizes = [8, 64], strides = [1, 1]} : vector<16x64xf32> to vector<8x64xf32>
    %141 = vector.extract_strided_slice %116 {offsets = [8, 0], sizes = [8, 16], strides = [1, 1]} : vector<16x16xf32> to vector<8x16xf32>
    %142 = vector.shape_cast %139 : vector<8x64xf32> to vector<8x1x64xf32>
    %143 = vector.shape_cast %121 : vector<16x64xf32> to vector<1x16x64xf32>
    %144 = vector.broadcast %142 : vector<8x1x64xf32> to vector<8x16x64xf32>
    %145 = vector.broadcast %143 : vector<1x16x64xf32> to vector<8x16x64xf32>
    %146 = arith.mulf %144, %145 : vector<8x16x64xf32>
    %147 = math.exp %146 : vector<8x16x64xf32>
    %c0_43 = arith.constant 0 : index
    %c0_44 = arith.constant 0 : index
    %c0_45 = arith.constant 0 : index
    %148 = vector.load %arg20[%c0_43, %c0_44, %c0_45] : memref<8x16x64xf32, #tpu.memory_space<vmem>>, vector<8x16x64xf32>
    tpu.vector_store %arg20[%c0_43, %c0_44, %c0_45], %147 {strides = array<i32>} : memref<8x16x64xf32, #tpu.memory_space<vmem>>, vector<8x16x64xf32>,
    %149 = vector.shape_cast %141 : vector<8x16xf32> to vector<8x16x1xf32>
    %150 = vector.shape_cast %140 : vector<8x64xf32> to vector<8x1x64xf32>
    %151 = vector.broadcast %149 : vector<8x16x1xf32> to vector<8x16x64xf32>
    %152 = vector.broadcast %150 : vector<8x1x64xf32> to vector<8x16x64xf32>
    %153 = arith.mulf %151, %152 : vector<8x16x64xf32>
    %c0_46 = arith.constant 0 : index
    %c0_47 = arith.constant 0 : index
    %c0_48 = arith.constant 0 : index
    %154 = vector.load %arg22[%c0_46, %c0_47, %c0_48] : memref<8x16x64xf32, #tpu.memory_space<vmem>>, vector<8x16x64xf32>
    tpu.vector_store %arg22[%c0_46, %c0_47, %c0_48], %153 {strides = array<i32>} : memref<8x16x64xf32, #tpu.memory_space<vmem>>, vector<8x16x64xf32>,
    %cst_49 = arith.constant 0.000000e+00 : f32
    %155 = vector.broadcast %cst_49 : f32 to vector<16x64xf32>
    %cst_50 = arith.constant 0.000000e+00 : f32
    %156 = vector.broadcast %cst_50 : f32 to vector<16x64xf32>
    %c0_i32 = arith.constant 0 : i32
    %157 = arith.index_cast %c0_i32 : i32 to index
    %c0_51 = arith.constant 0 : index
    %c0_52 = arith.constant 0 : index
    %158 = vector.load %arg19[%157, %c0_51, %c0_52] : memref<8x16x64xf32, #tpu.memory_space<vmem>>, vector<1x16x64xf32>
    %159 = vector.shape_cast %158 : vector<1x16x64xf32> to vector<16x64xf32>
    %160 = arith.mulf %159, %155 : vector<16x64xf32>
    %161 = arith.index_cast %c0_i32 : i32 to index
    %c0_53 = arith.constant 0 : index
    %c0_54 = arith.constant 0 : index
    %162 = vector.load %arg21[%161, %c0_53, %c0_54] : memref<8x16x64xf32, #tpu.memory_space<vmem>>, vector<1x16x64xf32>
    %163 = vector.shape_cast %162 : vector<1x16x64xf32> to vector<16x64xf32>
    %164 = arith.addf %160, %163 : vector<16x64xf32>
    %165 = arith.index_cast %c0_i32 : i32 to index
    %c0_55 = arith.constant 0 : index
    %c0_56 = arith.constant 0 : index
    %166 = vector.load %arg21[%165, %c0_55, %c0_56] : memref<8x16x64xf32, #tpu.memory_space<vmem>>, vector<1x16x64xf32>
    %167 = vector.shape_cast %166 : vector<1x16x64xf32> to vector<16x64xf32>
    %168 = vector.shape_cast %164 : vector<16x64xf32> to vector<1x16x64xf32>
    tpu.vector_store %arg21[%165, %c0_55, %c0_56], %168 {strides = array<i32>} : memref<8x16x64xf32, #tpu.memory_space<vmem>>, vector<1x16x64xf32>,
    %169 = arith.index_cast %c0_i32 : i32 to index
    %c0_57 = arith.constant 0 : index
    %c0_58 = arith.constant 0 : index
    %170 = vector.load %arg20[%169, %c0_57, %c0_58] : memref<8x16x64xf32, #tpu.memory_space<vmem>>, vector<1x16x64xf32>
    %171 = vector.shape_cast %170 : vector<1x16x64xf32> to vector<16x64xf32>
    %172 = arith.mulf %171, %156 : vector<16x64xf32>
    %173 = arith.index_cast %c0_i32 : i32 to index
    %c0_59 = arith.constant 0 : index
    %c0_60 = arith.constant 0 : index
    %174 = vector.load %arg22[%173, %c0_59, %c0_60] : memref<8x16x64xf32, #tpu.memory_space<vmem>>, vector<1x16x64xf32>
    %175 = vector.shape_cast %174 : vector<1x16x64xf32> to vector<16x64xf32>
    %176 = arith.addf %172, %175 : vector<16x64xf32>
    %177 = arith.index_cast %c0_i32 : i32 to index
    %c0_61 = arith.constant 0 : index
    %c0_62 = arith.constant 0 : index
    %178 = vector.load %arg22[%177, %c0_61, %c0_62] : memref<8x16x64xf32, #tpu.memory_space<vmem>>, vector<1x16x64xf32>
    %179 = vector.shape_cast %178 : vector<1x16x64xf32> to vector<16x64xf32>
    %180 = vector.shape_cast %176 : vector<16x64xf32> to vector<1x16x64xf32>
    tpu.vector_store %arg22[%177, %c0_61, %c0_62], %180 {strides = array<i32>} : memref<8x16x64xf32, #tpu.memory_space<vmem>>, vector<1x16x64xf32>,
    %c1_i32_63 = arith.constant 1 : i32
    %181 = arith.index_cast %c1_i32_63 : i32 to index
    %c0_64 = arith.constant 0 : index
    %c0_65 = arith.constant 0 : index
    %182 = vector.load %arg19[%181, %c0_64, %c0_65] : memref<8x16x64xf32, #tpu.memory_space<vmem>>, vector<1x16x64xf32>
    %183 = vector.shape_cast %182 : vector<1x16x64xf32> to vector<16x64xf32>
    %184 = arith.mulf %183, %164 : vector<16x64xf32>
    %185 = arith.index_cast %c1_i32_63 : i32 to index
    %c0_66 = arith.constant 0 : index
    %c0_67 = arith.constant 0 : index
    %186 = vector.load %arg21[%185, %c0_66, %c0_67] : memref<8x16x64xf32, #tpu.memory_space<vmem>>, vector<1x16x64xf32>
    %187 = vector.shape_cast %186 : vector<1x16x64xf32> to vector<16x64xf32>
    %188 = arith.addf %184, %187 : vector<16x64xf32>
    %189 = arith.index_cast %c1_i32_63 : i32 to index
    %c0_68 = arith.constant 0 : index
    %c0_69 = arith.constant 0 : index
    %190 = vector.load %arg21[%189, %c0_68, %c0_69] : memref<8x16x64xf32, #tpu.memory_space<vmem>>, vector<1x16x64xf32>
    %191 = vector.shape_cast %190 : vector<1x16x64xf32> to vector<16x64xf32>
    %192 = vector.shape_cast %188 : vector<16x64xf32> to vector<1x16x64xf32>
    tpu.vector_store %arg21[%189, %c0_68, %c0_69], %192 {strides = array<i32>} : memref<8x16x64xf32, #tpu.memory_space<vmem>>, vector<1x16x64xf32>,
    %193 = arith.index_cast %c1_i32_63 : i32 to index
    %c0_70 = arith.constant 0 : index
    %c0_71 = arith.constant 0 : index
    %194 = vector.load %arg20[%193, %c0_70, %c0_71] : memref<8x16x64xf32, #tpu.memory_space<vmem>>, vector<1x16x64xf32>
    %195 = vector.shape_cast %194 : vector<1x16x64xf32> to vector<16x64xf32>
    %196 = arith.mulf %195, %176 : vector<16x64xf32>
    %197 = arith.index_cast %c1_i32_63 : i32 to index
    %c0_72 = arith.constant 0 : index
    %c0_73 = arith.constant 0 : index
    %198 = vector.load %arg22[%197, %c0_72, %c0_73] : memref<8x16x64xf32, #tpu.memory_space<vmem>>, vector<1x16x64xf32>
    %199 = vector.shape_cast %198 : vector<1x16x64xf32> to vector<16x64xf32>
    %200 = arith.addf %196, %199 : vector<16x64xf32>
    %201 = arith.index_cast %c1_i32_63 : i32 to index
    %c0_74 = arith.constant 0 : index
    %c0_75 = arith.constant 0 : index
    %202 = vector.load %arg22[%201, %c0_74, %c0_75] : memref<8x16x64xf32, #tpu.memory_space<vmem>>, vector<1x16x64xf32>
    %203 = vector.shape_cast %202 : vector<1x16x64xf32> to vector<16x64xf32>
    %204 = vector.shape_cast %200 : vector<16x64xf32> to vector<1x16x64xf32>
    tpu.vector_store %arg22[%201, %c0_74, %c0_75], %204 {strides = array<i32>} : memref<8x16x64xf32, #tpu.memory_space<vmem>>, vector<1x16x64xf32>,
    %c2_i32_76 = arith.constant 2 : i32
    %205 = arith.index_cast %c2_i32_76 : i32 to index
    %c0_77 = arith.constant 0 : index
    %c0_78 = arith.constant 0 : index
    %206 = vector.load %arg19[%205, %c0_77, %c0_78] : memref<8x16x64xf32, #tpu.memory_space<vmem>>, vector<1x16x64xf32>
    %207 = vector.shape_cast %206 : vector<1x16x64xf32> to vector<16x64xf32>
    %208 = arith.mulf %207, %188 : vector<16x64xf32>
    %209 = arith.index_cast %c2_i32_76 : i32 to index
    %c0_79 = arith.constant 0 : index
    %c0_80 = arith.constant 0 : index
    %210 = vector.load %arg21[%209, %c0_79, %c0_80] : memref<8x16x64xf32, #tpu.memory_space<vmem>>, vector<1x16x64xf32>
    %211 = vector.shape_cast %210 : vector<1x16x64xf32> to vector<16x64xf32>
    %212 = arith.addf %208, %211 : vector<16x64xf32>
    %213 = arith.index_cast %c2_i32_76 : i32 to index
    %c0_81 = arith.constant 0 : index
    %c0_82 = arith.constant 0 : index
    %214 = vector.load %arg21[%213, %c0_81, %c0_82] : memref<8x16x64xf32, #tpu.memory_space<vmem>>, vector<1x16x64xf32>
    %215 = vector.shape_cast %214 : vector<1x16x64xf32> to vector<16x64xf32>
    %216 = vector.shape_cast %212 : vector<16x64xf32> to vector<1x16x64xf32>
    tpu.vector_store %arg21[%213, %c0_81, %c0_82], %216 {strides = array<i32>} : memref<8x16x64xf32, #tpu.memory_space<vmem>>, vector<1x16x64xf32>,
    %217 = arith.index_cast %c2_i32_76 : i32 to index
    %c0_83 = arith.constant 0 : index
    %c0_84 = arith.constant 0 : index
    %218 = vector.load %arg20[%217, %c0_83, %c0_84] : memref<8x16x64xf32, #tpu.memory_space<vmem>>, vector<1x16x64xf32>
    %219 = vector.shape_cast %218 : vector<1x16x64xf32> to vector<16x64xf32>
    %220 = arith.mulf %219, %200 : vector<16x64xf32>
    %221 = arith.index_cast %c2_i32_76 : i32 to index
    %c0_85 = arith.constant 0 : index
    %c0_86 = arith.constant 0 : index
    %222 = vector.load %arg22[%221, %c0_85, %c0_86] : memref<8x16x64xf32, #tpu.memory_space<vmem>>, vector<1x16x64xf32>
    %223 = vector.shape_cast %222 : vector<1x16x64xf32> to vector<16x64xf32>
    %224 = arith.addf %220, %223 : vector<16x64xf32>
    %225 = arith.index_cast %c2_i32_76 : i32 to index
    %c0_87 = arith.constant 0 : index
    %c0_88 = arith.constant 0 : index
    %226 = vector.load %arg22[%225, %c0_87, %c0_88] : memref<8x16x64xf32, #tpu.memory_space<vmem>>, vector<1x16x64xf32>
    %227 = vector.shape_cast %226 : vector<1x16x64xf32> to vector<16x64xf32>
    %228 = vector.shape_cast %224 : vector<16x64xf32> to vector<1x16x64xf32>
    tpu.vector_store %arg22[%225, %c0_87, %c0_88], %228 {strides = array<i32>} : memref<8x16x64xf32, #tpu.memory_space<vmem>>, vector<1x16x64xf32>,
    %c3_i32_89 = arith.constant 3 : i32
    %229 = arith.index_cast %c3_i32_89 : i32 to index
    %c0_90 = arith.constant 0 : index
    %c0_91 = arith.constant 0 : index
    %230 = vector.load %arg19[%229, %c0_90, %c0_91] : memref<8x16x64xf32, #tpu.memory_space<vmem>>, vector<1x16x64xf32>
    %231 = vector.shape_cast %230 : vector<1x16x64xf32> to vector<16x64xf32>
    %232 = arith.mulf %231, %212 : vector<16x64xf32>
    %233 = arith.index_cast %c3_i32_89 : i32 to index
    %c0_92 = arith.constant 0 : index
    %c0_93 = arith.constant 0 : index
    %234 = vector.load %arg21[%233, %c0_92, %c0_93] : memref<8x16x64xf32, #tpu.memory_space<vmem>>, vector<1x16x64xf32>
    %235 = vector.shape_cast %234 : vector<1x16x64xf32> to vector<16x64xf32>
    %236 = arith.addf %232, %235 : vector<16x64xf32>
    %237 = arith.index_cast %c3_i32_89 : i32 to index
    %c0_94 = arith.constant 0 : index
    %c0_95 = arith.constant 0 : index
    %238 = vector.load %arg21[%237, %c0_94, %c0_95] : memref<8x16x64xf32, #tpu.memory_space<vmem>>, vector<1x16x64xf32>
    %239 = vector.shape_cast %238 : vector<1x16x64xf32> to vector<16x64xf32>
    %240 = vector.shape_cast %236 : vector<16x64xf32> to vector<1x16x64xf32>
    tpu.vector_store %arg21[%237, %c0_94, %c0_95], %240 {strides = array<i32>} : memref<8x16x64xf32, #tpu.memory_space<vmem>>, vector<1x16x64xf32>,
    %241 = arith.index_cast %c3_i32_89 : i32 to index
    %c0_96 = arith.constant 0 : index
    %c0_97 = arith.constant 0 : index
    %242 = vector.load %arg20[%241, %c0_96, %c0_97] : memref<8x16x64xf32, #tpu.memory_space<vmem>>, vector<1x16x64xf32>
    %243 = vector.shape_cast %242 : vector<1x16x64xf32> to vector<16x64xf32>
    %244 = arith.mulf %243, %224 : vector<16x64xf32>
    %245 = arith.index_cast %c3_i32_89 : i32 to index
    %c0_98 = arith.constant 0 : index
    %c0_99 = arith.constant 0 : index
    %246 = vector.load %arg22[%245, %c0_98, %c0_99] : memref<8x16x64xf32, #tpu.memory_space<vmem>>, vector<1x16x64xf32>
    %247 = vector.shape_cast %246 : vector<1x16x64xf32> to vector<16x64xf32>
    %248 = arith.addf %244, %247 : vector<16x64xf32>
    %249 = arith.index_cast %c3_i32_89 : i32 to index
    %c0_100 = arith.constant 0 : index
    %c0_101 = arith.constant 0 : index
    %250 = vector.load %arg22[%249, %c0_100, %c0_101] : memref<8x16x64xf32, #tpu.memory_space<vmem>>, vector<1x16x64xf32>
    %251 = vector.shape_cast %250 : vector<1x16x64xf32> to vector<16x64xf32>
    %252 = vector.shape_cast %248 : vector<16x64xf32> to vector<1x16x64xf32>
    tpu.vector_store %arg22[%249, %c0_100, %c0_101], %252 {strides = array<i32>} : memref<8x16x64xf32, #tpu.memory_space<vmem>>, vector<1x16x64xf32>,
    %c4_i32 = arith.constant 4 : i32
    %253 = arith.index_cast %c4_i32 : i32 to index
    %c0_102 = arith.constant 0 : index
    %c0_103 = arith.constant 0 : index
    %254 = vector.load %arg19[%253, %c0_102, %c0_103] : memref<8x16x64xf32, #tpu.memory_space<vmem>>, vector<1x16x64xf32>
    %255 = vector.shape_cast %254 : vector<1x16x64xf32> to vector<16x64xf32>
    %256 = arith.mulf %255, %236 : vector<16x64xf32>
    %257 = arith.index_cast %c4_i32 : i32 to index
    %c0_104 = arith.constant 0 : index
    %c0_105 = arith.constant 0 : index
    %258 = vector.load %arg21[%257, %c0_104, %c0_105] : memref<8x16x64xf32, #tpu.memory_space<vmem>>, vector<1x16x64xf32>
    %259 = vector.shape_cast %258 : vector<1x16x64xf32> to vector<16x64xf32>
    %260 = arith.addf %256, %259 : vector<16x64xf32>
    %261 = arith.index_cast %c4_i32 : i32 to index
    %c0_106 = arith.constant 0 : index
    %c0_107 = arith.constant 0 : index
    %262 = vector.load %arg21[%261, %c0_106, %c0_107] : memref<8x16x64xf32, #tpu.memory_space<vmem>>, vector<1x16x64xf32>
    %263 = vector.shape_cast %262 : vector<1x16x64xf32> to vector<16x64xf32>
    %264 = vector.shape_cast %260 : vector<16x64xf32> to vector<1x16x64xf32>
    tpu.vector_store %arg21[%261, %c0_106, %c0_107], %264 {strides = array<i32>} : memref<8x16x64xf32, #tpu.memory_space<vmem>>, vector<1x16x64xf32>,
    %265 = arith.index_cast %c4_i32 : i32 to index
    %c0_108 = arith.constant 0 : index
    %c0_109 = arith.constant 0 : index
    %266 = vector.load %arg20[%265, %c0_108, %c0_109] : memref<8x16x64xf32, #tpu.memory_space<vmem>>, vector<1x16x64xf32>
    %267 = vector.shape_cast %266 : vector<1x16x64xf32> to vector<16x64xf32>
    %268 = arith.mulf %267, %248 : vector<16x64xf32>
    %269 = arith.index_cast %c4_i32 : i32 to index
    %c0_110 = arith.constant 0 : index
    %c0_111 = arith.constant 0 : index
    %270 = vector.load %arg22[%269, %c0_110, %c0_111] : memref<8x16x64xf32, #tpu.memory_space<vmem>>, vector<1x16x64xf32>
    %271 = vector.shape_cast %270 : vector<1x16x64xf32> to vector<16x64xf32>
    %272 = arith.addf %268, %271 : vector<16x64xf32>
    %273 = arith.index_cast %c4_i32 : i32 to index
    %c0_112 = arith.constant 0 : index
    %c0_113 = arith.constant 0 : index
    %274 = vector.load %arg22[%273, %c0_112, %c0_113] : memref<8x16x64xf32, #tpu.memory_space<vmem>>, vector<1x16x64xf32>
    %275 = vector.shape_cast %274 : vector<1x16x64xf32> to vector<16x64xf32>
    %276 = vector.shape_cast %272 : vector<16x64xf32> to vector<1x16x64xf32>
    tpu.vector_store %arg22[%273, %c0_112, %c0_113], %276 {strides = array<i32>} : memref<8x16x64xf32, #tpu.memory_space<vmem>>, vector<1x16x64xf32>,
    %c5_i32 = arith.constant 5 : i32
    %277 = arith.index_cast %c5_i32 : i32 to index
    %c0_114 = arith.constant 0 : index
    %c0_115 = arith.constant 0 : index
    %278 = vector.load %arg19[%277, %c0_114, %c0_115] : memref<8x16x64xf32, #tpu.memory_space<vmem>>, vector<1x16x64xf32>
    %279 = vector.shape_cast %278 : vector<1x16x64xf32> to vector<16x64xf32>
    %280 = arith.mulf %279, %260 : vector<16x64xf32>
    %281 = arith.index_cast %c5_i32 : i32 to index
    %c0_116 = arith.constant 0 : index
    %c0_117 = arith.constant 0 : index
    %282 = vector.load %arg21[%281, %c0_116, %c0_117] : memref<8x16x64xf32, #tpu.memory_space<vmem>>, vector<1x16x64xf32>
    %283 = vector.shape_cast %282 : vector<1x16x64xf32> to vector<16x64xf32>
    %284 = arith.addf %280, %283 : vector<16x64xf32>
    %285 = arith.index_cast %c5_i32 : i32 to index
    %c0_118 = arith.constant 0 : index
    %c0_119 = arith.constant 0 : index
    %286 = vector.load %arg21[%285, %c0_118, %c0_119] : memref<8x16x64xf32, #tpu.memory_space<vmem>>, vector<1x16x64xf32>
    %287 = vector.shape_cast %286 : vector<1x16x64xf32> to vector<16x64xf32>
    %288 = vector.shape_cast %284 : vector<16x64xf32> to vector<1x16x64xf32>
    tpu.vector_store %arg21[%285, %c0_118, %c0_119], %288 {strides = array<i32>} : memref<8x16x64xf32, #tpu.memory_space<vmem>>, vector<1x16x64xf32>,
    %289 = arith.index_cast %c5_i32 : i32 to index
    %c0_120 = arith.constant 0 : index
    %c0_121 = arith.constant 0 : index
    %290 = vector.load %arg20[%289, %c0_120, %c0_121] : memref<8x16x64xf32, #tpu.memory_space<vmem>>, vector<1x16x64xf32>
    %291 = vector.shape_cast %290 : vector<1x16x64xf32> to vector<16x64xf32>
    %292 = arith.mulf %291, %272 : vector<16x64xf32>
    %293 = arith.index_cast %c5_i32 : i32 to index
    %c0_122 = arith.constant 0 : index
    %c0_123 = arith.constant 0 : index
    %294 = vector.load %arg22[%293, %c0_122, %c0_123] : memref<8x16x64xf32, #tpu.memory_space<vmem>>, vector<1x16x64xf32>
    %295 = vector.shape_cast %294 : vector<1x16x64xf32> to vector<16x64xf32>
    %296 = arith.addf %292, %295 : vector<16x64xf32>
    %297 = arith.index_cast %c5_i32 : i32 to index
    %c0_124 = arith.constant 0 : index
    %c0_125 = arith.constant 0 : index
    %298 = vector.load %arg22[%297, %c0_124, %c0_125] : memref<8x16x64xf32, #tpu.memory_space<vmem>>, vector<1x16x64xf32>
    %299 = vector.shape_cast %298 : vector<1x16x64xf32> to vector<16x64xf32>
    %300 = vector.shape_cast %296 : vector<16x64xf32> to vector<1x16x64xf32>
    tpu.vector_store %arg22[%297, %c0_124, %c0_125], %300 {strides = array<i32>} : memref<8x16x64xf32, #tpu.memory_space<vmem>>, vector<1x16x64xf32>,
    %c6_i32 = arith.constant 6 : i32
    %301 = arith.index_cast %c6_i32 : i32 to index
    %c0_126 = arith.constant 0 : index
    %c0_127 = arith.constant 0 : index
    %302 = vector.load %arg19[%301, %c0_126, %c0_127] : memref<8x16x64xf32, #tpu.memory_space<vmem>>, vector<1x16x64xf32>
    %303 = vector.shape_cast %302 : vector<1x16x64xf32> to vector<16x64xf32>
    %304 = arith.mulf %303, %284 : vector<16x64xf32>
    %305 = arith.index_cast %c6_i32 : i32 to index
    %c0_128 = arith.constant 0 : index
    %c0_129 = arith.constant 0 : index
    %306 = vector.load %arg21[%305, %c0_128, %c0_129] : memref<8x16x64xf32, #tpu.memory_space<vmem>>, vector<1x16x64xf32>
    %307 = vector.shape_cast %306 : vector<1x16x64xf32> to vector<16x64xf32>
    %308 = arith.addf %304, %307 : vector<16x64xf32>
    %309 = arith.index_cast %c6_i32 : i32 to index
    %c0_130 = arith.constant 0 : index
    %c0_131 = arith.constant 0 : index
    %310 = vector.load %arg21[%309, %c0_130, %c0_131] : memref<8x16x64xf32, #tpu.memory_space<vmem>>, vector<1x16x64xf32>
    %311 = vector.shape_cast %310 : vector<1x16x64xf32> to vector<16x64xf32>
    %312 = vector.shape_cast %308 : vector<16x64xf32> to vector<1x16x64xf32>
    tpu.vector_store %arg21[%309, %c0_130, %c0_131], %312 {strides = array<i32>} : memref<8x16x64xf32, #tpu.memory_space<vmem>>, vector<1x16x64xf32>,
    %313 = arith.index_cast %c6_i32 : i32 to index
    %c0_132 = arith.constant 0 : index
    %c0_133 = arith.constant 0 : index
    %314 = vector.load %arg20[%313, %c0_132, %c0_133] : memref<8x16x64xf32, #tpu.memory_space<vmem>>, vector<1x16x64xf32>
    %315 = vector.shape_cast %314 : vector<1x16x64xf32> to vector<16x64xf32>
    %316 = arith.mulf %315, %296 : vector<16x64xf32>
    %317 = arith.index_cast %c6_i32 : i32 to index
    %c0_134 = arith.constant 0 : index
    %c0_135 = arith.constant 0 : index
    %318 = vector.load %arg22[%317, %c0_134, %c0_135] : memref<8x16x64xf32, #tpu.memory_space<vmem>>, vector<1x16x64xf32>
    %319 = vector.shape_cast %318 : vector<1x16x64xf32> to vector<16x64xf32>
    %320 = arith.addf %316, %319 : vector<16x64xf32>
    %321 = arith.index_cast %c6_i32 : i32 to index
    %c0_136 = arith.constant 0 : index
    %c0_137 = arith.constant 0 : index
    %322 = vector.load %arg22[%321, %c0_136, %c0_137] : memref<8x16x64xf32, #tpu.memory_space<vmem>>, vector<1x16x64xf32>
    %323 = vector.shape_cast %322 : vector<1x16x64xf32> to vector<16x64xf32>
    %324 = vector.shape_cast %320 : vector<16x64xf32> to vector<1x16x64xf32>
    tpu.vector_store %arg22[%321, %c0_136, %c0_137], %324 {strides = array<i32>} : memref<8x16x64xf32, #tpu.memory_space<vmem>>, vector<1x16x64xf32>,
    %c7_i32 = arith.constant 7 : i32
    %325 = arith.index_cast %c7_i32 : i32 to index
    %c0_138 = arith.constant 0 : index
    %c0_139 = arith.constant 0 : index
    %326 = vector.load %arg19[%325, %c0_138, %c0_139] : memref<8x16x64xf32, #tpu.memory_space<vmem>>, vector<1x16x64xf32>
    %327 = vector.shape_cast %326 : vector<1x16x64xf32> to vector<16x64xf32>
    %328 = arith.mulf %327, %308 : vector<16x64xf32>
    %329 = arith.index_cast %c7_i32 : i32 to index
    %c0_140 = arith.constant 0 : index
    %c0_141 = arith.constant 0 : index
    %330 = vector.load %arg21[%329, %c0_140, %c0_141] : memref<8x16x64xf32, #tpu.memory_space<vmem>>, vector<1x16x64xf32>
    %331 = vector.shape_cast %330 : vector<1x16x64xf32> to vector<16x64xf32>
    %332 = arith.addf %328, %331 : vector<16x64xf32>
    %333 = arith.index_cast %c7_i32 : i32 to index
    %c0_142 = arith.constant 0 : index
    %c0_143 = arith.constant 0 : index
    %334 = vector.load %arg21[%333, %c0_142, %c0_143] : memref<8x16x64xf32, #tpu.memory_space<vmem>>, vector<1x16x64xf32>
    %335 = vector.shape_cast %334 : vector<1x16x64xf32> to vector<16x64xf32>
    %336 = vector.shape_cast %332 : vector<16x64xf32> to vector<1x16x64xf32>
    tpu.vector_store %arg21[%333, %c0_142, %c0_143], %336 {strides = array<i32>} : memref<8x16x64xf32, #tpu.memory_space<vmem>>, vector<1x16x64xf32>,
    %337 = arith.index_cast %c7_i32 : i32 to index
    %c0_144 = arith.constant 0 : index
    %c0_145 = arith.constant 0 : index
    %338 = vector.load %arg20[%337, %c0_144, %c0_145] : memref<8x16x64xf32, #tpu.memory_space<vmem>>, vector<1x16x64xf32>
    %339 = vector.shape_cast %338 : vector<1x16x64xf32> to vector<16x64xf32>
    %340 = arith.mulf %339, %320 : vector<16x64xf32>
    %341 = arith.index_cast %c7_i32 : i32 to index
    %c0_146 = arith.constant 0 : index
    %c0_147 = arith.constant 0 : index
    %342 = vector.load %arg22[%341, %c0_146, %c0_147] : memref<8x16x64xf32, #tpu.memory_space<vmem>>, vector<1x16x64xf32>
    %343 = vector.shape_cast %342 : vector<1x16x64xf32> to vector<16x64xf32>
    %344 = arith.addf %340, %343 : vector<16x64xf32>
    %345 = arith.index_cast %c7_i32 : i32 to index
    %c0_148 = arith.constant 0 : index
    %c0_149 = arith.constant 0 : index
    %346 = vector.load %arg22[%345, %c0_148, %c0_149] : memref<8x16x64xf32, #tpu.memory_space<vmem>>, vector<1x16x64xf32>
    %347 = vector.shape_cast %346 : vector<1x16x64xf32> to vector<16x64xf32>
    %348 = vector.shape_cast %344 : vector<16x64xf32> to vector<1x16x64xf32>
    tpu.vector_store %arg22[%345, %c0_148, %c0_149], %348 {strides = array<i32>} : memref<8x16x64xf32, #tpu.memory_space<vmem>>, vector<1x16x64xf32>,
    %c8_i32 = arith.constant 8 : i32
    %349 = vector.extract_strided_slice %117 {offsets = [0, 0], sizes = [8, 16], strides = [1, 1]} : vector<16x16xf32> to vector<8x16xf32>
    %350 = vector.shape_cast %349 : vector<8x16xf32> to vector<8x16x1xf32>
    %c0_150 = arith.constant 0 : index
    %c0_151 = arith.constant 0 : index
    %c0_152 = arith.constant 0 : index
    %351 = vector.load %arg21[%c0_150, %c0_151, %c0_152] : memref<8x16x64xf32, #tpu.memory_space<vmem>>, vector<8x16x64xf32>
    %352 = vector.broadcast %350 : vector<8x16x1xf32> to vector<8x16x64xf32>
    %353 = arith.mulf %352, %351 : vector<8x16x64xf32>
    %cst_153 = arith.constant dense<0.000000e+00> : vector<8x64xf32>
    %354 = vector.multi_reduction <add>, %353, %cst_153 [1] : vector<8x16x64xf32> to vector<8x64xf32>
    %355 = vector.extract_strided_slice %117 {offsets = [8, 0], sizes = [8, 16], strides = [1, 1]} : vector<16x16xf32> to vector<8x16xf32>
    %356 = vector.shape_cast %355 : vector<8x16xf32> to vector<8x16x1xf32>
    %c0_154 = arith.constant 0 : index
    %c0_155 = arith.constant 0 : index
    %c0_156 = arith.constant 0 : index
    %357 = vector.load %arg22[%c0_154, %c0_155, %c0_156] : memref<8x16x64xf32, #tpu.memory_space<vmem>>, vector<8x16x64xf32>
    %358 = vector.broadcast %356 : vector<8x16x1xf32> to vector<8x16x64xf32>
    %359 = arith.mulf %358, %357 : vector<8x16x64xf32>
    %cst_157 = arith.constant dense<0.000000e+00> : vector<8x64xf32>
    %360 = vector.multi_reduction <add>, %359, %cst_157 [1] : vector<8x16x64xf32> to vector<8x64xf32>
    %361 = tpu.concatenate %354, %360 in 0 : vector<8x64xf32>, vector<8x64xf32> -> vector<16x64xf32>
    %c0_158 = arith.constant 0 : index
    %c0_159 = arith.constant 0 : index
    %362 = vector.load %arg8[%c0_158, %c0_159] : memref<1x64xf32, #tpu.memory_space<vmem>>, vector<1x64xf32>
    %363 = vector.broadcast %362 : vector<1x64xf32> to vector<16x64xf32>
    %364 = arith.mulf %92, %363 : vector<16x64xf32>
    %365 = arith.addf %361, %364 : vector<16x64xf32>
    %366 = arith.negf %6 : vector<16x64xf32>
    %367 = math.exp %366 : vector<16x64xf32>
    %cst_160 = arith.constant 1.000000e+00 : f32
    %368 = vector.broadcast %cst_160 : f32 to vector<16x64xf32>
    %369 = arith.addf %368, %367 : vector<16x64xf32>
    %370 = arith.divf %368, %369 : vector<16x64xf32>
    %371 = arith.mulf %6, %370 : vector<16x64xf32>
    %372 = arith.mulf %365, %371 : vector<16x64xf32>
    %373 = arith.truncf %372 : vector<16x64xf32> to vector<16x64xbf16>
    %c0_161 = arith.constant 0 : index
    %c0_162 = arith.constant 0 : index
    %374 = vector.load %arg9[%c0_161, %c0_162] : memref<64x32xbf16, #tpu.memory_space<vmem>>, vector<64x32xbf16>
    %cst_163 = arith.constant dense<0.000000e+00> : vector<16x32xf32>
    %375 = tpu.matmul %373, %374, %cst_163 {dimension_numbers = #tpu.dot_dimension_numbers<[1], [0], [0], [1], [0, 0, 1, 1], [], []>} : vector<16x64xbf16>, vector<64x32xbf16>, vector<16x32xf32> -> vector<16x32xf32>
    %376 = arith.addf %375, %1 : vector<16x32xf32>
    %c0_164 = arith.constant 0 : index
    %c0_165 = arith.constant 0 : index
    %377 = vector.load %arg10[%c0_164, %c0_165] : memref<1x32xf32, #tpu.memory_space<vmem>>, vector<1x32xf32>
    %c0_166 = arith.constant 0 : index
    %c0_167 = arith.constant 0 : index
    %378 = vector.load %arg11[%c0_166, %c0_167] : memref<1x32xf32, #tpu.memory_space<vmem>>, vector<1x32xf32>
    %cst_168 = arith.constant dense<0.000000e+00> : vector<16xf32>
    %379 = vector.multi_reduction <add>, %376, %cst_168 [1] : vector<16x32xf32> to vector<16xf32>
    %380 = vector.shape_cast %379 : vector<16xf32> to vector<16x1xf32>
    %cst_169 = arith.constant 3.200000e+01 : f32
    %381 = vector.broadcast %cst_169 : f32 to vector<16x1xf32>
    %382 = arith.divf %380, %381 : vector<16x1xf32>
    %383 = vector.broadcast %382 : vector<16x1xf32> to vector<16x32xf32>
    %384 = arith.subf %376, %383 : vector<16x32xf32>
    %385 = arith.mulf %384, %384 : vector<16x32xf32>
    %cst_170 = arith.constant dense<0.000000e+00> : vector<16xf32>
    %386 = vector.multi_reduction <add>, %385, %cst_170 [1] : vector<16x32xf32> to vector<16xf32>
    %387 = vector.shape_cast %386 : vector<16xf32> to vector<16x1xf32>
    %cst_171 = arith.constant 3.200000e+01 : f32
    %388 = vector.broadcast %cst_171 : f32 to vector<16x1xf32>
    %389 = arith.divf %387, %388 : vector<16x1xf32>
    %cst_172 = arith.constant 9.99999996E-13 : f32
    %390 = vector.broadcast %cst_172 : f32 to vector<16x1xf32>
    %391 = arith.addf %389, %390 : vector<16x1xf32>
    %392 = math.rsqrt %391 : vector<16x1xf32>
    %393 = vector.broadcast %392 : vector<16x1xf32> to vector<16x32xf32>
    %394 = arith.mulf %384, %393 : vector<16x32xf32>
    %395 = vector.broadcast %377 : vector<1x32xf32> to vector<16x32xf32>
    %396 = arith.mulf %394, %395 : vector<16x32xf32>
    %397 = vector.broadcast %378 : vector<1x32xf32> to vector<16x32xf32>
    %398 = arith.addf %396, %397 : vector<16x32xf32>
    %399 = arith.truncf %398 : vector<16x32xf32> to vector<16x32xbf16>
    %c0_173 = arith.constant 0 : index
    %c0_174 = arith.constant 0 : index
    %400 = vector.load %arg12[%c0_173, %c0_174] : memref<32x128xbf16, #tpu.memory_space<vmem>>, vector<32x128xbf16>
    %cst_175 = arith.constant dense<0.000000e+00> : vector<16x128xf32>
    %401 = tpu.matmul %399, %400, %cst_175 {dimension_numbers = #tpu.dot_dimension_numbers<[1], [0], [0], [1], [0, 0, 1, 1], [], []>} : vector<16x32xbf16>, vector<32x128xbf16>, vector<16x128xf32> -> vector<16x128xf32>
    %c0_176 = arith.constant 0 : index
    %c0_177 = arith.constant 0 : index
    %402 = vector.load %arg13[%c0_176, %c0_177] : memref<1x128xf32, #tpu.memory_space<vmem>>, vector<1x128xf32>
    %403 = vector.broadcast %402 : vector<1x128xf32> to vector<16x128xf32>
    %404 = arith.addf %401, %403 : vector<16x128xf32>
    %cst_178 = arith.constant 5.000000e-01 : f32
    %405 = vector.broadcast %cst_178 : f32 to vector<16x128xf32>
    %406 = arith.mulf %405, %404 : vector<16x128xf32>
    %cst_179 = arith.constant 0.707106769 : f32
    %407 = vector.broadcast %cst_179 : f32 to vector<16x128xf32>
    %408 = arith.mulf %404, %407 : vector<16x128xf32>
    %409 = math.absf %408 : vector<16x128xf32>
    %cst_180 = arith.constant 0.327591091 : f32
    %410 = vector.broadcast %cst_180 : f32 to vector<16x128xf32>
    %411 = arith.mulf %410, %409 : vector<16x128xf32>
    %cst_181 = arith.constant 1.000000e+00 : f32
    %412 = vector.broadcast %cst_181 : f32 to vector<16x128xf32>
    %413 = arith.addf %412, %411 : vector<16x128xf32>
    %cst_182 = arith.constant 1.000000e+00 : f32
    %414 = vector.broadcast %cst_182 : f32 to vector<16x128xf32>
    %415 = arith.divf %414, %413 : vector<16x128xf32>
    %cst_183 = arith.constant 1.06140542 : f32
    %416 = vector.broadcast %cst_183 : f32 to vector<16x128xf32>
    %417 = arith.mulf %416, %415 : vector<16x128xf32>
    %cst_184 = arith.constant -1.45315206 : f32
    %418 = vector.broadcast %cst_184 : f32 to vector<16x128xf32>
    %419 = arith.addf %417, %418 : vector<16x128xf32>
    %420 = arith.mulf %419, %415 : vector<16x128xf32>
    %cst_185 = arith.constant 1.42141378 : f32
    %421 = vector.broadcast %cst_185 : f32 to vector<16x128xf32>
    %422 = arith.addf %420, %421 : vector<16x128xf32>
    %423 = arith.mulf %422, %415 : vector<16x128xf32>
    %cst_186 = arith.constant -0.284496725 : f32
    %424 = vector.broadcast %cst_186 : f32 to vector<16x128xf32>
    %425 = arith.addf %423, %424 : vector<16x128xf32>
    %426 = arith.mulf %425, %415 : vector<16x128xf32>
    %cst_187 = arith.constant 0.254829586 : f32
    %427 = vector.broadcast %cst_187 : f32 to vector<16x128xf32>
    %428 = arith.addf %426, %427 : vector<16x128xf32>
    %429 = arith.mulf %428, %415 : vector<16x128xf32>
    %cst_188 = arith.constant 0.000000e+00 : f32
    %430 = vector.broadcast %cst_188 : f32 to vector<16x128xf32>
    %431 = arith.subf %430, %409 : vector<16x128xf32>
    %432 = arith.mulf %431, %409 : vector<16x128xf32>
    %433 = math.exp %432 : vector<16x128xf32>
    %434 = arith.mulf %429, %433 : vector<16x128xf32>
    %cst_189 = arith.constant 1.000000e+00 : f32
    %435 = vector.broadcast %cst_189 : f32 to vector<16x128xf32>
    %436 = arith.subf %435, %434 : vector<16x128xf32>
    %cst_190 = arith.constant 0.000000e+00 : f32
    %437 = vector.broadcast %cst_190 : f32 to vector<16x128xf32>
    %438 = arith.cmpf oge, %408, %437 : vector<16x128xf32>
    %cst_191 = arith.constant 0.000000e+00 : f32
    %439 = vector.broadcast %cst_191 : f32 to vector<16x128xf32>
    %440 = arith.subf %439, %436 : vector<16x128xf32>
    %441 = arith.select %438, %436, %440 : vector<16x128xi1>, vector<16x128xf32>
    %cst_192 = arith.constant 1.000000e+00 : f32
    %442 = vector.broadcast %cst_192 : f32 to vector<16x128xf32>
    %443 = arith.addf %442, %441 : vector<16x128xf32>
    %444 = arith.mulf %406, %443 : vector<16x128xf32>
    %445 = arith.truncf %444 : vector<16x128xf32> to vector<16x128xbf16>
    %c0_193 = arith.constant 0 : index
    %c0_194 = arith.constant 0 : index
    %446 = vector.load %arg14[%c0_193, %c0_194] : memref<128x32xbf16, #tpu.memory_space<vmem>>, vector<128x32xbf16>
    %cst_195 = arith.constant dense<0.000000e+00> : vector<16x32xf32>
    %447 = tpu.matmul %445, %446, %cst_195 {dimension_numbers = #tpu.dot_dimension_numbers<[1], [0], [0], [1], [0, 0, 1, 1], [], []>} : vector<16x128xbf16>, vector<128x32xbf16>, vector<16x32xf32> -> vector<16x32xf32>
    %c0_196 = arith.constant 0 : index
    %c0_197 = arith.constant 0 : index
    %448 = vector.load %arg15[%c0_196, %c0_197] : memref<1x32xf32, #tpu.memory_space<vmem>>, vector<1x32xf32>
    %449 = vector.broadcast %448 : vector<1x32xf32> to vector<16x32xf32>
    %450 = arith.addf %447, %449 : vector<16x32xf32>
    %451 = arith.addf %450, %398 : vector<16x32xf32>
    %c0_198 = arith.constant 0 : index
    %c0_199 = arith.constant 0 : index
    %452 = vector.load %arg16[%c0_198, %c0_199] : memref<1x32xf32, #tpu.memory_space<vmem>>, vector<1x32xf32>
    %c0_200 = arith.constant 0 : index
    %c0_201 = arith.constant 0 : index
    %453 = vector.load %arg17[%c0_200, %c0_201] : memref<1x32xf32, #tpu.memory_space<vmem>>, vector<1x32xf32>
    %cst_202 = arith.constant dense<0.000000e+00> : vector<16xf32>
    %454 = vector.multi_reduction <add>, %451, %cst_202 [1] : vector<16x32xf32> to vector<16xf32>
    %455 = vector.shape_cast %454 : vector<16xf32> to vector<16x1xf32>
    %cst_203 = arith.constant 3.200000e+01 : f32
    %456 = vector.broadcast %cst_203 : f32 to vector<16x1xf32>
    %457 = arith.divf %455, %456 : vector<16x1xf32>
    %458 = vector.broadcast %457 : vector<16x1xf32> to vector<16x32xf32>
    %459 = arith.subf %451, %458 : vector<16x32xf32>
    %460 = arith.mulf %459, %459 : vector<16x32xf32>
    %cst_204 = arith.constant dense<0.000000e+00> : vector<16xf32>
    %461 = vector.multi_reduction <add>, %460, %cst_204 [1] : vector<16x32xf32> to vector<16xf32>
    %462 = vector.shape_cast %461 : vector<16xf32> to vector<16x1xf32>
    %cst_205 = arith.constant 3.200000e+01 : f32
    %463 = vector.broadcast %cst_205 : f32 to vector<16x1xf32>
    %464 = arith.divf %462, %463 : vector<16x1xf32>
    %cst_206 = arith.constant 9.99999996E-13 : f32
    %465 = vector.broadcast %cst_206 : f32 to vector<16x1xf32>
    %466 = arith.addf %464, %465 : vector<16x1xf32>
    %467 = math.rsqrt %466 : vector<16x1xf32>
    %468 = vector.broadcast %467 : vector<16x1xf32> to vector<16x32xf32>
    %469 = arith.mulf %459, %468 : vector<16x32xf32>
    %470 = vector.broadcast %452 : vector<1x32xf32> to vector<16x32xf32>
    %471 = arith.mulf %469, %470 : vector<16x32xf32>
    %472 = vector.broadcast %453 : vector<1x32xf32> to vector<16x32xf32>
    %473 = arith.addf %471, %472 : vector<16x32xf32>
    %474 = vector.shape_cast %473 : vector<16x32xf32> to vector<2x8x32xf32>
    %c0_207 = arith.constant 0 : index
    %c0_208 = arith.constant 0 : index
    %c0_209 = arith.constant 0 : index
    %475 = vector.load %arg18[%c0_207, %c0_208, %c0_209] : memref<2x8x32xf32, #tpu.memory_space<vmem>>, vector<2x8x32xf32>
    tpu.vector_store %arg18[%c0_207, %c0_208, %c0_209], %474 {strides = array<i32>} : memref<2x8x32xf32, #tpu.memory_space<vmem>>, vector<2x8x32xf32>,
    return
  }
  func.func @transform_0(%arg0: i32) -> (i32, i32, i32) {
    %c0_i32 = arith.constant 0 : i32
    %c0_i32_0 = arith.constant 0 : i32
    %c0_i32_1 = arith.constant 0 : i32
    return %arg0, %c0_i32, %c0_i32_0 : i32, i32, i32
  }
  func.func @transform_1(%arg0: i32) -> (i32, i32) {
    %c0_i32 = arith.constant 0 : i32
    %c0_i32_0 = arith.constant 0 : i32
    %c0_i32_1 = arith.constant 0 : i32
    return %c0_i32, %c0_i32_0 : i32, i32
  }
  func.func @transform_2(%arg0: i32) -> (i32, i32) {
    %c0_i32 = arith.constant 0 : i32
    %c0_i32_0 = arith.constant 0 : i32
    %c0_i32_1 = arith.constant 0 : i32
    return %c0_i32, %c0_i32_0 : i32, i32
  }
  func.func @transform_3(%arg0: i32) -> (i32, i32) {
    %c0_i32 = arith.constant 0 : i32
    %c0_i32_0 = arith.constant 0 : i32
    %c0_i32_1 = arith.constant 0 : i32
    return %c0_i32, %c0_i32_0 : i32, i32
  }
  func.func @transform_4(%arg0: i32) -> (i32, i32) {
    %c0_i32 = arith.constant 0 : i32
    %c0_i32_0 = arith.constant 0 : i32
    %c0_i32_1 = arith.constant 0 : i32
    return %c0_i32, %c0_i32_0 : i32, i32
  }
  func.func @transform_5(%arg0: i32) -> (i32, i32) {
    %c0_i32 = arith.constant 0 : i32
    %c0_i32_0 = arith.constant 0 : i32
    %c0_i32_1 = arith.constant 0 : i32
    return %c0_i32, %c0_i32_0 : i32, i32
  }
  func.func @transform_6(%arg0: i32) -> (i32, i32) {
    %c0_i32 = arith.constant 0 : i32
    %c0_i32_0 = arith.constant 0 : i32
    %c0_i32_1 = arith.constant 0 : i32
    return %c0_i32, %c0_i32_0 : i32, i32
  }
  func.func @transform_7(%arg0: i32) -> (i32, i32) {
    %c0_i32 = arith.constant 0 : i32
    %c0_i32_0 = arith.constant 0 : i32
    %c0_i32_1 = arith.constant 0 : i32
    return %c0_i32, %c0_i32_0 : i32, i32
  }
  func.func @transform_8(%arg0: i32) -> (i32, i32) {
    %c0_i32 = arith.constant 0 : i32
    %c0_i32_0 = arith.constant 0 : i32
    %c0_i32_1 = arith.constant 0 : i32
    return %c0_i32, %c0_i32_0 : i32, i32
  }
  func.func @transform_9(%arg0: i32) -> (i32, i32) {
    %c0_i32 = arith.constant 0 : i32
    %c0_i32_0 = arith.constant 0 : i32
    %c0_i32_1 = arith.constant 0 : i32
    return %c0_i32, %c0_i32_0 : i32, i32
  }
  func.func @transform_10(%arg0: i32) -> (i32, i32) {
    %c0_i32 = arith.constant 0 : i32
    %c0_i32_0 = arith.constant 0 : i32
    %c0_i32_1 = arith.constant 0 : i32
    return %c0_i32, %c0_i32_0 : i32, i32
  }
  func.func @transform_11(%arg0: i32) -> (i32, i32) {
    %c0_i32 = arith.constant 0 : i32
    %c0_i32_0 = arith.constant 0 : i32
    %c0_i32_1 = arith.constant 0 : i32
    return %c0_i32, %c0_i32_0 : i32, i32
  }
  func.func @transform_12(%arg0: i32) -> (i32, i32) {
    %c0_i32 = arith.constant 0 : i32
    %c0_i32_0 = arith.constant 0 : i32
    %c0_i32_1 = arith.constant 0 : i32
    return %c0_i32, %c0_i32_0 : i32, i32
  }
  func.func @transform_13(%arg0: i32) -> (i32, i32) {
    %c0_i32 = arith.constant 0 : i32
    %c0_i32_0 = arith.constant 0 : i32
    %c0_i32_1 = arith.constant 0 : i32
    return %c0_i32, %c0_i32_0 : i32, i32
  }
  func.func @transform_14(%arg0: i32) -> (i32, i32) {
    %c0_i32 = arith.constant 0 : i32
    %c0_i32_0 = arith.constant 0 : i32
    %c0_i32_1 = arith.constant 0 : i32
    return %c0_i32, %c0_i32_0 : i32, i32
  }
  func.func @transform_15(%arg0: i32) -> (i32, i32) {
    %c0_i32 = arith.constant 0 : i32
    %c0_i32_0 = arith.constant 0 : i32
    %c0_i32_1 = arith.constant 0 : i32
    return %c0_i32, %c0_i32_0 : i32, i32
  }
  func.func @transform_16(%arg0: i32) -> (i32, i32) {
    %c0_i32 = arith.constant 0 : i32
    %c0_i32_0 = arith.constant 0 : i32
    %c0_i32_1 = arith.constant 0 : i32
    return %c0_i32, %c0_i32_0 : i32, i32
  }
  func.func @transform_17(%arg0: i32) -> (i32, i32, i32) {
    %c0_i32 = arith.constant 0 : i32
    %c0_i32_0 = arith.constant 0 : i32
    %c0_i32_1 = arith.constant 0 : i32
    return %arg0, %c0_i32, %c0_i32_0 : i32, i32, i32
  }
}

</mosaic_0001>

<bundles_post_ra>
// kernel: tpu_custom_call.1
= control target key start
LH: loop header
LB: loop body
LE: loop exit
PB: predicated region body
PF: predicated region fallthrough
CT: control target
= control target key end

     0   :  { %s3094_s0 = inlined_call_operand.vmem [shape: f32[2,8,32], index: 0, kind: input, shape index: {}]   ;;  %s3095_s1 = inlined_call_operand.vmem [shape: bf16[32,128], index: 1, kind: input, shape index: {}]   ;;  %s3096_s2 = inlined_call_operand.vmem [shape: f32[4,64], index: 2, kind: input, shape index: {}]   ;;  %s3097_s3 = inlined_call_operand.vmem [shape: f32[1,64], index: 3, kind: input, shape index: {}]   ;;  %s3098_s4 = inlined_call_operand.vmem [shape: bf16[64,96], index: 4, kind: input, shape index: {}]   ;;  %s3099_s5 = inlined_call_operand.vmem [shape: f32[1,64], index: 5, kind: input, shape index: {}]   ;;  %s3100_s6 = inlined_call_operand.vmem [shape: f32[16,64], index: 6, kind: input, shape index: {}]   ;;  %s3101_s7 = inlined_call_operand.vmem [shape: f32[1,64], index: 7, kind: input, shape index: {}]   ;;  %s3102_s8 = inlined_call_operand.vmem [shape: bf16[64,32], index: 8, kind: input, shape index: {}]   ;;  %s3103_s9 = inlined_call_operand.vmem [shape: f32[1,32], index: 9, kind: input, shape index: {}]   ;;  %s3104_s10 = inlined_call_operand.vmem [shape: f32[1,32], index: 10, kind: input, shape index: {}]   ;;  %s3105_s11 = inlined_call_operand.vmem [shape: bf16[32,128], index: 11, kind: input, shape index: {}]   ;;  %s3106_s12 = inlined_call_operand.vmem [shape: f32[1,128], index: 12, kind: input, shape index: {}]   ;;  %s3107_s13 = inlined_call_operand.vmem [shape: bf16[128,32], index: 13, kind: input, shape index: {}]   ;;  %s3108_s14 = inlined_call_operand.vmem [shape: f32[1,32], index: 14, kind: input, shape index: {}]   ;;  %s3109_s15 = inlined_call_operand.vmem [shape: f32[1,32], index: 15, kind: input, shape index: {}]   ;;  %s3110_s16 = inlined_call_operand.vmem [shape: f32[1,32], index: 16, kind: input, shape index: {}]   ;;  %s3111_s17 = inlined_call_operand.hbm [shape: f32[2,8,32], index: 17, kind: output, shape index: {}]  }
   0x1   :  { %3114 = sst [smem:[#allocation9_spill]] %s3094_s0 }
   0x2   :  { %3115 = sst [smem:[#allocation10_spill]] %s3095_s1 }
   0x3   :  { %s3116_s26 = sld [smem:[#allocation10_spill]]  ;;  %v2374_v1 = vmov 0.0   ;;  %vm2375_vm0 = vmmov 0   ;;  %vm77_vm1 = vcmask 261120  }
   0x4   :  { %2151 = vmatprep.subr.bf16.mxu0 %v2374_v1  ;;  %2159 = vmatprep.subr.bf16.mxu1 %v2374_v1  ;;  %s3117_s30 = sld [smem:[#allocation9_spill]] }
   0x5   :  { %2155 = vmatprep.mubr.msk.bf16.mxu0 %vm2375_vm0, %v2374_v1  ;;  %2167 = vmatprep.mubr.msk.bf16.mxu1 %vm2375_vm0, %v2374_v1 }
   0x9   :  { %v2218_v0 = vld [vmem:[%s3116_s26 + $0x8] sm:$0xff]   ;;  %v2219_v2 = vld [vmem:[%s3116_s26] sm:$0xff]  }
   0xa   :  { %2152 = vmatpush3.bf16.msra.mxu0 %v2218_v0  ;;  %v58_v3 = vld [vmem:[%s3117_s30] sm:$0xff]  ;;  %v59_v4 = vld [vmem:[%s3117_s30 + $0x8] sm:$0xff] }
   0xb   :  { %2153 = vmatprep.subr.bf16.mxu0 %v2374_v1  ;;  %v60_v5 = vpack.c.bf16 %v59_v4, %v58_v3 }
   0xe   :  { %2154 = vmatpush3.bf16.msra.mxu0 %v2219_v2 }
   0xf   :  { %2191 = vmatprep.subr.bf16.mxu0 %v2374_v1 }
  0x11   :  { %2156 = vmatmul.mubr.msk.bf16.vlgmr.msra.gmra.mxu0 %vm77_vm1, %v60_v5 }
  0x12   :  { %2207 = vmatprep.mubr.msk.bf16.mxu0 %vm2375_vm0, %v2374_v1 }
  0x13   :  { %22 = vsyncpa [#allocation7], 0  ;;  %v2220_v6 = vld [vmem:[%s3098_s4 + $0x18] sm:$0xff]   ;;  %v2221_v7 = vld [vmem:[%s3098_s4 + $0x10] sm:$0xff]   ;;  %v123_v10 = vlaneseq  ;;  %vm232_vm5 = vcmask 523264   ;;  %vm1600_vm10 = vcmask 1041409  }
  0x14   :  { %2160 = vmatpush3.bf16.msra.mxu1 %v2220_v6  ;;  %v2222_v8 = vld [vmem:[%s3098_s4 + $0x8] sm:$0xff]   ;;  %v2223_v9 = vld [vmem:[%s3098_s4] sm:$0xff]   ;;  %vm1602_vm11 = vcmask 1042434   ;;  %vm1604_vm12 = vcmask 1043459   ;;  %vm1606_vm13 = vcmask 1044484   ;;  %vm1608_vm14 = vcmask 1045509  }
  0x15   :  { %2161 = vmatprep.subr.bf16.mxu1 %v2374_v1  ;;  %v2510_v11 = vshrl.u32 %v123_v10, 7  ;;  %v122_v13 = vld [vmem:[%s3096_s2] sm:$0xf]  ;;  %vm1610_vm15 = vcmask 1046534   ;;  %s2378_s0 = smov [#allocation6]  }
  0x16   :  { %v2090_v45 = vld [vmem:[%s3097_s3] ss:$0 sm:$0xff]  ;;  %s2076_s18 = sshll.u32 %s2378_s0, 4  ;;  %s2077_s18 = int_to_ptr.vmem [resolvable:$true] %s2076_s18 }
  0x17   :  { %v2513_v12 = vsub.s32 3, %v2510_v11  ;;  %v2519_v14 = vsub.s32 2, %v2510_v11  ;;  %v2522_v15 = vsub.s32 1, %v2510_v11  ;;  %vm131_vm2 = vcmp.ge.s32.totalorder %v2510_v11, 1  ;;  %v2098_v2 = vld [vmem:[%s3099_s5] ss:$0 sm:$0xff]  ;;  %p2357_p1 = scmp.lt.s32.totalorder %s2077_s18, %s2077_s18 }
  0x18   :  { %2162 = vmatpush3.bf16.msra.mxu1 %v2221_v7  ;;  %vm142_vm3 = vcmp.ge.s32.totalorder %v2510_v11, 2  ;;  %v2531_v19 = vsub.s32 0, %v2510_v11  ;;  %vm153_vm4 = vcmp.ge.s32.totalorder %v2510_v11, 3  ;;  %v528_v10 = vsub.s32 4, %v2510_v11 }
  0x19   :  { %2163 = vmatprep.subr.bf16.mxu1 %v2374_v1  ;;  %v128_v16 = vrot.slane %v122_v13, %v2513_v12  ;;  %v138_v18 = vrot.slane %v122_v13, %v2519_v14  ;;  %v149_v23 = vrot.slane %v122_v13, %v2522_v15 }
  0x1a   :  { %v160_v29 = vrot.slane %v122_v13, %v2531_v19  ;;  %v540_v13 = vsub.s32 5, %v2510_v11 }
  0x1c   :  { %2164 = vmatpush3.bf16.msra.mxu1 %v2222_v8 }
  0x1d   :  { %2165 = vmatprep.subr.bf16.mxu1 %v2374_v1 }
  0x20   :  { %2166 = vmatpush3.bf16.msra.mxu1 %v2223_v9 }
  0x21   :  { %2171 = vmatprep.subr.bf16.mxu1 %v2374_v1 }
  0xd1   :  { %v2525_v17 = vpop.f32.mrf.mxu0 }
  0xd2   :  { %v130_v20 = vrot.slane %v2525_v17, 7  ;;  %v141_v21 = vrot.slane %v2525_v17, 6  ;;  %v152_v22 = vrot.slane %v2525_v17, 5  ;;  %v129_v27 = vmul.f32 %v128_v16, %v2525_v17 }
  0xd3   :  { %v2157_v24 = vpop.f32.mrf.mxu0 }
  0xd4   :  { %v134_v25 = vsel %vm131_vm2, %v130_v20, 0.0  ;;  %v145_v26 = vsel %vm142_vm3, %v141_v21, 0.0  ;;  %v156_v31 = vsel %vm153_vm4, %v152_v22, 0.0  ;;  %v552_v21 = vsub.s32 6, %v2510_v11 }
  0xd5   :  { %v139_v28 = vmul.f32 %v138_v18, %v134_v25  ;;  %v2544_v30 = vpop.f32.mrf.mxu0  ;;  %v150_v36 = vmul.f32 %v149_v23, %v145_v26  ;;  %v161_v41 = vmul.f32 %v160_v29, %v156_v31 }
  0xd6   :  { %v164_v32 = vrot.slane %v2544_v30, 7  ;;  %v168_v33 = vrot.slane %v2544_v30, 6  ;;  %v172_v34 = vrot.slane %v2544_v30, 5  ;;  %v163_v42 = vmul.f32 %v128_v16, %v2544_v30 }
  0xd7   :  { %v140_v35 = vadd.f32 %v139_v28, %v129_v27  ;;  %v2158_v37 = vpop.f32.mrf.mxu0 }
  0xd8   :  { %v165_v38 = vsel %vm131_vm2, %v164_v32, 0.0  ;;  %v169_v39 = vsel %vm142_vm3, %v168_v33, 0.0  ;;  %v173_v44 = vsel %vm153_vm4, %v172_v34, 0.0  ;;  %vm1612_vm2 = vcmask 1047559  }
  0xd9   :  { %v151_v40 = vadd.f32 %v150_v36, %v140_v35  ;;  %v166_v43 = vmul.f32 %v165_v38, %v138_v18  ;;  %v170_v47 = vmul.f32 %v169_v39, %v149_v23  ;;  %v174_v50 = vmul.f32 %v173_v44, %v160_v29  ;;  %v314_v39 = vld [vmem:[%s3100_s6] sm:$0xff] }
  0xda   :  { %v564_v23 = vsub.s32 7, %v2510_v11  ;;  %v316_v44 = vmul.f32 1.442695, %v314_v39 }
  0xdb   :  { %v167_v46 = vadd.f32 %v166_v43, %v163_v42  ;;  %v162_v48 = vadd.f32 %v161_v41, %v151_v40  ;;  %v315_v42 = vld [vmem:[%s3100_s6 + $0x8] sm:$0xff]  ;;  %s2377_s6 = smov 64  }
  0xdd   :  { %v171_v49 = vadd.f32 %v170_v47, %v167_v46  ;;  %v183_v51 = vadd.f32 %v2090_v45, %v162_v48  ;;  %v2376_v46 = vmov 1966171168  }
  0xde   :  { %v327_v47 = vunpack.c.l.s4 %v2376_v46 }
  0xdf   :  { %v175_v52 = vadd.f32 %v174_v50, %v171_v49  ;;  %v2091_v53 = vmul.f32 -1.442695, %v183_v51 }
  0xe0   :  { %v328_v49 = vunpack.c.0.s8 %v327_v47 }
  0xe1   :  { %v184_v54 = vadd.f32 %v2090_v45, %v175_v52  ;;  %2238 = vpow2.f32 %v2091_v53  ;;  %v318_v45 = vmul.f32 1.442695, %v315_v42 }
  0xe3   :  { %v2092_v55 = vmul.f32 -1.442695, %v184_v54 }
  0xe5   :  { %2240 = vpow2.f32 %v2092_v55 }
  0xee   :  { %v2239_v56 = vpop.eup %2238 }
  0xef   :  { %v191_v57 = vadd.f32 1.0, %v2239_v56 }
  0xf1   :  { %2242 = vrcp.f32 %v191_v57 }
  0xf2   :  { %v2241_v58 = vpop.eup %2240 }
  0xf3   :  { %v192_v59 = vadd.f32 1.0, %v2241_v58 }
  0xf5   :  { %2244 = vrcp.f32 %v192_v59 }
  0xfe   :  { %v2243_v60 = vpop.eup %2242 }
  0xff   :  { %v2561_v62 = vmul.f32 %v2243_v60, %v183_v51 }
 0x102   :  { %v2245_v61 = vpop.eup %2244 }
 0x103   :  { %v2563_v63 = vmul.f32 %v2245_v61, %v184_v54  ;;  %v2645_v54 = vsub.s32 %v328_v49, %v2510_v11 }
 0x105   :  { %v199_v0 = vpack.c.bf16 %v2563_v63, %v2561_v62 }
 0x107   :  { %2168 = vmatmul.mubr.msk.bf16.vlgmr.msra.gmra.mxu1 %vm232_vm5, %v199_v0 }
 0x108   :  { %2179 = vmatprep.mubr.msk.bf16.mxu1 %vm2375_vm0, %v2374_v1 }
 0x1c7   :  { %v270_v3 = vpop.f32.mrf.mxu1 }
 0x1c8   :  { %v2573_v4 = vadd.f32 %v2098_v2, %v270_v3  ;;  %v2576_v5 = vrot.slane %v270_v3, %v2522_v15  ;;  %v2579_v6 = vrot.slane %v270_v3, %v2531_v19  ;;  %v2592_v20 = vrot.slane %v270_v3, %v2519_v14 }
 0x1c9   :  { %v2169_v7 = vpop.f32.mrf.mxu1  ;;  %v2612_v31 = vrot.slane %v270_v3, %v2513_v12  ;;  %v2616_v32 = vrot.slane %v270_v3, %v528_v10  ;;  %v2620_v33 = vrot.slane %v270_v3, %v540_v13  ;;  %v2624_v36 = vrot.slane %v270_v3, %v552_v21 }
 0x1ca   :  { %v286_v8 = vmin.f32 %v2573_v4, 20.0  ;;  %500 = vbcast.lane.b32.xlu1 %v2576_v5, 328  ;;  %484 = vbcast.lane.b32.xlu0 %v2579_v6, 320  ;;  %v2631_v41 = vrot.slane %v270_v3, %v564_v23  ;;  %vm310_vm7 = vcmp.gt.f32.partialorder %v2573_v4, 20.0 }
 0x1cb   :  { %v2584_v9 = vpop.f32.mrf.mxu1 }
 0x1cc   :  { %v288_v16 = vmul.f32 1.442695, %v286_v8  ;;  %v2589_v18 = vadd.f32 %v2098_v2, %v2584_v9  ;;  %v2597_v24 = vrot.slane %v2584_v9, %v528_v10  ;;  %v2600_v25 = vrot.slane %v2584_v9, %v540_v13 }
 0x1cd   :  { %v2170_v22 = vpop.f32.mrf.mxu1  ;;  %v2606_v27 = vrot.slane %v2584_v9, %v552_v21  ;;  %v2609_v28 = vrot.slane %v2584_v9, %v564_v23 }
 0x1ce   :  { %2246 = vpow2.f32 %v288_v16  ;;  %v287_v26 = vmin.f32 %v2589_v18, 20.0  ;;  %512 = vbcast.lane.b32.xlu1 %v2592_v20, 328  ;;  %488 = vbcast.lane.b32.xlu0 %v2579_v6, 328  ;;  %vm311_vm9 = vcmp.gt.f32.partialorder %v2589_v18, 20.0 }
 0x1d0   :  { %v290_v29 = vmul.f32 1.442695, %v287_v26 }
 0x1d2   :  { %2248 = vpow2.f32 %v290_v29  ;;  %524 = vbcast.lane.b32.xlu1 %v2612_v31, 328  ;;  %496 = vbcast.lane.b32.xlu0 %v2576_v5, 320 }
 0x1d6   :  { %536 = vbcast.lane.b32.xlu1 %v2616_v32, 328  ;;  %508 = vbcast.lane.b32.xlu0 %v2592_v20, 320 }
 0x1da   :  { %548 = vbcast.lane.b32.xlu1 %v2620_v33, 328  ;;  %520 = vbcast.lane.b32.xlu0 %v2612_v31, 320 }
 0x1db   :  { %v2247_v34 = vpop.eup %2246 }
 0x1dc   :  { %v292_v35 = vadd.f32 1.0, %v2247_v34 }
 0x1de   :  { %2250 = vlog2.f32 %v292_v35  ;;  %v2099_v37 = vadd.f32 -1.0, %v292_v35  ;;  %560 = vbcast.lane.b32.xlu1 %v2624_v36, 328  ;;  %532 = vbcast.lane.b32.xlu0 %v2616_v32, 320  ;;  %vm294_vm6 = vcmp.eq.f32.partialorder %v292_v35, 1.0 }
 0x1df   :  { %v2249_v38 = vpop.eup %2248 }
 0x1e0   :  { %2252 = vrcp.f32 %v2099_v37  ;;  %v293_v40 = vadd.f32 1.0, %v2249_v38 }
 0x1e2   :  { %v2100_v43 = vadd.f32 -1.0, %v293_v40  ;;  %572 = vbcast.lane.b32.xlu1 %v2631_v41, 328  ;;  %544 = vbcast.lane.b32.xlu0 %v2620_v33, 320  ;;  %2254 = vlog2.f32 %v293_v40  ;;  %vm295_vm8 = vcmp.eq.f32.partialorder %v293_v40, 1.0 }
 0x1e4   :  { %2256 = vrcp.f32 %v2100_v43 }
 0x1e5   :  { %2258 = vpow2.f32 %v316_v44 }
 0x1e6   :  { %1262 = vbcast.lane.b32.xlu1 %v2579_v6, 344  ;;  %556 = vbcast.lane.b32.xlu0 %v2624_v36, 320  ;;  %2260 = vpow2.f32 %v318_v45 }
 0x1ea   :  { %1270 = vbcast.lane.b32.xlu1 %v2576_v5, 344  ;;  %568 = vbcast.lane.b32.xlu0 %v2631_v41, 320 }
 0x1eb   :  { %v2251_v48 = vpop.eup %2250 }
 0x1ec   :  { %v297_v51 = vmul.f32 0.6931472, %v2251_v48  ;;  %v2692_v48 = vrot.slane %v2584_v9, %v2531_v19 }
 0x1ed   :  { %v2253_v50 = vpop.eup %2252 }
 0x1ee   :  { %v303_v52 = vmul.f32 %v2253_v50, %v2247_v34  ;;  %1278 = vbcast.lane.b32.xlu1 %v2592_v20, 344  ;;  %1258 = vbcast.lane.b32.xlu0 %v2579_v6, 336 }
 0x1ef   :  { %v2255_v53 = vpop.eup %2254 }
 0x1f0   :  { %v306_v55 = vmul.f32 %v303_v52, %v297_v51  ;;  %v299_v60 = vmul.f32 0.6931472, %v2255_v53 }
 0x1f1   :  { %v2257_v56 = vpop.eup %2256 }
 0x1f2   :  { %v308_v57 = vsel %vm294_vm6, %v2247_v34, %v306_v55  ;;  %v305_v58 = vmul.f32 %v2257_v56, %v2249_v38  ;;  %1286 = vbcast.lane.b32.xlu1 %v2612_v31, 344  ;;  %1266 = vbcast.lane.b32.xlu0 %v2576_v5, 336  ;;  %v2259_v61 = vpop.eup %2258 }
 0x1f3   :  { %v2651_v59 = vsel %vm310_vm7, %v2573_v4, %v308_v57  ;;  %v2261_v3 = vpop.eup %2260  ;;  %v2660_v5 = vsub.f32 0.0, %v2259_v61 }
 0x1f4   :  { %v325_v11 = vcombine.high %v2651_v59, %v2651_v59  ;;  %v332_v0 = vrot.slane %v2651_v59, %v2645_v54  ;;  %v307_v2 = vmul.f32 %v305_v58, %v299_v60  ;;  %v2665_v21 = vsub.f32 0.0, %v2261_v3 }
 0x1f6   :  { %v339_v6 = vrot.slane %v325_v11, %v2645_v54  ;;  %v340_v7 = vcombine.high %v332_v0, %v332_v0  ;;  %v348_v8 = vrot.slane %v332_v0, %v2645_v54  ;;  %1294 = vbcast.lane.b32.xlu1 %v2616_v32, 344  ;;  %1274 = vbcast.lane.b32.xlu0 %v2592_v20, 336 }
 0x1f7   :  { %v309_v23 = vsel %vm295_vm8, %v2249_v38, %v307_v2 }
 0x1f8   :  { %v341_v4 = vcombine.high %v339_v6, %v339_v6  ;;  %v355_v10 = vrot.slane %v339_v6, %v2645_v54  ;;  %v362_v13 = vrot.slane %v340_v7, %v2645_v54  ;;  %v370_v16 = vcombine.high %v348_v8, %v348_v8 }
 0x1f9   :  { %v377_v22 = vrot.slane %v348_v8, %v2531_v19  ;;  %v2677_v38 = vsel %vm311_vm9, %v2589_v18, %v309_v23 }
 0x1fa   :  { %v369_v26 = vrot.slane %v341_v4, %v2645_v54  ;;  %v372_v29 = vcombine.high %v362_v13, %v362_v13  ;;  %v381_v34 = vrot.slane %v362_v13, %v2531_v19  ;;  %1302 = vbcast.lane.b32.xlu1 %v2620_v33, 344  ;;  %v385_v20 = vrot.slane %v370_v16, %v2531_v19 }
 0x1fb   :  { %1282 = vbcast.lane.b32.xlu0 %v2612_v31, 336  ;;  %v371_v35 = vcombine.high %v355_v10, %v355_v10  ;;  %v414_v39 = vmul.f32 %v377_v22, %v2660_v5  ;;  %v415_v40 = vmul.f32 %v377_v22, %v2665_v21  ;;  %v393_v45 = vrot.slane %v355_v10, %v2531_v19 }
 0x1fc   :  { %v389_v37 = vrot.slane %v372_v29, %v2531_v19  ;;  %v416_v42 = vmul.f32 %v381_v34, %v2660_v5  ;;  %v417_v43 = vmul.f32 %v381_v34, %v2665_v21  ;;  %v373_v44 = vcombine.high %v369_v26, %v369_v26 }
 0x1fd   :  { %v418_v46 = vmul.f32 %v385_v20, %v2660_v5  ;;  %v397_v31 = vrot.slane %v369_v26, %v2531_v19  ;;  %v419_v47 = vmul.f32 %v385_v20, %v2665_v21  ;;  %v697_v18 = vcombine.high %v2677_v38, %v2677_v38 }
 0x1fe   :  { %1310 = vbcast.lane.b32.xlu1 %v2624_v36, 344  ;;  %v401_v49 = vrot.slane %v371_v35, %v2531_v19  ;;  %v420_v50 = vmul.f32 %v389_v37, %v2660_v5  ;;  %v430_v51 = vmul.f32 1.442695, %v414_v39  ;;  %v704_v52 = vrot.slane %v2677_v38, %v2645_v54 }
 0x1ff   :  { %1290 = vbcast.lane.b32.xlu0 %v2616_v32, 336  ;;  %v421_v53 = vmul.f32 %v389_v37, %v2665_v21  ;;  %v432_v55 = vmul.f32 1.442695, %v415_v40  ;;  %v434_v56 = vmul.f32 1.442695, %v416_v42  ;;  %v405_v58 = vrot.slane %v373_v44, %v2531_v19 }
 0x200   :  { %v436_v57 = vmul.f32 1.442695, %v417_v43  ;;  %v422_v32 = vmul.f32 %v393_v45, %v2660_v5  ;;  %2262 = vpow2.f32 %v430_v51  ;;  %v438_v60 = vmul.f32 1.442695, %v418_v46 }
 0x201   :  { %v423_v61 = vmul.f32 %v393_v45, %v2665_v21  ;;  %v424_v11 = vmul.f32 %v397_v31, %v2660_v5  ;;  %2264 = vpow2.f32 %v432_v55  ;;  %v440_v0 = vmul.f32 1.442695, %v419_v47 }
 0x202   :  { %v425_v2 = vmul.f32 %v397_v31, %v2665_v21  ;;  %v426_v3 = vmul.f32 %v401_v49, %v2660_v5  ;;  %2266 = vpow2.f32 %v434_v56  ;;  %v442_v6 = vmul.f32 1.442695, %v420_v50  ;;  %1318 = vbcast.lane.b32.xlu1 %v2631_v41, 344 }
 0x203   :  { %v427_v7 = vmul.f32 %v401_v49, %v2665_v21  ;;  %2268 = vpow2.f32 %v436_v57  ;;  %v444_v8 = vmul.f32 1.442695, %v421_v53  ;;  %v711_v4 = vrot.slane %v697_v18, %v2645_v54  ;;  %1298 = vbcast.lane.b32.xlu0 %v2620_v33, 336 }
 0x204   :  { %2270 = vpow2.f32 %v438_v60  ;;  %v446_v10 = vmul.f32 1.442695, %v422_v32  ;;  %v712_v13 = vcombine.high %v704_v52, %v704_v52  ;;  %v720_v16 = vrot.slane %v704_v52, %v2645_v54 }
 0x205   :  { %v428_v22 = vmul.f32 %v405_v58, %v2660_v5  ;;  %v429_v23 = vmul.f32 %v405_v58, %v2665_v21  ;;  %2272 = vpow2.f32 %v440_v0  ;;  %v448_v26 = vmul.f32 1.442695, %v423_v61 }
 0x206   :  { %2274 = vpow2.f32 %v442_v6  ;;  %v450_v29 = vmul.f32 1.442695, %v424_v11  ;;  %v734_v34 = vrot.slane %v712_v13, %v2645_v54  ;;  %v742_v20 = vcombine.high %v720_v16, %v720_v16  ;;  %856 = vbcast.lane.b32.xlu1 %v2692_v48, 320 }
 0x207   :  { %2276 = vpow2.f32 %v444_v8  ;;  %v452_v35 = vmul.f32 1.442695, %v425_v2  ;;  %v454_v37 = vmul.f32 1.442695, %v426_v3  ;;  %v713_v39 = vcombine.high %v711_v4, %v711_v4  ;;  %1306 = vbcast.lane.b32.xlu0 %v2624_v36, 336 }
 0x208   :  { %2278 = vpow2.f32 %v446_v10  ;;  %v744_v40 = vcombine.high %v734_v34, %v734_v34  ;;  %v749_v42 = vrot.slane %v720_v16, %v2531_v19  ;;  %v753_v33 = vrot.slane %v734_v34, %v2531_v19 }
 0x209   :  { %2280 = vpow2.f32 %v448_v26  ;;  %v456_v43 = vmul.f32 1.442695, %v427_v7  ;;  %v727_v44 = vrot.slane %v711_v4, %v2645_v54  ;;  %v458_v45 = vmul.f32 1.442695, %v428_v22 }
 0x20a   :  { %2282 = vpow2.f32 %v450_v29  ;;  %v757_v46 = vrot.slane %v742_v20, %v2531_v19  ;;  %v460_v31 = vmul.f32 1.442695, %v429_v23  ;;  %v741_v47 = vrot.slane %v713_v39, %v2645_v54  ;;  %860 = vbcast.lane.b32.xlu1 %v2692_v48, 328 }
 0x20b   :  { %2284 = vpow2.f32 %v452_v35  ;;  %v761_v18 = vrot.slane %v744_v40, %v2531_v19  ;;  %v786_v49 = vmul.f32 %v749_v42, %v2660_v5  ;;  %v787_v36 = vmul.f32 %v749_v42, %v2665_v21  ;;  %1314 = vbcast.lane.b32.xlu0 %v2631_v41, 336 }
 0x20c   :  { %2286 = vpow2.f32 %v454_v37  ;;  %v788_v50 = vmul.f32 %v753_v33, %v2660_v5  ;;  %v743_v52 = vcombine.high %v727_v44, %v727_v44  ;;  %v789_v53 = vmul.f32 %v753_v33, %v2665_v21 }
 0x20d   :  { %v2263_v51 = vpop.eup %2262  ;;  %2288 = vpow2.f32 %v456_v43  ;;  %v765_v56 = vrot.slane %v727_v44, %v2531_v19  ;;  %v790_v57 = vmul.f32 %v757_v46, %v2660_v5  ;;  %v745_v41 = vcombine.high %v741_v47, %v741_v47 }
 0x20e   :  { %v2265_v55 = vpop.eup %2264  ;;  %2290 = vpow2.f32 %v458_v45  ;;  %462 = vst.msk [vmem:[#allocation2] sm:$0xff] %vm232_vm5, %v2263_v51  ;;  %v769_v32 = vrot.slane %v741_v47, %v2531_v19  ;;  %v791_v60 = vmul.f32 %v757_v46, %v2665_v21  ;;  %v792_v11 = vmul.f32 %v761_v18, %v2660_v5 }
 0x20f   :  { %v2267_v58 = vpop.eup %2266  ;;  %2292 = vpow2.f32 %v460_v31  ;;  %463 = vst.msk [vmem:[#allocation2 + $0x8] sm:$0xff] %vm232_vm5, %v2265_v55  ;;  %v802_v0 = vmul.f32 1.442695, %v786_v49  ;;  %v804_v2 = vmul.f32 1.442695, %v787_v36  ;;  %v773_v7 = vrot.slane %v743_v52, %v2531_v19 }
 0x210   :  { %v2269_v61 = vpop.eup %2268  ;;  %464 = vst.msk [vmem:[#allocation2 + $0x10] sm:$0xff] %vm232_vm5, %v2267_v58  ;;  %v806_v3 = vmul.f32 1.442695, %v788_v50  ;;  %v793_v8 = vmul.f32 %v761_v18, %v2665_v21  ;;  %v808_v4 = vmul.f32 1.442695, %v789_v53  ;;  %v794_v13 = vmul.f32 %v765_v56, %v2660_v5 }
 0x211   :  { %v2271_v6 = vpop.eup %2270  ;;  %465 = vst.msk [vmem:[#allocation2 + $0x18] sm:$0xff] %vm232_vm5, %v2269_v61  ;;  %2294 = vpow2.f32 %v802_v0  ;;  %v810_v16 = vmul.f32 1.442695, %v790_v57  ;;  %v795_v23 = vmul.f32 %v765_v56, %v2665_v21  ;;  %v812_v26 = vmul.f32 1.442695, %v791_v60 }
 0x212   :  { %v2273_v10 = vpop.eup %2272  ;;  %466 = vst.msk [vmem:[#allocation2 + $0x20] sm:$0xff] %vm232_vm5, %v2271_v6  ;;  %2296 = vpow2.f32 %v804_v2  ;;  %v2744_v29 = vrot.slane %v2584_v9, %v2522_v15  ;;  %v777_v20 = vrot.slane %v745_v41, %v2531_v19  ;;  %v796_v35 = vmul.f32 %v769_v32, %v2660_v5 }
 0x213   :  { %v2275_v22 = vpop.eup %2274  ;;  %467 = vst.msk [vmem:[#allocation2 + $0x28] sm:$0xff] %vm232_vm5, %v2273_v10  ;;  %2298 = vpow2.f32 %v806_v3  ;;  %v814_v37 = vmul.f32 1.442695, %v792_v11  ;;  %v797_v40 = vmul.f32 %v769_v32, %v2665_v21  ;;  %v798_v42 = vmul.f32 %v773_v7, %v2660_v5 }
 0x214   :  { %v2277_v34 = vpop.eup %2276  ;;  %468 = vst.msk [vmem:[#allocation2 + $0x30] sm:$0xff] %vm232_vm5, %v2275_v22  ;;  %2300 = vpow2.f32 %v808_v4  ;;  %v816_v33 = vmul.f32 1.442695, %v793_v8  ;;  %868 = vbcast.lane.b32.xlu0 %v2744_v29, 320  ;;  %872 = vbcast.lane.b32.xlu1 %v2744_v29, 328  ;;  %v799_v43 = vmul.f32 %v773_v7, %v2665_v21  ;;  %v323_v45 = vmul.f32 %v2677_v38, %v2563_v63 }
 0x215   :  { %v2279_v39 = vpop.eup %2278  ;;  %469 = vst.msk [vmem:[#allocation2 + $0x38] sm:$0xff] %vm232_vm5, %v2277_v34  ;;  %2302 = vpow2.f32 %v810_v16  ;;  %v818_v44 = vmul.f32 1.442695, %v794_v13  ;;  %v820_v31 = vmul.f32 1.442695, %v795_v23  ;;  %v2761_v47 = vrot.slane %v2584_v9, %v2519_v14 }
 0x216   :  { %v2281_v15 = vpop.eup %2280  ;;  %470 = vst.msk [vmem:[#allocation2 + $0x40] sm:$0xff] %vm232_vm5, %v2279_v39  ;;  %2304 = vpow2.f32 %v812_v26  ;;  %v800_v49 = vmul.f32 %v777_v20, %v2660_v5  ;;  %v822_v36 = vmul.f32 1.442695, %v796_v35  ;;  %v954_v50 = vrot.slane %v323_v45, %v2645_v54 }
 0x217   :  { %v2283_v46 = vpop.eup %2282  ;;  %471 = vst.msk [vmem:[#allocation2 + $0x48] sm:$0xff] %vm232_vm5, %v2281_v15  ;;  %2306 = vpow2.f32 %v814_v37  ;;  %v801_v38 = vmul.f32 %v777_v20, %v2665_v21  ;;  %v824_v52 = vmul.f32 1.442695, %v797_v40  ;;  %v947_v14 = vcombine.high %v323_v45, %v323_v45 }
 0x218   :  { %v2285_v18 = vpop.eup %2284  ;;  %472 = vst.msk [vmem:[#allocation2 + $0x50] sm:$0xff] %vm232_vm5, %v2283_v46  ;;  %2308 = vpow2.f32 %v816_v33  ;;  %880 = vbcast.lane.b32.xlu0 %v2761_v47, 320  ;;  %884 = vbcast.lane.b32.xlu1 %v2761_v47, 328  ;;  %v826_v5 = vmul.f32 1.442695, %v798_v42  ;;  %v2773_v56 = vrot.slane %v2584_v9, %v2513_v12  ;;  %v2777_v21 = vrot.slane %v954_v50, %v2645_v54 }
 0x219   :  { %v2287_v51 = vpop.eup %2286  ;;  %473 = vst.msk [vmem:[#allocation2 + $0x58] sm:$0xff] %vm232_vm5, %v2285_v18  ;;  %2310 = vpow2.f32 %v818_v44  ;;  %v828_v55 = vmul.f32 1.442695, %v799_v43  ;;  %v962_v58 = vcombine.high %v954_v50, %v954_v50  ;;  %v961_v41 = vrot.slane %v947_v14, %v2645_v54 }
 0x21a   :  { %v2289_v53 = vpop.eup %2288  ;;  %474 = vst.msk [vmem:[#allocation2 + $0x60] sm:$0xff] %vm232_vm5, %v2287_v51  ;;  %2312 = vpow2.f32 %v820_v31  ;;  %v830_v60 = vmul.f32 1.442695, %v800_v49  ;;  %v832_v12 = vmul.f32 1.442695, %v801_v38  ;;  %v322_v20 = vmul.f32 %v2651_v59, %v2561_v62 }
 0x21b   :  { %v2291_v57 = vpop.eup %2290  ;;  %475 = vst.msk [vmem:[#allocation2 + $0x68] sm:$0xff] %vm232_vm5, %v2289_v53  ;;  %2314 = vpow2.f32 %v822_v36  ;;  %v2785_v9 = vrot.slane %v962_v58, %v2645_v54  ;;  %v2788_v61 = vrot.slane %v961_v41, %v2645_v54  ;;  %v963_v11 = vcombine.high %v961_v41, %v961_v41  ;;  %v1068_v58 = vld [vmem:[#allocation2] sm:$0xff] }
 0x21c   :  { %v2293_v32 = vpop.eup %2292  ;;  %476 = vst.msk [vmem:[#allocation2 + $0x70] sm:$0xff] %vm232_vm5, %v2291_v57  ;;  %2316 = vpow2.f32 %v824_v52  ;;  %892 = vbcast.lane.b32.xlu0 %v2773_v56, 320  ;;  %896 = vbcast.lane.b32.xlu1 %v2773_v56, 328  ;;  %v2102_v13 = vmul.f32 -1.442695, %v2525_v17  ;;  %v582_v42 = vrot.slane %v322_v20, %v2645_v54  ;;  %v575_v46 = vcombine.high %v322_v20, %v322_v20 }
 0x21d   :  { %477 = vst.msk [vmem:[#allocation2 + $0x78] sm:$0xff] %vm232_vm5, %v2293_v32  ;;  %2318 = vpow2.f32 %v826_v5  ;;  %v2792_v3 = vrot.slane %v963_v11, %v2645_v54  ;;  %v2103_v22 = vmul.f32 -1.442695, %v2544_v30  ;;  %v1070_v11 = vmul.f32 0.0, %v1068_v58 }
 0x21e   :  { %v2295_v0 = vpop.eup %2294  ;;  %2320 = vpow2.f32 %v828_v55  ;;  %v590_v33 = vcombine.high %v582_v42, %v582_v42  ;;  %v598_v43 = vrot.slane %v582_v42, %v2645_v54  ;;  %v589_v14 = vrot.slane %v575_v46, %v2645_v54 }
 0x21f   :  { %v2297_v2 = vpop.eup %2296  ;;  %2322 = vpow2.f32 %v830_v60  ;;  %834 = vst.msk [vmem:[#allocation3] sm:$0xff] %vm232_vm5, %v2295_v0 }
 0x220   :  { %v2299_v6 = vpop.eup %2298  ;;  %2324 = vpow2.f32 %v832_v12  ;;  %835 = vst.msk [vmem:[#allocation3 + $0x8] sm:$0xff] %vm232_vm5, %v2297_v2  ;;  %904 = vbcast.lane.b32.xlu0 %v2597_v24, 320  ;;  %908 = vbcast.lane.b32.xlu1 %v2597_v24, 328  ;;  %v612_v15 = vrot.slane %v590_v33, %v2645_v54  ;;  %v620_v49 = vcombine.high %v598_v43, %v598_v43 }
 0x221   :  { %v2301_v7 = vpop.eup %2300  ;;  %836 = vst.msk [vmem:[#allocation3 + $0x10] sm:$0xff] %vm232_vm5, %v2299_v6  ;;  %2326 = vpow2.f32 %v2102_v13  ;;  %v605_v41 = vrot.slane %v589_v14, %v2645_v54  ;;  %v591_v32 = vcombine.high %v589_v14, %v589_v14 }
 0x222   :  { %v2303_v8 = vpop.eup %2302  ;;  %837 = vst.msk [vmem:[#allocation3 + $0x18] sm:$0xff] %vm232_vm5, %v2301_v7  ;;  %2328 = vpow2.f32 %v2103_v22  ;;  %v631_v18 = vrot.slane %v612_v15, %v2531_v19  ;;  %v622_v52 = vcombine.high %v612_v15, %v612_v15  ;;  %v1069_v7 = vld [vmem:[#allocation2 + $0x8] sm:$0xff] }
 0x223   :  { %v2305_v4 = vpop.eup %2304  ;;  %838 = vst.msk [vmem:[#allocation3 + $0x20] sm:$0xff] %vm232_vm5, %v2303_v8 }
 0x224   :  { %v2307_v10 = vpop.eup %2306  ;;  %839 = vst.msk [vmem:[#allocation3 + $0x28] sm:$0xff] %vm232_vm5, %v2305_v4  ;;  %916 = vbcast.lane.b32.xlu0 %v2600_v25, 320  ;;  %920 = vbcast.lane.b32.xlu1 %v2600_v25, 328  ;;  %v619_v4 = vrot.slane %v591_v32, %v2645_v54 }
 0x225   :  { %v2309_v16 = vpop.eup %2308  ;;  %840 = vst.msk [vmem:[#allocation3 + $0x30] sm:$0xff] %vm232_vm5, %v2307_v10 }
 0x226   :  { %v2311_v23 = vpop.eup %2310  ;;  %841 = vst.msk [vmem:[#allocation3 + $0x38] sm:$0xff] %vm232_vm5, %v2309_v16  ;;  %v1071_v16 = vmul.f32 0.0, %v1069_v7  ;;  %v1162_v7 = vld [vmem:[#allocation2 + $0x48] sm:$0xff] }
 0x227   :  { %v2313_v26 = vpop.eup %2312  ;;  %842 = vst.msk [vmem:[#allocation3 + $0x40] sm:$0xff] %vm232_vm5, %v2311_v23 }
 0x228   :  { %v2315_v34 = vpop.eup %2314  ;;  %843 = vst.msk [vmem:[#allocation3 + $0x48] sm:$0xff] %vm232_vm5, %v2313_v26  ;;  %928 = vbcast.lane.b32.xlu0 %v2606_v27, 320  ;;  %932 = vbcast.lane.b32.xlu1 %v2606_v27, 328 }
 0x229   :  { %v2317_v35 = vpop.eup %2316  ;;  %844 = vst.msk [vmem:[#allocation3 + $0x50] sm:$0xff] %vm232_vm5, %v2315_v34  ;;  %v621_v34 = vcombine.high %v605_v41, %v605_v41 }
 0x22a   :  { %v2319_v37 = vpop.eup %2318  ;;  %845 = vst.msk [vmem:[#allocation3 + $0x58] sm:$0xff] %vm232_vm5, %v2317_v35  ;;  %v1090_v35 = vld [vmem:[#allocation2 + $0x18] sm:$0xff] }
 0x22b   :  { %v2321_v39 = vpop.eup %2320  ;;  %846 = vst.msk [vmem:[#allocation3 + $0x60] sm:$0xff] %vm232_vm5, %v2319_v37  ;;  %v1089_v37 = vld [vmem:[#allocation2 + $0x10] sm:$0xff] }
 0x22c   :  { %v2323_v40 = vpop.eup %2322  ;;  %847 = vst.msk [vmem:[#allocation3 + $0x68] sm:$0xff] %vm232_vm5, %v2321_v39  ;;  %940 = vbcast.lane.b32.xlu0 %v2609_v28, 320  ;;  %944 = vbcast.lane.b32.xlu1 %v2609_v28, 328 }
 0x22d   :  { %v2325_v59 = vpop.eup %2324  ;;  %848 = vst.msk [vmem:[#allocation3 + $0x70] sm:$0xff] %vm232_vm5, %v2323_v40 }
 0x22e   :  { %849 = vst.msk [vmem:[#allocation3 + $0x78] sm:$0xff] %vm232_vm5, %v2325_v59  ;;  %v2327_v44 = vpop.eup %2326 }
 0x22f   :  { %v2329_v45 = vpop.eup %2328  ;;  %v1648_v31 = vadd.f32 1.0, %v2327_v44 }
 0x230   :  { %1426 = vbcast.lane.b32.xlu0 %v2692_v48, 336  ;;  %1430 = vbcast.lane.b32.xlu1 %v2692_v48, 344  ;;  %v627_v48 = vrot.slane %v598_v43, %v2531_v19  ;;  %v1649_v36 = vadd.f32 1.0, %v2329_v45  ;;  %v651_v45 = vrot.slane %v621_v34, %v2531_v19  ;;  %v2225_v34 = vld [vmem:[%s3102_s8 + $0x10] sm:$0xff]  }
 0x231   :  { %2330 = vrcp.f32 %v1648_v31 }
 0x232   :  { %2332 = vrcp.f32 %v1649_v36 }
 0x234   :  { %1434 = vbcast.lane.b32.xlu0 %v2744_v29, 336  ;;  %1438 = vbcast.lane.b32.xlu1 %v2744_v29, 344 }
 0x238   :  { %1442 = vbcast.lane.b32.xlu0 %v2761_v47, 336  ;;  %1446 = vbcast.lane.b32.xlu1 %v2761_v47, 344  ;;  %v635_v47 = vrot.slane %v620_v49, %v2531_v19  ;;  %v1113_v49 = vld [vmem:[#allocation2 + $0x20] sm:$0xff] }
 0x23c   :  { %v501_v50 = vpop.permute.xlu1 %500  ;;  %v485_v29 = vpop.permute.xlu0 %484  ;;  %1450 = vbcast.lane.b32.xlu0 %v2773_v56, 336  ;;  %1454 = vbcast.lane.b32.xlu1 %v2773_v56, 344  ;;  %v639_v56 = vrot.slane %v622_v52, %v2531_v19 }
 0x23d   :  { %v667_v51 = vmul.f32 %v631_v18, %v501_v50  ;;  %v664_v38 = vmul.f32 %v627_v48, %v485_v29 }
 0x23e   :  { %v2331_v54 = vpop.eup %2330 }
 0x23f   :  { %683 = vst.msk [vmem:[#allocation4 + $0x18] sm:$0xff] %vm232_vm5, %v667_v51  ;;  %680 = vst.msk [vmem:[#allocation4] sm:$0xff] %vm232_vm5, %v664_v38  ;;  %v2333_v42 = vpop.eup %2332  ;;  %v1654_v36 = vmul.f32 %v2331_v54, %v2525_v17  ;;  %v1186_v54 = vld [vmem:[#allocation2 + $0x58] sm:$0xff] }
 0x240   :  { %v513_v53 = vpop.permute.xlu1 %512  ;;  %v489_v5 = vpop.permute.xlu0 %488  ;;  %1458 = vbcast.lane.b32.xlu0 %v2597_v24, 336  ;;  %1462 = vbcast.lane.b32.xlu1 %v2597_v24, 344  ;;  %v643_v24 = vrot.slane %v605_v41, %v2531_v19  ;;  %v1655_v50 = vmul.f32 %v2333_v42, %v2544_v30  ;;  %v1138_v30 = vld [vmem:[#allocation2 + $0x38] sm:$0xff] }
 0x241   :  { %v669_v55 = vmul.f32 %v635_v47, %v513_v53  ;;  %v665_v57 = vmul.f32 %v627_v48, %v489_v5  ;;  %v1114_v48 = vld [vmem:[#allocation2 + $0x28] sm:$0xff] }
 0x243   :  { %685 = vst.msk [vmem:[#allocation4 + $0x28] sm:$0xff] %vm232_vm5, %v669_v55  ;;  %681 = vst.msk [vmem:[#allocation4 + $0x8] sm:$0xff] %vm232_vm5, %v665_v57  ;;  %v1137_v57 = vld [vmem:[#allocation2 + $0x30] sm:$0xff] }
 0x244   :  { %v525_v60 = vpop.permute.xlu1 %524  ;;  %v497_v12 = vpop.permute.xlu0 %496  ;;  %1466 = vbcast.lane.b32.xlu0 %v2600_v25, 336  ;;  %1470 = vbcast.lane.b32.xlu1 %v2600_v25, 344  ;;  %v647_v25 = vrot.slane %v619_v4, %v2531_v19 }
 0x245   :  { %v671_v0 = vmul.f32 %v639_v56, %v525_v60  ;;  %v666_v2 = vmul.f32 %v631_v18, %v497_v12  ;;  %v623_v18 = vcombine.high %v619_v4, %v619_v4 }
 0x246   :  { %v1072_v6 = vld [vmem:[#allocation4] sm:$0xff]  ;;  %v1095_v44 = vld [vmem:[#allocation4 + $0x18] sm:$0xff] }
 0x247   :  { %v1074_v8 = vadd.f32 %v1072_v6, %v1070_v11  ;;  %687 = vst.msk [vmem:[#allocation4 + $0x38] sm:$0xff] %vm232_vm5, %v671_v0  ;;  %682 = vst.msk [vmem:[#allocation4 + $0x10] sm:$0xff] %vm232_vm5, %v666_v2  ;;  %v655_v17 = vrot.slane %v623_v18, %v2531_v19  ;;  %v1209_v18 = vld [vmem:[#allocation2 + $0x60] sm:$0xff] }
 0x248   :  { %v537_v10 = vpop.permute.xlu1 %536  ;;  %v509_v13 = vpop.permute.xlu0 %508  ;;  %1474 = vbcast.lane.b32.xlu0 %v2606_v27, 336  ;;  %1478 = vbcast.lane.b32.xlu1 %v2606_v27, 344 }
 0x249   :  { %1076 = vst.msk [vmem:[#allocation4] sm:$0xff] %vm232_vm5, %v1074_v8  ;;  %v673_v22 = vmul.f32 %v643_v24, %v537_v10  ;;  %v668_v23 = vmul.f32 %v635_v47, %v509_v13  ;;  %v1091_v33 = vmul.f32 %v1089_v37, %v1074_v8  ;;  %v1161_v8 = vld [vmem:[#allocation2 + $0x40] sm:$0xff]  ;;  %v2224_v10 = vld [vmem:[%s3102_s8 + $0x18] sm:$0xff]  }
 0x24a   :  { %v1073_v26 = vld [vmem:[#allocation4 + $0x8] sm:$0xff]  ;;  %2172 = vmatpush3.bf16.msra.mxu1 %v2224_v10 }
 0x24b   :  { %v1075_v20 = vadd.f32 %v1073_v26, %v1071_v16  ;;  %689 = vst.msk [vmem:[#allocation4 + $0x48] sm:$0xff] %vm232_vm5, %v673_v22  ;;  %684 = vst.msk [vmem:[#allocation4 + $0x20] sm:$0xff] %vm232_vm5, %v668_v23  ;;  %v1119_v14 = vld [vmem:[#allocation4 + $0x28] sm:$0xff]  ;;  %2173 = vmatprep.subr.bf16.mxu1 %v2374_v1 }
 0x24c   :  { %v549_v39 = vpop.permute.xlu1 %548  ;;  %v521_v40 = vpop.permute.xlu0 %520  ;;  %1482 = vbcast.lane.b32.xlu0 %v2609_v28, 336  ;;  %1486 = vbcast.lane.b32.xlu1 %v2609_v28, 344 }
 0x24d   :  { %1077 = vst.msk [vmem:[#allocation4 + $0x8] sm:$0xff] %vm232_vm5, %v1075_v20  ;;  %v1092_v59 = vmul.f32 %v1090_v35, %v1075_v20  ;;  %v675_v15 = vmul.f32 %v647_v25, %v549_v39  ;;  %v670_v43 = vmul.f32 %v639_v56, %v521_v40  ;;  %v1185_v35 = vld [vmem:[#allocation2 + $0x50] sm:$0xff] }
 0x24e   :  { %v1094_v27 = vld [vmem:[#allocation4 + $0x10] sm:$0xff]  ;;  %v1143_v11 = vld [vmem:[#allocation4 + $0x38] sm:$0xff]  ;;  %2174 = vmatpush3.bf16.msra.mxu1 %v2225_v34 }
 0x24f   :  { %v1097_v46 = vadd.f32 %v1095_v44, %v1092_v59  ;;  %v1096_v31 = vadd.f32 %v1094_v27, %v1091_v33  ;;  %691 = vst.msk [vmem:[#allocation4 + $0x58] sm:$0xff] %vm232_vm5, %v675_v15  ;;  %686 = vst.msk [vmem:[#allocation4 + $0x30] sm:$0xff] %vm232_vm5, %v670_v43  ;;  %v2226_v27 = vld [vmem:[%s3102_s8 + $0x8] sm:$0xff]   ;;  %2175 = vmatprep.subr.bf16.mxu1 %v2374_v1 }
 0x250   :  { %v561_v29 = vpop.permute.xlu1 %560  ;;  %v533_v51 = vpop.permute.xlu0 %532  ;;  %1658 = vrot.lane.b32.xlu0 %v1654_v36, %s2377_s6  ;;  %1660 = vrot.lane.b32.xlu1 %v1655_v50, %s2377_s6  ;;  %v1320_v36 = vld [vmem:[#allocation4] sm:$0xff] }
 0x251   :  { %1099 = vst.msk [vmem:[#allocation4 + $0x18] sm:$0xff] %vm232_vm5, %v1097_v46  ;;  %v1116_v38 = vmul.f32 %v1114_v48, %v1097_v46  ;;  %1098 = vst.msk [vmem:[#allocation4 + $0x10] sm:$0xff] %vm232_vm5, %v1096_v31  ;;  %v1115_v47 = vmul.f32 %v1113_v49, %v1096_v31  ;;  %v677_v28 = vmul.f32 %v651_v45, %v561_v29  ;;  %v1210_v31 = vld [vmem:[#allocation2 + $0x68] sm:$0xff] }
 0x252   :  { %v672_v52 = vmul.f32 %v643_v24, %v533_v51  ;;  %v1118_v53 = vld [vmem:[#allocation4 + $0x20] sm:$0xff]  ;;  %v1167_v23 = vld [vmem:[#allocation4 + $0x48] sm:$0xff]  ;;  %2176 = vmatpush3.bf16.msra.mxu1 %v2226_v27 }
 0x253   :  { %v1121_v5 = vadd.f32 %v1119_v14, %v1116_v38  ;;  %v1120_v55 = vadd.f32 %v1118_v53, %v1115_v47  ;;  %693 = vst.msk [vmem:[#allocation4 + $0x68] sm:$0xff] %vm232_vm5, %v677_v28  ;;  %v2227_v14 = vld [vmem:[%s3102_s8] sm:$0xff]   ;;  %2177 = vmatprep.subr.bf16.mxu1 %v2374_v1 }
 0x254   :  { %688 = vst.msk [vmem:[#allocation4 + $0x40] sm:$0xff] %vm232_vm5, %v672_v52  ;;  %v573_v58 = vpop.permute.xlu1 %572  ;;  %v545_v56 = vpop.permute.xlu0 %544  ;;  %v1321_v59 = vld [vmem:[#allocation4 + $0x8] sm:$0xff] }
 0x255   :  { %1123 = vst.msk [vmem:[#allocation4 + $0x28] sm:$0xff] %vm232_vm5, %v1121_v5  ;;  %v1140_v41 = vmul.f32 %v1138_v30, %v1121_v5  ;;  %1122 = vst.msk [vmem:[#allocation4 + $0x20] sm:$0xff] %vm232_vm5, %v1120_v55  ;;  %v1139_v32 = vmul.f32 %v1137_v57, %v1120_v55  ;;  %v679_v60 = vmul.f32 %v655_v17, %v573_v58  ;;  %v1234_v30 = vld [vmem:[#allocation2 + $0x78] sm:$0xff]  ;;  %v1233_v57 = vld [vmem:[#allocation2 + $0x70] sm:$0xff] }
 0x256   :  { %v674_v12 = vmul.f32 %v647_v25, %v545_v56  ;;  %v1142_v0 = vld [vmem:[#allocation4 + $0x30] sm:$0xff]  ;;  %v1191_v15 = vld [vmem:[#allocation4 + $0x58] sm:$0xff]  ;;  %2178 = vmatpush3.bf16.msra.mxu1 %v2227_v14 }
 0x257   :  { %v1145_v2 = vadd.f32 %v1143_v11, %v1140_v41  ;;  %v1144_v6 = vadd.f32 %v1142_v0, %v1139_v32  ;;  %695 = vst.msk [vmem:[#allocation4 + $0x78] sm:$0xff] %vm232_vm5, %v679_v60  ;;  %2183 = vmatprep.subr.bf16.mxu1 %v2374_v1 }
 0x258   :  { %690 = vst.msk [vmem:[#allocation4 + $0x50] sm:$0xff] %vm232_vm5, %v674_v12  ;;  %v1263_v24 = vpop.permute.xlu1 %1262  ;;  %v557_v4 = vpop.permute.xlu0 %556  ;;  %v1323_v51 = vld [vmem:[#allocation4 + $0x18] sm:$0xff]  ;;  %v1322_v32 = vld [vmem:[#allocation4 + $0x10] sm:$0xff] }
 0x259   :  { %1147 = vst.msk [vmem:[#allocation4 + $0x38] sm:$0xff] %vm232_vm5, %v1145_v2  ;;  %v1164_v13 = vmul.f32 %v1162_v7, %v1145_v2  ;;  %1146 = vst.msk [vmem:[#allocation4 + $0x30] sm:$0xff] %vm232_vm5, %v1144_v6  ;;  %v1163_v16 = vmul.f32 %v1161_v8, %v1144_v6  ;;  %v676_v22 = vmul.f32 %v651_v45, %v557_v4 }
 0x25a   :  { %v1337_v44 = vmul.f32 %v1321_v59, %v1263_v24  ;;  %v1215_v47 = vld [vmem:[#allocation4 + $0x68] sm:$0xff] }
 0x25b   :  { %v1166_v26 = vld [vmem:[#allocation4 + $0x40] sm:$0xff]  ;;  %v1169_v20 = vadd.f32 %v1167_v23, %v1164_v13  ;;  %692 = vst.msk [vmem:[#allocation4 + $0x60] sm:$0xff] %vm232_vm5, %v676_v22 }
 0x25c   :  { %v1168_v25 = vadd.f32 %v1166_v26, %v1163_v16  ;;  %v1271_v37 = vpop.permute.xlu1 %1270  ;;  %v569_v39 = vpop.permute.xlu0 %568  ;;  %v1353_v28 = vsel %vm232_vm5, %v1337_v44, 0.0  ;;  %v1325_v4 = vld [vmem:[#allocation4 + $0x28] sm:$0xff]  ;;  %v1324_v34 = vld [vmem:[#allocation4 + $0x20] sm:$0xff] }
 0x25d   :  { %1171 = vst.msk [vmem:[#allocation4 + $0x48] sm:$0xff] %vm232_vm5, %v1169_v20  ;;  %v1188_v40 = vmul.f32 %v1186_v54, %v1169_v20  ;;  %v678_v33 = vmul.f32 %v655_v17, %v569_v39  ;;  %v1339_v55 = vmul.f32 %v1323_v51, %v1271_v37 }
 0x25e   :  { %1170 = vst.msk [vmem:[#allocation4 + $0x40] sm:$0xff] %vm232_vm5, %v1168_v25  ;;  %v1187_v42 = vmul.f32 %v1185_v35, %v1168_v25  ;;  %v1239_v0 = vld [vmem:[#allocation4 + $0x78] sm:$0xff] }
 0x25f   :  { %v1190_v43 = vld [vmem:[#allocation4 + $0x50] sm:$0xff]  ;;  %v1193_v45 = vadd.f32 %v1191_v15, %v1188_v40  ;;  %694 = vst.msk [vmem:[#allocation4 + $0x70] sm:$0xff] %vm232_vm5, %v678_v33  ;;  %v1362_v8 = vsel %vm232_vm5, %v1339_v55, 0.0 }
 0x260   :  { %v1192_v46 = vadd.f32 %v1190_v43, %v1187_v42  ;;  %v1279_v48 = vpop.permute.xlu1 %1278  ;;  %v1259_v49 = vpop.permute.xlu0 %1258  ;;  %v1327_v25 = vld [vmem:[#allocation4 + $0x38] sm:$0xff]  ;;  %v1326_v44 = vld [vmem:[#allocation4 + $0x30] sm:$0xff] }
 0x261   :  { %1195 = vst.msk [vmem:[#allocation4 + $0x58] sm:$0xff] %vm232_vm5, %v1193_v45  ;;  %v1212_v50 = vmul.f32 %v1210_v31, %v1193_v45  ;;  %v1336_v38 = vmul.f32 %v1320_v36, %v1259_v49  ;;  %v1341_v13 = vmul.f32 %v1325_v4, %v1279_v48 }
 0x262   :  { %1194 = vst.msk [vmem:[#allocation4 + $0x50] sm:$0xff] %vm232_vm5, %v1192_v46  ;;  %v1211_v29 = vmul.f32 %v1209_v18, %v1192_v46  ;;  %v1214_v52 = vld [vmem:[#allocation4 + $0x60] sm:$0xff] }
 0x263   :  { %v1217_v53 = vadd.f32 %v1215_v47, %v1212_v50  ;;  %v1352_v17 = vsel %vm232_vm5, %v1336_v38, 0.0  ;;  %v1371_v39 = vsel %vm232_vm5, %v1341_v13, 0.0 }
 0x264   :  { %v1216_v5 = vadd.f32 %v1214_v52, %v1211_v29  ;;  %v1354_v58 = vadd.f32 %v1353_v28, %v1352_v17  ;;  %v1287_v56 = vpop.permute.xlu1 %1286  ;;  %v1267_v41 = vpop.permute.xlu0 %1266  ;;  %v1329_v31 = vld [vmem:[#allocation4 + $0x48] sm:$0xff] }
 0x265   :  { %1219 = vst.msk [vmem:[#allocation4 + $0x68] sm:$0xff] %vm232_vm5, %v1217_v53  ;;  %v1236_v60 = vmul.f32 %v1234_v30, %v1217_v53  ;;  %v1338_v11 = vmul.f32 %v1322_v32, %v1267_v41  ;;  %v1343_v37 = vmul.f32 %v1327_v25, %v1287_v56  ;;  %v1328_v47 = vld [vmem:[#allocation4 + $0x40] sm:$0xff] }
 0x266   :  { %1218 = vst.msk [vmem:[#allocation4 + $0x60] sm:$0xff] %vm232_vm5, %v1216_v5  ;;  %v1235_v12 = vmul.f32 %v1233_v57, %v1216_v5  ;;  %v1238_v2 = vld [vmem:[#allocation4 + $0x70] sm:$0xff]  ;;  %v1355_v6 = vrot.slane %v1354_v58, 4 }
 0x267   :  { %v1241_v7 = vadd.f32 %v1239_v0, %v1236_v60  ;;  %v1361_v10 = vsel %vm232_vm5, %v1338_v11, 0.0  ;;  %v1380_v46 = vsel %vm232_vm5, %v1343_v37, 0.0 }
 0x268   :  { %v1240_v24 = vadd.f32 %v1238_v2, %v1235_v12  ;;  %v1356_v16 = vadd.f32 %v1355_v6, %v1354_v58  ;;  %v1363_v22 = vadd.f32 %v1362_v8, %v1361_v10  ;;  %v1295_v23 = vpop.permute.xlu1 %1294  ;;  %v1275_v26 = vpop.permute.xlu0 %1274  ;;  %v1331_v12 = vld [vmem:[#allocation4 + $0x58] sm:$0xff] }
 0x269   :  { %1243 = vst.msk [vmem:[#allocation4 + $0x78] sm:$0xff] %vm232_vm5, %v1241_v7  ;;  %v1340_v35 = vmul.f32 %v1324_v34, %v1275_v26  ;;  %v1345_v36 = vmul.f32 %v1329_v31, %v1295_v23  ;;  %v1330_v13 = vld [vmem:[#allocation4 + $0x50] sm:$0xff] }
 0x26a   :  { %1242 = vst.msk [vmem:[#allocation4 + $0x70] sm:$0xff] %vm232_vm5, %v1240_v24  ;;  %v1357_v20 = vrot.slane %v1356_v16, 2  ;;  %v1364_v54 = vrot.slane %v1363_v22, 4 }
 0x26b   :  { %v1370_v59 = vsel %vm232_vm5, %v1340_v35, 0.0  ;;  %v1389_v30 = vsel %vm232_vm5, %v1345_v36, 0.0 }
 0x26c   :  { %v1358_v40 = vadd.f32 %v1357_v20, %v1356_v16  ;;  %v1365_v42 = vadd.f32 %v1364_v54, %v1363_v22  ;;  %v1303_v33 = vpop.permute.xlu1 %1302  ;;  %v1372_v15 = vadd.f32 %v1371_v39, %v1370_v59  ;;  %v1333_v4 = vld [vmem:[#allocation4 + $0x68] sm:$0xff]  ;;  %v999_v39 = vrot.slane %v2777_v21, %v2531_v19 }
 0x26d   :  { %v1283_v43 = vpop.permute.xlu0 %1282  ;;  %v1347_v2 = vmul.f32 %v1331_v12, %v1303_v33  ;;  %v1332_v35 = vld [vmem:[#allocation4 + $0x60] sm:$0xff] }
 0x26e   :  { %v1366_v27 = vrot.slane %v1365_v42, 2  ;;  %v1342_v45 = vmul.f32 %v1326_v44, %v1283_v43  ;;  %v1373_v18 = vrot.slane %v1372_v15, 4  ;;  %v1359_v48 = vrot.slane %v1358_v40, 1 }
 0x26f   :  { %v1398_v20 = vsel %vm232_vm5, %v1347_v2, 0.0 }
 0x270   :  { %v1367_v49 = vadd.f32 %v1366_v27, %v1365_v42  ;;  %v1379_v50 = vsel %vm232_vm5, %v1342_v45, 0.0  ;;  %v1374_v29 = vadd.f32 %v1373_v18, %v1372_v15  ;;  %v1311_v52 = vpop.permute.xlu1 %1310  ;;  %v1360_v55 = vadd.f32 %v1359_v48, %v1358_v40  ;;  %v1335_v59 = vld [vmem:[#allocation4 + $0x78] sm:$0xff] }
 0x271   :  { %v1381_v51 = vadd.f32 %v1380_v46, %v1379_v50  ;;  %v1291_v38 = vpop.permute.xlu0 %1290  ;;  %v1349_v16 = vmul.f32 %v1333_v4, %v1311_v52  ;;  %v1334_v36 = vld [vmem:[#allocation4 + $0x70] sm:$0xff] }
 0x272   :  { %v1368_v28 = vrot.slane %v1367_v49, 1  ;;  %v1344_v14 = vmul.f32 %v1328_v47, %v1291_v38  ;;  %v1375_v53 = vrot.slane %v1374_v29, 2 }
 0x273   :  { %v1382_v5 = vrot.slane %v1381_v51, 4  ;;  %v1407_v43 = vsel %vm232_vm5, %v1349_v16, 0.0 }
 0x274   :  { %v1369_v17 = vadd.f32 %v1368_v28, %v1367_v49  ;;  %v1388_v57 = vsel %vm232_vm5, %v1344_v14, 0.0  ;;  %v1376_v58 = vadd.f32 %v1375_v53, %v1374_v29  ;;  %v1319_v6 = vpop.permute.xlu1 %1318  ;;  %v1078_v53 = vld [vmem:[#allocation3] sm:$0xff] }
 0x275   :  { %v1383_v56 = vadd.f32 %v1382_v5, %v1381_v51  ;;  %v1390_v41 = vadd.f32 %v1389_v30, %v1388_v57  ;;  %v1299_v7 = vpop.permute.xlu0 %1298  ;;  %v1351_v44 = vmul.f32 %v1335_v59, %v1319_v6 }
 0x276   :  { %v1601_v32 = vsel %vm1600_vm10, %v1369_v17, %v1360_v55  ;;  %v1377_v60 = vrot.slane %v1376_v58, 1  ;;  %v1346_v22 = vmul.f32 %v1330_v13, %v1299_v7 }
 0x277   :  { %v1384_v11 = vrot.slane %v1383_v56, 2  ;;  %v1391_v0 = vrot.slane %v1390_v41, 4  ;;  %v1416_v52 = vsel %vm232_vm5, %v1351_v44, 0.0  ;;  %v1101_v44 = vld [vmem:[#allocation3 + $0x10] sm:$0xff] }
 0x278   :  { %v1378_v8 = vadd.f32 %v1377_v60, %v1376_v58  ;;  %v1397_v25 = vsel %vm232_vm5, %v1346_v22, 0.0  ;;  %v857_v37 = vpop.permute.xlu1 %856 }
 0x279   :  { %v1385_v24 = vadd.f32 %v1384_v11, %v1383_v56  ;;  %v1392_v10 = vadd.f32 %v1391_v0, %v1390_v41  ;;  %v1307_v54 = vpop.permute.xlu0 %1306  ;;  %v1399_v33 = vadd.f32 %v1398_v20, %v1397_v25  ;;  %v1036_v27 = vmul.f32 %v999_v39, %v857_v37 }
 0x27a   :  { %v1603_v23 = vsel %vm1602_vm11, %v1378_v8, %v1601_v32  ;;  %v1348_v15 = vmul.f32 %v1332_v35, %v1307_v54  ;;  %v1080_v56 = vmul.f32 0.0, %v1078_v53  ;;  %v1079_v32 = vld [vmem:[#allocation3 + $0x8] sm:$0xff]  ;;  %v1003_v11 = vrot.slane %v2785_v9, %v2531_v19 }
 0x27b   :  { %v1386_v26 = vrot.slane %v1385_v24, 1  ;;  %v1393_v34 = vrot.slane %v1392_v10, 2  ;;  %v1400_v46 = vrot.slane %v1399_v33, 4  ;;  %1052 = vst.msk [vmem:[#allocation5] sm:$0xff] %vm232_vm5, %v1036_v27  ;;  %v992_v0 = vcombine.high %v2777_v21, %v2777_v21  ;;  %v1126_v53 = vld [vmem:[#allocation3 + $0x28] sm:$0xff] }
 0x27c   :  { %v1406_v31 = vsel %vm232_vm5, %v1348_v15, 0.0  ;;  %v861_v50 = vpop.permute.xlu1 %860  ;;  %v994_v35 = vcombine.high %v2785_v9, %v2785_v9  ;;  %v1102_v15 = vld [vmem:[#allocation3 + $0x18] sm:$0xff] }
 0x27d   :  { %v1387_v40 = vadd.f32 %v1386_v26, %v1385_v24  ;;  %v1394_v42 = vadd.f32 %v1393_v34, %v1392_v10  ;;  %v1408_v48 = vadd.f32 %v1407_v43, %v1406_v31  ;;  %v1315_v49 = vpop.permute.xlu0 %1314  ;;  %v1401_v51 = vadd.f32 %v1400_v46, %v1399_v33 }
 0x27e   :  { %v1350_v38 = vmul.f32 %v1334_v36, %v1315_v49  ;;  %v1037_v47 = vmul.f32 %v999_v39, %v861_v50  ;;  %v1081_v24 = vmul.f32 0.0, %v1079_v32  ;;  %v1007_v54 = vrot.slane %v992_v0, %v2531_v19 }
 0x27f   :  { %v1395_v45 = vrot.slane %v1394_v42, 1  ;;  %v1605_v18 = vsel %vm1604_vm12, %v1387_v40, %v1603_v23  ;;  %v1409_v28 = vrot.slane %v1408_v48, 4  ;;  %v1402_v14 = vrot.slane %v1401_v51, 2 }
 0x280   :  { %v1415_v5 = vsel %vm232_vm5, %v1350_v38, 0.0  ;;  %1053 = vst.msk [vmem:[#allocation5 + $0x8] sm:$0xff] %vm232_vm5, %v1037_v47  ;;  %v1011_v43 = vrot.slane %v994_v35, %v2531_v19  ;;  %v1125_v47 = vld [vmem:[#allocation3 + $0x20] sm:$0xff] }
 0x281   :  { %v1396_v29 = vadd.f32 %v1395_v45, %v1394_v42  ;;  %v1410_v17 = vadd.f32 %v1409_v28, %v1408_v48  ;;  %v1417_v30 = vadd.f32 %v1416_v52, %v1415_v5  ;;  %v1403_v57 = vadd.f32 %v1402_v14, %v1401_v51 }
 0x282   :  { %v1082_v12 = vld [vmem:[#allocation5] sm:$0xff]  ;;  %v1015_v51 = vrot.slane %v2788_v61, %v2531_v19 }
 0x283   :  { %v1607_v55 = vsel %vm1606_vm13, %v1396_v29, %v1605_v18  ;;  %v1411_v58 = vrot.slane %v1410_v17, 2  ;;  %v1418_v41 = vrot.slane %v1417_v30, 4  ;;  %v1404_v60 = vrot.slane %v1403_v57, 1 }
 0x284   :  { %v1084_v6 = vadd.f32 %v1082_v12, %v1080_v56  ;;  %v1019_v56 = vrot.slane %v2792_v3, %v2531_v19 }
 0x285   :  { %v1412_v2 = vadd.f32 %v1411_v58, %v1410_v17  ;;  %v1419_v7 = vadd.f32 %v1418_v41, %v1417_v30  ;;  %v1405_v8 = vadd.f32 %v1404_v60, %v1403_v57  ;;  %v993_v41 = vcombine.high %v2788_v61, %v2788_v61  ;;  %v1149_v60 = vld [vmem:[#allocation3 + $0x30] sm:$0xff] }
 0x286   :  { %v869_v4 = vpop.permute.xlu0 %868  ;;  %v873_v10 = vpop.permute.xlu1 %872  ;;  %1086 = vst.msk [vmem:[#allocation5] sm:$0xff] %vm232_vm5, %v1084_v6  ;;  %v1103_v31 = vmul.f32 %v1101_v44, %v1084_v6 }
 0x287   :  { %v1413_v13 = vrot.slane %v1412_v2, 1  ;;  %v1420_v16 = vrot.slane %v1419_v7, 2  ;;  %v1083_v22 = vld [vmem:[#allocation5 + $0x8] sm:$0xff]  ;;  %v1038_v23 = vmul.f32 %v1003_v11, %v869_v4  ;;  %v1039_v34 = vmul.f32 %v1003_v11, %v873_v10 }
 0x288   :  { %v1085_v26 = vadd.f32 %v1083_v22, %v1081_v24  ;;  %v1609_v20 = vsel %vm1608_vm14, %v1405_v8, %v1607_v55  ;;  %v1023_v61 = vrot.slane %v993_v41, %v2531_v19  ;;  %v1173_v22 = vld [vmem:[#allocation3 + $0x40] sm:$0xff] }
 0x289   :  { %v1414_v21 = vadd.f32 %v1413_v13, %v1412_v2  ;;  %v1421_v25 = vadd.f32 %v1420_v16, %v1419_v7  ;;  %1054 = vst.msk [vmem:[#allocation5 + $0x10] sm:$0xff] %vm232_vm5, %v1038_v23  ;;  %1055 = vst.msk [vmem:[#allocation5 + $0x18] sm:$0xff] %vm232_vm5, %v1039_v34  ;;  %v1150_v2 = vld [vmem:[#allocation3 + $0x38] sm:$0xff]  ;;  %v995_v13 = vcombine.high %v2792_v3, %v2792_v3 }
 0x28a   :  { %1087 = vst.msk [vmem:[#allocation5 + $0x8] sm:$0xff] %vm232_vm5, %v1085_v26  ;;  %v881_v37 = vpop.permute.xlu0 %880  ;;  %v885_v39 = vpop.permute.xlu1 %884  ;;  %v1104_v27 = vmul.f32 %v1102_v15, %v1085_v26 }
 0x28b   :  { %v1422_v40 = vrot.slane %v1421_v25, 1  ;;  %v1040_v42 = vmul.f32 %v1007_v54, %v881_v37  ;;  %v1041_v59 = vmul.f32 %v1007_v54, %v885_v39  ;;  %v1611_v33 = vsel %vm1610_vm15, %v1414_v21, %v1609_v20  ;;  %v1174_v20 = vld [vmem:[#allocation3 + $0x48] sm:$0xff] }
 0x28c   :  { %v1027_v3 = vrot.slane %v995_v13, %v2531_v19 }
 0x28d   :  { %1056 = vst.msk [vmem:[#allocation5 + $0x20] sm:$0xff] %vm232_vm5, %v1040_v42  ;;  %1057 = vst.msk [vmem:[#allocation5 + $0x28] sm:$0xff] %vm232_vm5, %v1041_v59  ;;  %v1423_v9 = vadd.f32 %v1422_v40, %v1421_v25  ;;  %v1197_v42 = vld [vmem:[#allocation3 + $0x50] sm:$0xff] }
 0x28e   :  { %v893_v45 = vpop.permute.xlu0 %892  ;;  %v897_v46 = vpop.permute.xlu1 %896 }
 0x28f   :  { %v1042_v18 = vmul.f32 %v1011_v43, %v893_v45  ;;  %v1043_v48 = vmul.f32 %v1011_v43, %v897_v46  ;;  %v2942_v49 = vsel %vm1612_vm2, %v1423_v9, %v1611_v33  ;;  %v1198_v43 = vld [vmem:[#allocation3 + $0x58] sm:$0xff] }
 0x290   :  { %v1106_v36 = vld [vmem:[#allocation5 + $0x10] sm:$0xff]  ;;  %v1107_v29 = vld [vmem:[#allocation5 + $0x18] sm:$0xff] }
 0x291   :  { %v1108_v50 = vadd.f32 %v1106_v36, %v1103_v31  ;;  %1058 = vst.msk [vmem:[#allocation5 + $0x30] sm:$0xff] %vm232_vm5, %v1042_v18  ;;  %1059 = vst.msk [vmem:[#allocation5 + $0x38] sm:$0xff] %vm232_vm5, %v1043_v48  ;;  %v1109_v38 = vadd.f32 %v1107_v29, %v1104_v27  ;;  %v1221_v18 = vld [vmem:[#allocation3 + $0x60] sm:$0xff]  ;;  %v1222_v29 = vld [vmem:[#allocation3 + $0x68] sm:$0xff] }
 0x292   :  { %v905_v28 = vpop.permute.xlu0 %904  ;;  %v909_v52 = vpop.permute.xlu1 %908 }
 0x293   :  { %1110 = vst.msk [vmem:[#allocation5 + $0x10] sm:$0xff] %vm232_vm5, %v1108_v50  ;;  %v1127_v14 = vmul.f32 %v1125_v47, %v1108_v50  ;;  %v1044_v5 = vmul.f32 %v1015_v51, %v905_v28  ;;  %v1045_v55 = vmul.f32 %v1015_v51, %v909_v52  ;;  %1111 = vst.msk [vmem:[#allocation5 + $0x18] sm:$0xff] %vm232_vm5, %v1109_v38 }
 0x294   :  { %v1130_v17 = vld [vmem:[#allocation5 + $0x20] sm:$0xff]  ;;  %v1128_v30 = vmul.f32 %v1126_v53, %v1109_v38  ;;  %v1131_v57 = vld [vmem:[#allocation5 + $0x28] sm:$0xff] }
 0x295   :  { %v1132_v58 = vadd.f32 %v1130_v17, %v1127_v14  ;;  %1060 = vst.msk [vmem:[#allocation5 + $0x40] sm:$0xff] %vm232_vm5, %v1044_v5  ;;  %1061 = vst.msk [vmem:[#allocation5 + $0x48] sm:$0xff] %vm232_vm5, %v1045_v55  ;;  %v1245_v14 = vld [vmem:[#allocation3 + $0x70] sm:$0xff] }
 0x296   :  { %v1133_v32 = vadd.f32 %v1131_v57, %v1128_v30  ;;  %v917_v12 = vpop.permute.xlu0 %916  ;;  %v921_v11 = vpop.permute.xlu1 %920  ;;  %v1246_v57 = vld [vmem:[#allocation3 + $0x78] sm:$0xff] }
 0x297   :  { %1134 = vst.msk [vmem:[#allocation5 + $0x20] sm:$0xff] %vm232_vm5, %v1132_v58  ;;  %v1151_v0 = vmul.f32 %v1149_v60, %v1132_v58  ;;  %v1046_v6 = vmul.f32 %v1019_v56, %v917_v12  ;;  %v1047_v7 = vmul.f32 %v1019_v56, %v921_v11  ;;  %v1488_v58 = vld [vmem:[#allocation5] sm:$0xff]  ;;  %v1489_v11 = vld [vmem:[#allocation5 + $0x8] sm:$0xff] }
 0x298   :  { %1135 = vst.msk [vmem:[#allocation5 + $0x28] sm:$0xff] %vm232_vm5, %v1133_v32  ;;  %v1154_v8 = vld [vmem:[#allocation5 + $0x30] sm:$0xff]  ;;  %v1152_v24 = vmul.f32 %v1150_v2, %v1133_v32  ;;  %v1155_v4 = vld [vmem:[#allocation5 + $0x38] sm:$0xff] }
 0x299   :  { %v1156_v10 = vadd.f32 %v1154_v8, %v1151_v0  ;;  %1062 = vst.msk [vmem:[#allocation5 + $0x50] sm:$0xff] %vm232_vm5, %v1046_v6  ;;  %1063 = vst.msk [vmem:[#allocation5 + $0x58] sm:$0xff] %vm232_vm5, %v1047_v7 }
 0x29a   :  { %v1157_v16 = vadd.f32 %v1155_v4, %v1152_v24  ;;  %v929_v23 = vpop.permute.xlu0 %928  ;;  %v933_v26 = vpop.permute.xlu1 %932  ;;  %v1490_v5 = vld [vmem:[#allocation5 + $0x10] sm:$0xff]  ;;  %v1491_v17 = vld [vmem:[#allocation5 + $0x18] sm:$0xff] }
 0x29b   :  { %1158 = vst.msk [vmem:[#allocation5 + $0x30] sm:$0xff] %vm232_vm5, %v1156_v10  ;;  %v1175_v34 = vmul.f32 %v1173_v22, %v1156_v10  ;;  %v1048_v21 = vmul.f32 %v1023_v61, %v929_v23  ;;  %v1049_v25 = vmul.f32 %v1023_v61, %v933_v26 }
 0x29c   :  { %1159 = vst.msk [vmem:[#allocation5 + $0x38] sm:$0xff] %vm232_vm5, %v1157_v16  ;;  %v1178_v54 = vld [vmem:[#allocation5 + $0x40] sm:$0xff]  ;;  %v1176_v35 = vmul.f32 %v1174_v20, %v1157_v16  ;;  %v1179_v37 = vld [vmem:[#allocation5 + $0x48] sm:$0xff] }
 0x29d   :  { %v1180_v39 = vadd.f32 %v1178_v54, %v1175_v34  ;;  %1064 = vst.msk [vmem:[#allocation5 + $0x60] sm:$0xff] %vm232_vm5, %v1048_v21  ;;  %1065 = vst.msk [vmem:[#allocation5 + $0x68] sm:$0xff] %vm232_vm5, %v1049_v25 }
 0x29e   :  { %v1181_v40 = vadd.f32 %v1179_v37, %v1176_v35  ;;  %v941_v59 = vpop.permute.xlu0 %940  ;;  %v945_v33 = vpop.permute.xlu1 %944  ;;  %v1492_v24 = vld [vmem:[#allocation5 + $0x20] sm:$0xff] }
 0x29f   :  { %1182 = vst.msk [vmem:[#allocation5 + $0x40] sm:$0xff] %vm232_vm5, %v1180_v39  ;;  %v1199_v15 = vmul.f32 %v1197_v42, %v1180_v39  ;;  %v1050_v9 = vmul.f32 %v1027_v3, %v941_v59  ;;  %v1051_v44 = vmul.f32 %v1027_v3, %v945_v33  ;;  %v1493_v10 = vld [vmem:[#allocation5 + $0x28] sm:$0xff] }
 0x2a0   :  { %1183 = vst.msk [vmem:[#allocation5 + $0x48] sm:$0xff] %vm232_vm5, %v1181_v40  ;;  %v1202_v27 = vld [vmem:[#allocation5 + $0x50] sm:$0xff]  ;;  %v1200_v45 = vmul.f32 %v1198_v43, %v1181_v40  ;;  %v1203_v46 = vld [vmem:[#allocation5 + $0x58] sm:$0xff] }
 0x2a1   :  { %v1204_v31 = vadd.f32 %v1202_v27, %v1199_v15  ;;  %1066 = vst.msk [vmem:[#allocation5 + $0x70] sm:$0xff] %vm232_vm5, %v1050_v9  ;;  %1067 = vst.msk [vmem:[#allocation5 + $0x78] sm:$0xff] %vm232_vm5, %v1051_v44 }
 0x2a2   :  { %v1205_v19 = vadd.f32 %v1203_v46, %v1200_v45  ;;  %v1427_v48 = vpop.permute.xlu0 %1426  ;;  %v1431_v36 = vpop.permute.xlu1 %1430  ;;  %v1494_v54 = vld [vmem:[#allocation5 + $0x30] sm:$0xff] }
 0x2a3   :  { %1206 = vst.msk [vmem:[#allocation5 + $0x50] sm:$0xff] %vm232_vm5, %v1204_v31  ;;  %v1223_v50 = vmul.f32 %v1221_v18, %v1204_v31  ;;  %v1504_v2 = vmul.f32 %v1488_v58, %v1427_v48  ;;  %v1505_v6 = vmul.f32 %v1489_v11, %v1431_v36  ;;  %v1495_v37 = vld [vmem:[#allocation5 + $0x38] sm:$0xff] }
 0x2a4   :  { %1207 = vst.msk [vmem:[#allocation5 + $0x58] sm:$0xff] %vm232_vm5, %v1205_v19  ;;  %v1226_v51 = vld [vmem:[#allocation5 + $0x60] sm:$0xff]  ;;  %v1224_v38 = vmul.f32 %v1222_v29, %v1205_v19  ;;  %v1227_v47 = vld [vmem:[#allocation5 + $0x68] sm:$0xff] }
 0x2a5   :  { %v1228_v28 = vadd.f32 %v1226_v51, %v1223_v50  ;;  %v1520_v23 = vsel %vm232_vm5, %v1504_v2, 0.0  ;;  %v1521_v26 = vsel %vm232_vm5, %v1505_v6, 0.0 }
 0x2a6   :  { %v1229_v52 = vadd.f32 %v1227_v47, %v1224_v38  ;;  %v1435_v53 = vpop.permute.xlu0 %1434  ;;  %v1439_v55 = vpop.permute.xlu1 %1438  ;;  %v1522_v42 = vadd.f32 %v1521_v26, %v1520_v23  ;;  %v1496_v44 = vld [vmem:[#allocation5 + $0x40] sm:$0xff] }
 0x2a7   :  { %1230 = vst.msk [vmem:[#allocation5 + $0x60] sm:$0xff] %vm232_vm5, %v1228_v28  ;;  %v1247_v30 = vmul.f32 %v1245_v14, %v1228_v28  ;;  %v1506_v56 = vmul.f32 %v1490_v5, %v1435_v53  ;;  %v1507_v41 = vmul.f32 %v1491_v17, %v1439_v55  ;;  %v1497_v45 = vld [vmem:[#allocation5 + $0x48] sm:$0xff] }
 0x2a8   :  { %1231 = vst.msk [vmem:[#allocation5 + $0x68] sm:$0xff] %vm232_vm5, %v1229_v52  ;;  %v1250_v32 = vld [vmem:[#allocation5 + $0x70] sm:$0xff]  ;;  %v1248_v60 = vmul.f32 %v1246_v57, %v1229_v52  ;;  %v1251_v12 = vld [vmem:[#allocation5 + $0x78] sm:$0xff]  ;;  %v1523_v18 = vrot.slane %v1522_v42, 4 }
 0x2a9   :  { %v1252_v0 = vadd.f32 %v1250_v32, %v1247_v30  ;;  %v1529_v61 = vsel %vm232_vm5, %v1506_v56, 0.0  ;;  %v1530_v13 = vsel %vm232_vm5, %v1507_v41, 0.0 }
 0x2aa   :  { %v1253_v7 = vadd.f32 %v1251_v12, %v1248_v60  ;;  %v1443_v8 = vpop.permute.xlu0 %1442  ;;  %v1447_v4 = vpop.permute.xlu1 %1446  ;;  %v1531_v21 = vadd.f32 %v1530_v13, %v1529_v61  ;;  %v1498_v47 = vld [vmem:[#allocation5 + $0x50] sm:$0xff]  ;;  %v1524_v55 = vadd.f32 %v1523_v18, %v1522_v42 }
 0x2ab   :  { %1254 = vst.msk [vmem:[#allocation5 + $0x70] sm:$0xff] %vm232_vm5, %v1252_v0  ;;  %v1508_v16 = vmul.f32 %v1492_v24, %v1443_v8  ;;  %v1509_v22 = vmul.f32 %v1493_v10, %v1447_v4  ;;  %v1499_v52 = vld [vmem:[#allocation5 + $0x58] sm:$0xff] }
 0x2ac   :  { %1255 = vst.msk [vmem:[#allocation5 + $0x78] sm:$0xff] %vm232_vm5, %v1253_v7  ;;  %v1532_v15 = vrot.slane %v1531_v21, 4  ;;  %v1525_v8 = vrot.slane %v1524_v55, 2 }
 0x2ad   :  { %v1538_v34 = vsel %vm232_vm5, %v1508_v16, 0.0  ;;  %v1539_v20 = vsel %vm232_vm5, %v1509_v22, 0.0 }
 0x2ae   :  { %v1451_v25 = vpop.permute.xlu0 %1450  ;;  %v1455_v35 = vpop.permute.xlu1 %1454  ;;  %v1540_v39 = vadd.f32 %v1539_v20, %v1538_v34  ;;  %v1533_v29 = vadd.f32 %v1532_v15, %v1531_v21  ;;  %v1500_v12 = vld [vmem:[#allocation5 + $0x60] sm:$0xff] }
 0x2af   :  { %v1510_v3 = vmul.f32 %v1494_v54, %v1451_v25  ;;  %v1511_v40 = vmul.f32 %v1495_v37, %v1455_v35  ;;  %v1501_v0 = vld [vmem:[#allocation5 + $0x68] sm:$0xff]  ;;  %v1526_v37 = vadd.f32 %v1525_v8, %v1524_v55 }
 0x2b0   :  { %v1541_v46 = vrot.slane %v1540_v39, 4  ;;  %v1534_v56 = vrot.slane %v1533_v29, 2 }
 0x2b1   :  { %v1547_v59 = vsel %vm232_vm5, %v1510_v3, 0.0  ;;  %v1548_v33 = vsel %vm232_vm5, %v1511_v40, 0.0 }
 0x2b2   :  { %v1549_v43 = vadd.f32 %v1548_v33, %v1547_v59  ;;  %v1459_v9 = vpop.permute.xlu0 %1458  ;;  %v1463_v27 = vpop.permute.xlu1 %1462  ;;  %v1542_v14 = vadd.f32 %v1541_v46, %v1540_v39  ;;  %v1535_v16 = vadd.f32 %v1534_v56, %v1533_v29  ;;  %v1502_v34 = vld [vmem:[#allocation5 + $0x70] sm:$0xff] }
 0x2b3   :  { %v1512_v31 = vmul.f32 %v1496_v44, %v1459_v9  ;;  %v1513_v19 = vmul.f32 %v1497_v45, %v1463_v27  ;;  %v1503_v21 = vld [vmem:[#allocation5 + $0x78] sm:$0xff]  ;;  %v1527_v45 = vrot.slane %v1526_v37, 1 }
 0x2b4   :  { %v1550_v48 = vrot.slane %v1549_v43, 4  ;;  %v1543_v2 = vrot.slane %v1542_v14, 2  ;;  %v1536_v15 = vrot.slane %v1535_v16, 1 }
 0x2b5   :  { %v1556_v36 = vsel %vm232_vm5, %v1512_v31, 0.0  ;;  %v1557_v50 = vsel %vm232_vm5, %v1513_v19, 0.0 }
 0x2b6   :  { %v1558_v51 = vadd.f32 %v1557_v50, %v1556_v36  ;;  %v1467_v38 = vpop.permute.xlu0 %1466  ;;  %v1471_v28 = vpop.permute.xlu1 %1470  ;;  %v1551_v17 = vadd.f32 %v1550_v48, %v1549_v43  ;;  %v1544_v25 = vadd.f32 %v1543_v2, %v1542_v14  ;;  %v1537_v48 = vadd.f32 %v1536_v15, %v1535_v16  ;;  %v2229_v15 = vld [vmem:[%s3105_s11] sm:$0xff]  }
 0x2b7   :  { %v1514_v53 = vmul.f32 %v1498_v47, %v1467_v38  ;;  %v1515_v5 = vmul.f32 %v1499_v52, %v1471_v28  ;;  %v1528_v38 = vadd.f32 %v1527_v45, %v1526_v37 }
 0x2b8   :  { %v1559_v30 = vrot.slane %v1558_v51, 4  ;;  %v1552_v24 = vrot.slane %v1551_v17, 2  ;;  %v1545_v27 = vrot.slane %v1544_v25, 1 }
 0x2b9   :  { %v1565_v57 = vsel %vm232_vm5, %v1514_v53, 0.0  ;;  %v1566_v58 = vsel %vm232_vm5, %v1515_v5, 0.0  ;;  %v1623_v53 = vsel %vm1600_vm10, %v1537_v48, %v1528_v38 }
 0x2ba   :  { %v1560_v41 = vadd.f32 %v1559_v30, %v1558_v51  ;;  %v1567_v32 = vadd.f32 %v1566_v58, %v1565_v57  ;;  %v1475_v60 = vpop.permute.xlu0 %1474  ;;  %v1479_v11 = vpop.permute.xlu1 %1478  ;;  %v1553_v39 = vadd.f32 %v1552_v24, %v1551_v17  ;;  %v1546_v51 = vadd.f32 %v1545_v27, %v1544_v25  ;;  %v2101_v58 = vld [vmem:[%s3101_s7] ss:$0 sm:$0xff] }
 0x2bb   :  { %v1516_v6 = vmul.f32 %v1500_v12, %v1475_v60  ;;  %v1517_v7 = vmul.f32 %v1501_v0, %v1479_v11  ;;  %v1638_v12 = vmul.f32 %v2101_v58, %v2561_v62  ;;  %v1639_v11 = vmul.f32 %v2101_v58, %v2563_v63  ;;  %v2350_v63 = vld [vmem:[%s3117_s30] sm:$0xff] }
 0x2bc   :  { %v1568_v4 = vrot.slane %v1567_v32, 4  ;;  %v1561_v10 = vrot.slane %v1560_v41, 2  ;;  %v1554_v46 = vrot.slane %v1553_v39, 1  ;;  %v1624_v17 = vsel %vm1602_vm11, %v1546_v51, %v1623_v53  ;;  %v2232_v53 = vld [vmem:[%s3107_s13 + $0x28] sm:$0xff]   ;;  %v2111_v58 = vld [vmem:[%s3106_s12] ss:$0 sm:$0xff] }
 0x2bd   :  { %v1574_v61 = vsel %vm232_vm5, %v1516_v6, 0.0  ;;  %v1575_v13 = vsel %vm232_vm5, %v1517_v7, 0.0  ;;  %v1640_v7 = vadd.f32 %v1638_v12, %v2942_v49 }
 0x2be   :  { %v1569_v22 = vadd.f32 %v1568_v4, %v1567_v32  ;;  %v1576_v23 = vadd.f32 %v1575_v13, %v1574_v61  ;;  %v1483_v26 = vpop.permute.xlu0 %1482  ;;  %v1487_v20 = vpop.permute.xlu1 %1486  ;;  %v1562_v42 = vadd.f32 %v1561_v10, %v1560_v41  ;;  %v1555_v47 = vadd.f32 %v1554_v46, %v1553_v39 }
 0x2bf   :  { %v1518_v54 = vmul.f32 %v1502_v34, %v1483_v26  ;;  %v1519_v35 = vmul.f32 %v1503_v21, %v1487_v20 }
 0x2c0   :  { %v1570_v3 = vrot.slane %v1569_v22, 2  ;;  %v1577_v40 = vrot.slane %v1576_v23, 4  ;;  %v1563_v18 = vrot.slane %v1562_v42, 1  ;;  %v1625_v56 = vsel %vm1604_vm12, %v1555_v47, %v1624_v17  ;;  %v2235_v17 = vld [vmem:[%s3107_s13 + $0x10] sm:$0xff]  }
 0x2c1   :  { %v1583_v59 = vsel %vm232_vm5, %v1518_v54, 0.0  ;;  %v1584_v33 = vsel %vm232_vm5, %v1519_v35, 0.0 }
 0x2c2   :  { %v1571_v43 = vadd.f32 %v1570_v3, %v1569_v22  ;;  %v1578_v9 = vadd.f32 %v1577_v40, %v1576_v23  ;;  %v1585_v44 = vadd.f32 %v1584_v33, %v1583_v59  ;;  %v1564_v14 = vadd.f32 %v1563_v18, %v1562_v42  ;;  %v1659_v2 = vpop.permute.xlu0 %1658  ;;  %v1661_v24 = vpop.permute.xlu1 %1660  ;;  %v2351_v23 = vld [vmem:[%s3117_s30 + $0x8] sm:$0xff]  ;;  %v2109_v18 = vld [vmem:[%s3103_s9] ss:$0 sm:$0xff] }
 0x2c3   :  { %v1664_v4 = vmul.f32 %v1659_v2, %v1640_v7  ;;  %v2228_v33 = vld [vmem:[%s3105_s11 + $0x8] sm:$0xff]   ;;  %s2352_s11 = scalar_lea.vmem %s2077_s18, 256 }
 0x2c4   :  { %v1579_v31 = vrot.slane %v1578_v9, 2  ;;  %v1586_v19 = vrot.slane %v1585_v44, 4  ;;  %v1572_v36 = vrot.slane %v1571_v43, 1  ;;  %v1626_v41 = vsel %vm1606_vm13, %v1564_v14, %v1625_v56  ;;  %v2231_v14 = vld [vmem:[%s3107_s13 + $0x30] sm:$0xff]   ;;  %p2353_p0 = scmp.ne.s32.totalorder %s2077_s18, %s2352_s11  ;;  %p2358_p2 = scmp.lt.s32.totalorder %s2352_s11, %s2352_s11 }
 0x2c6   :  { %v1580_v50 = vadd.f32 %v1579_v31, %v1578_v9  ;;  %v1587_v29 = vadd.f32 %v1586_v19, %v1585_v44  ;;  %v1573_v5 = vadd.f32 %v1572_v36, %v1571_v43  ;;  %p2359_p3 = por %p2358_p2, %p2357_p1 }
 0x2c8   :  { %v1581_v28 = vrot.slane %v1580_v50, 1  ;;  %v1588_v52 = vrot.slane %v1587_v29, 2  ;;  %v1627_v60 = vsel %vm1608_vm14, %v1573_v5, %v1626_v41  ;;  %v2233_v5 = vld [vmem:[%s3107_s13 + $0x20] sm:$0xff]   ;;  %p2360_p4 = pnand %p2359_p3, %p2353_p0 }
 0x2ca   :  { %v1589_v55 = vadd.f32 %v1588_v52, %v1587_v29  ;;  %v1582_v30 = vadd.f32 %v1581_v28, %v1580_v50  ;;  %v2110_v29 = vld [vmem:[%s3104_s10] ss:$0 sm:$0xff]  ;;  %v2230_v52 = vld [vmem:[%s3107_s13 + $0x38] sm:$0xff]  }
 0x2cb   :  { %2192 = vmatpush3.bf16.msra.mxu0 %v2230_v52 }
 0x2cc   :  { %v1590_v57 = vrot.slane %v1589_v55, 1  ;;  %v1628_v0 = vsel %vm1610_vm15, %v1582_v30, %v1627_v60  ;;  %2193 = vmatprep.subr.bf16.mxu0 %v2374_v1  ;;  %v2236_v30 = vld [vmem:[%s3107_s13 + $0x8] sm:$0xff]  }
 0x2ce   :  { %v1591_v32 = vadd.f32 %v1590_v57, %v1589_v55  ;;  %v2234_v55 = vld [vmem:[%s3107_s13 + $0x18] sm:$0xff]   ;;  %v2237_v57 = vld [vmem:[%s3107_s13] sm:$0xff]  }
 0x2cf   :  { %2194 = vmatpush3.bf16.msra.mxu0 %v2231_v14 }
 0x2d0   :  { %v1629_v6 = vsel %vm1612_vm2, %v1591_v32, %v1628_v0  ;;  %2195 = vmatprep.subr.bf16.mxu0 %v2374_v1 }
 0x2d1   :  { %v1641_v8 = vadd.f32 %v1639_v11, %v1629_v6 }
 0x2d3   :  { %v1665_v10 = vmul.f32 %v1661_v24, %v1641_v8  ;;  %2196 = vmatpush3.bf16.msra.mxu0 %v2232_v53 }
 0x2d4   :  { %2197 = vmatprep.subr.bf16.mxu0 %v2374_v1 }
 0x2d5   :  { %v1666_v61 = vpack.c.bf16 %v1665_v10, %v1664_v4 }
 0x2d7   :  { %2180 = vmatmul.mubr.msk.bf16.vlgmr.msra.gmra.mxu1 %vm232_vm5, %v1666_v61  ;;  %2198 = vmatpush3.bf16.msra.mxu0 %v2233_v5 }
 0x2d8   :  { %2187 = vmatprep.mubr.msk.bf16.mxu1 %vm2375_vm0, %v2374_v1  ;;  %2184 = vmatpush3.bf16.msra.mxu1 %v2228_v33 }
 0x2d9   :  { %2185 = vmatprep.subr.bf16.mxu1 %v2374_v1  ;;  %2199 = vmatprep.subr.bf16.mxu0 %v2374_v1 }
 0x2db   :  { %2200 = vmatpush3.bf16.msra.mxu0 %v2234_v55  ;;  %v2115_v55 = vld [vmem:[%s3108_s14] ss:$0 sm:$0xff] }
 0x2dc   :  { %2186 = vmatpush3.bf16.msra.mxu1 %v2229_v15  ;;  %2201 = vmatprep.subr.bf16.mxu0 %v2374_v1 }
 0x2df   :  { %2202 = vmatpush3.bf16.msra.mxu0 %v2235_v17 }
 0x2e0   :  { %2203 = vmatprep.subr.bf16.mxu0 %v2374_v1 }
 0x2e3   :  { %2204 = vmatpush3.bf16.msra.mxu0 %v2236_v30 }
 0x2e4   :  { %2205 = vmatprep.subr.bf16.mxu0 %v2374_v1 }
 0x2e7   :  { %2206 = vmatpush3.bf16.msra.mxu0 %v2237_v57 }
 0x397   :  { %v1736_v62 = vpop.f32.mrf.mxu1 }
 0x398   :  { %v1737_v13 = vadd.f32 %v2350_v63, %v1736_v62 }
 0x399   :  { %v2181_v16 = vpop.f32.mrf.mxu1 }
 0x39a   :  { %v1745_v22 = vsel %vm77_vm1, %v1737_v13, 0.0 }
 0x39b   :  { %1746 = vadd.xlane.f32.xlu0 %v1745_v22  ;;  %v1739_v49 = vpop.f32.mrf.mxu1 }
 0x39c   :  { %v1740_v26 = vadd.f32 %v2351_v23, %v1739_v49 }
 0x39d   :  { %v2182_v34 = vpop.f32.mrf.mxu1 }
 0x39e   :  { %v1748_v20 = vsel %vm77_vm1, %v1740_v26, 0.0 }
 0x39f   :  { %1749 = vadd.xlane.f32.xlu1 %v1748_v20 }
 0x424   :  { %v1747_v21 = vpop.xlane.xlu0 %1746 }
 0x425   :  { %v1752_v25 = vmul.f32 0.03125, %v1747_v21 }
 0x427   :  { %v1754_v54 = vsub.f32 %v1737_v13, %v1752_v25 }
 0x428   :  { %v1750_v35 = vpop.xlane.xlu1 %1749 }
 0x429   :  { %v1753_v37 = vmul.f32 0.03125, %v1750_v35  ;;  %v1756_v39 = vmul.f32 %v1754_v54, %v1754_v54 }
 0x42b   :  { %v1755_v3 = vsub.f32 %v1740_v26, %v1753_v37  ;;  %v1758_v40 = vsel %vm77_vm1, %v1756_v39, 0.0 }
 0x42c   :  { %1759 = vadd.xlane.f32.xlu0 %v1758_v40 }
 0x42d   :  { %v1757_v42 = vmul.f32 %v1755_v3, %v1755_v3 }
 0x42f   :  { %v1761_v59 = vsel %vm77_vm1, %v1757_v42, 0.0 }
 0x430   :  { %1762 = vadd.xlane.f32.xlu0 %v1761_v59 }
 0x4b5   :  { %v1760_v43 = vpop.xlane.xlu0 %1759 }
 0x4b6   :  { %v1764_v9 = vmul.f32 0.03125, %v1760_v43 }
 0x4b8   :  { %v1766_v44 = vadd.f32 1e-12, %v1764_v9 }
 0x4b9   :  { %v1763_v27 = vpop.xlane.xlu0 %1762 }
 0x4ba   :  { %2334 = vrsqrt.f32 %v1766_v44  ;;  %v1765_v45 = vmul.f32 0.03125, %v1763_v27 }
 0x4bc   :  { %v1767_v46 = vadd.f32 1e-12, %v1765_v45 }
 0x4be   :  { %2336 = vrsqrt.f32 %v1767_v46 }
 0x4c7   :  { %v2335_v31 = vpop.eup %2334 }
 0x4c8   :  { %v1770_v19 = vmul.f32 %v2335_v31, %v1754_v54 }
 0x4ca   :  { %v1778_v50 = vmul.f32 %v2109_v18, %v1770_v19 }
 0x4cb   :  { %v2337_v48 = vpop.eup %2336 }
 0x4cc   :  { %v1771_v36 = vmul.f32 %v2337_v48, %v1755_v3  ;;  %v3033_v38 = vadd.f32 %v2110_v29, %v1778_v50 }
 0x4ce   :  { %v1779_v51 = vmul.f32 %v2109_v18, %v1771_v36 }
 0x4d0   :  { %v3035_v47 = vadd.f32 %v2110_v29, %v1779_v51 }
 0x4d2   :  { %v1788_v28 = vpack.c.bf16 %v3035_v47, %v3033_v38 }
 0x4d4   :  { %2188 = vmatmul.mubr.msk.bf16.vlgmr.msra.gmra.mxu1 %vm77_vm1, %v1788_v28 }
 0x594   :  { %v1849_v56 = vpop.f32.mrf.mxu1 }
 0x595   :  { %v1850_v41 = vadd.f32 %v2111_v58, %v1849_v56 }
 0x596   :  { %v2189_v32 = vpop.f32.mrf.mxu1 }
 0x597   :  { %v1858_v60 = vmul.f32 0.70710677, %v1850_v41  ;;  %v1856_v51 = vmul.f32 0.5, %v1850_v41 }
 0x598   :  { %v1852_v12 = vpop.f32.mrf.mxu1 }
 0x599   :  { %v1860_v11 = vand.u32 2147483647, %v1858_v60  ;;  %v1853_v0 = vadd.f32 %v2111_v58, %v1852_v12  ;;  %vm1900_vm0 = vcmp.ge.f32.partialorder %v1858_v60, 0.0 }
 0x59a   :  { %v2190_v2 = vpop.f32.mrf.mxu1 }
 0x59b   :  { %v1862_v6 = vmul.f32 0.3275911, %v1860_v11  ;;  %v1859_v7 = vmul.f32 0.70710677, %v1853_v0  ;;  %v1888_v10 = vsub.f32 0.0, %v1860_v11  ;;  %v1857_v28 = vmul.f32 0.5, %v1853_v0 }
 0x59d   :  { %v1864_v8 = vadd.f32 1.0, %v1862_v6  ;;  %v1861_v24 = vand.u32 2147483647, %v1859_v7  ;;  %v1890_v61 = vmul.f32 %v1888_v10, %v1860_v11  ;;  %vm1901_vm3 = vcmp.ge.f32.partialorder %v1859_v7, 0.0 }
 0x59f   :  { %2338 = vrcp.f32 %v1864_v8  ;;  %v1863_v4 = vmul.f32 0.3275911, %v1861_v24  ;;  %v1889_v62 = vsub.f32 0.0, %v1861_v24  ;;  %v1892_v16 = vmul.f32 1.442695, %v1890_v61 }
 0x5a1   :  { %v1865_v1 = vadd.f32 1.0, %v1863_v4  ;;  %v1891_v22 = vmul.f32 %v1889_v62, %v1861_v24 }
 0x5a3   :  { %2340 = vrcp.f32 %v1865_v1  ;;  %v1894_v20 = vmul.f32 1.442695, %v1891_v22 }
 0x5a4   :  { %2342 = vpow2.f32 %v1892_v16 }
 0x5a5   :  { %2344 = vpow2.f32 %v1894_v20 }
 0x5ac   :  { %v2339_v63 = vpop.eup %2338 }
 0x5ad   :  { %v1870_v13 = vmul.f32 1.0614054, %v2339_v63 }
 0x5af   :  { %v1872_v49 = vadd.f32 -1.4531521, %v1870_v13 }
 0x5b0   :  { %v2341_v23 = vpop.eup %2340 }
 0x5b1   :  { %v1874_v26 = vmul.f32 %v2339_v63, %v1872_v49  ;;  %v1871_v34 = vmul.f32 1.0614054, %v2341_v23  ;;  %v2343_v43 = vpop.eup %2342  ;;  %v2124_v49 = vld [vmem:[%s3109_s15] ss:$0 sm:$0xff] }
 0x5b2   :  { %v2345_v46 = vpop.eup %2344 }
 0x5b3   :  { %v1876_v21 = vadd.f32 1.4214138, %v1874_v26  ;;  %v1873_v25 = vadd.f32 -1.4531521, %v1871_v34  ;;  %v2125_v26 = vld [vmem:[%s3110_s16] ss:$0 sm:$0xff] }
 0x5b5   :  { %v1878_v54 = vmul.f32 %v2339_v63, %v1876_v21  ;;  %v1875_v35 = vmul.f32 %v2341_v23, %v1873_v25 }
 0x5b7   :  { %v1880_v37 = vadd.f32 -0.28449672, %v1878_v54  ;;  %v1877_v39 = vadd.f32 1.4214138, %v1875_v35 }
 0x5b9   :  { %v1882_v3 = vmul.f32 %v2339_v63, %v1880_v37  ;;  %v1879_v40 = vmul.f32 %v2341_v23, %v1877_v39 }
 0x5bb   :  { %v1884_v42 = vadd.f32 0.2548296, %v1882_v3  ;;  %v1881_v59 = vadd.f32 -0.28449672, %v1879_v40 }
 0x5bd   :  { %v1886_v33 = vmul.f32 %v2339_v63, %v1884_v42  ;;  %v1883_v15 = vmul.f32 %v2341_v23, %v1881_v59 }
 0x5bf   :  { %v1896_v9 = vmul.f32 %v2343_v43, %v1886_v33  ;;  %v1885_v44 = vadd.f32 0.2548296, %v1883_v15 }
 0x5c1   :  { %v1898_v27 = vsub.f32 1.0, %v1896_v9  ;;  %v1887_v45 = vmul.f32 %v2341_v23, %v1885_v44 }
 0x5c3   :  { %v1902_v31 = vsub.f32 0.0, %v1898_v27  ;;  %v1897_v19 = vmul.f32 %v2345_v46, %v1887_v45 }
 0x5c5   :  { %v1904_v18 = vsel %vm1900_vm0, %v1898_v27, %v1902_v31  ;;  %v1899_v48 = vsub.f32 1.0, %v1897_v19 }
 0x5c6   :  { %v1906_v50 = vadd.f32 1.0, %v1904_v18 }
 0x5c7   :  { %v1903_v36 = vsub.f32 0.0, %v1899_v48 }
 0x5c8   :  { %v1908_v14 = vmul.f32 %v1906_v50, %v1856_v51 }
 0x5c9   :  { %v1905_v29 = vsel %vm1901_vm3, %v1899_v48, %v1903_v36 }
 0x5ca   :  { %v1907_v52 = vadd.f32 1.0, %v1905_v29 }
 0x5cc   :  { %v1909_v53 = vmul.f32 %v1907_v52, %v1857_v28 }
 0x5ce   :  { %v1910_v5 = vpack.c.bf16 %v1909_v53, %v1908_v14 }
 0x5d0   :  { %2208 = vmatmul.mubr.bf16.vlgmr.msra.gmra.mxu0 %v1910_v5 }
 0x690   :  { %v2016_v17 = vpop.f32.mrf.mxu0 }
 0x691   :  { %v2017_v30 = vadd.f32 %v2115_v55, %v2016_v17 }
 0x692   :  { %v2209_v57 = vpop.f32.mrf.mxu0 }
 0x693   :  { %v2023_v58 = vadd.f32 %v2017_v30, %v3033_v38 }
 0x694   :  { %v2019_v56 = vpop.f32.mrf.mxu0 }
 0x695   :  { %v2020_v32 = vadd.f32 %v2115_v55, %v2019_v56  ;;  %v2027_v60 = vsel %vm77_vm1, %v2023_v58, 0.0 }
 0x696   :  { %2028 = vadd.xlane.f32.xlu1 %v2027_v60  ;;  %v2210_v41 = vpop.f32.mrf.mxu0 }
 0x697   :  { %v2024_v12 = vadd.f32 %v2020_v32, %v3035_v47 }
 0x699   :  { %v2030_v11 = vsel %vm77_vm1, %v2024_v12, 0.0 }
 0x69a   :  { %2031 = vadd.xlane.f32.xlu0 %v2030_v11 }
 0x71f   :  { %v2029_v0 = vpop.xlane.xlu1 %2028 }
 0x720   :  { %v2033_v2 = vmul.f32 0.03125, %v2029_v0 }
 0x722   :  { %v2035_v6 = vsub.f32 %v2023_v58, %v2033_v2 }
 0x723   :  { %v2032_v7 = vpop.xlane.xlu0 %2031 }
 0x724   :  { %v2034_v8 = vmul.f32 0.03125, %v2032_v7  ;;  %v2037_v24 = vmul.f32 %v2035_v6, %v2035_v6 }
 0x726   :  { %v2036_v4 = vsub.f32 %v2024_v12, %v2034_v8  ;;  %v2039_v38 = vsel %vm77_vm1, %v2037_v24, 0.0 }
 0x727   :  { %2040 = vadd.xlane.f32.xlu1 %v2039_v38 }
 0x728   :  { %v2038_v1 = vmul.f32 %v2036_v4, %v2036_v4 }
 0x72a   :  { %v2042_v10 = vsel %vm77_vm1, %v2038_v1, 0.0 }
 0x72b   :  { %2043 = vadd.xlane.f32.xlu0 %v2042_v10 }
 0x7b0   :  { %v2041_v61 = vpop.xlane.xlu1 %2040 }
 0x7b1   :  { %v2045_v62 = vmul.f32 0.03125, %v2041_v61 }
 0x7b3   :  { %v2047_v47 = vadd.f32 1e-12, %v2045_v62 }
 0x7b4   :  { %v2044_v63 = vpop.xlane.xlu0 %2043 }
 0x7b5   :  { %2346 = vrsqrt.f32 %v2047_v47  ;;  %v2046_v13 = vmul.f32 0.03125, %v2044_v63 }
 0x7b7   :  { %v2048_v16 = vadd.f32 1e-12, %v2046_v13 }
 0x7b9   :  { %2348 = vrsqrt.f32 %v2048_v16 }
 0x7c2   :  { %v2347_v22 = vpop.eup %2346 }
 0x7c3   :  { %v2051_v23 = vmul.f32 %v2347_v22, %v2035_v6 }
 0x7c5   :  { %v2059_v34 = vmul.f32 %v2124_v49, %v2051_v23 }
 0x7c6   :  { %v2349_v20 = vpop.eup %2348 }
 0x7c7   :  { %v2052_v21 = vmul.f32 %v2349_v20, %v2036_v4  ;;  %v2067_v25 = vadd.f32 %v2125_v26, %v2059_v34 }
 0x7c9   :  { %v2060_v54 = vmul.f32 %v2124_v49, %v2052_v21  ;;  %2069 = vst.msk [vmem:[#allocation6] sm:$0xff] %vm77_vm1, %v2067_v25 }
 0x7cb   :  { %v2068_v35 = vadd.f32 %v2125_v26, %v2060_v54 }
 0x7cd   :  { %2070 = vst.msk [vmem:[#allocation6 + $0x8] sm:$0xff] %vm77_vm1, %v2068_v35 }
 0x7ce   :  { %2363 = shalt.err (!%p2360_p4)
}
 0x7cf   :  { %s2379_s15 = smov 128   ;;  %s2380_s16 = smov 8  }
 0x7d0   :  { %2082 = dma.vmem_to_hbm [thread:$0]  %s2077_s18, 256, %s3111_s17, [#allocation7], %s2379_s15, %s2379_s15, %s2380_s16  }
 0x7d1   :  { %2372 = dma.done.wait [#allocation7], 256  }
 0x7d2   :  { %2373 = vsyncadd [#allocation7], 4294967040 }
 0x7d3   :  { %2086 = vsyncpa [#allocation7], 1 }

// kernel: tpu_custom_call.1
= control target key start
LH: loop header
LB: loop body
LE: loop exit
PB: predicated region body
PF: predicated region fallthrough
CT: control target
= control target key end

     0   :  { %s3094_s0 = inlined_call_operand.vmem [shape: f32[2,8,32], index: 0, kind: input, shape index: {}]   ;;  %s3095_s1 = inlined_call_operand.vmem [shape: bf16[32,128], index: 1, kind: input, shape index: {}]   ;;  %s3096_s2 = inlined_call_operand.vmem [shape: f32[4,64], index: 2, kind: input, shape index: {}]   ;;  %s3097_s3 = inlined_call_operand.vmem [shape: f32[1,64], index: 3, kind: input, shape index: {}]   ;;  %s3098_s4 = inlined_call_operand.vmem [shape: bf16[64,96], index: 4, kind: input, shape index: {}]   ;;  %s3099_s5 = inlined_call_operand.vmem [shape: f32[1,64], index: 5, kind: input, shape index: {}]   ;;  %s3100_s6 = inlined_call_operand.vmem [shape: f32[16,64], index: 6, kind: input, shape index: {}]   ;;  %s3101_s7 = inlined_call_operand.vmem [shape: f32[1,64], index: 7, kind: input, shape index: {}]   ;;  %s3102_s8 = inlined_call_operand.vmem [shape: bf16[64,32], index: 8, kind: input, shape index: {}]   ;;  %s3103_s9 = inlined_call_operand.vmem [shape: f32[1,32], index: 9, kind: input, shape index: {}]   ;;  %s3104_s10 = inlined_call_operand.vmem [shape: f32[1,32], index: 10, kind: input, shape index: {}]   ;;  %s3105_s11 = inlined_call_operand.vmem [shape: bf16[32,128], index: 11, kind: input, shape index: {}]   ;;  %s3106_s12 = inlined_call_operand.vmem [shape: f32[1,128], index: 12, kind: input, shape index: {}]   ;;  %s3107_s13 = inlined_call_operand.vmem [shape: bf16[128,32], index: 13, kind: input, shape index: {}]   ;;  %s3108_s14 = inlined_call_operand.vmem [shape: f32[1,32], index: 14, kind: input, shape index: {}]   ;;  %s3109_s15 = inlined_call_operand.vmem [shape: f32[1,32], index: 15, kind: input, shape index: {}]   ;;  %s3110_s16 = inlined_call_operand.vmem [shape: f32[1,32], index: 16, kind: input, shape index: {}]   ;;  %s3111_s17 = inlined_call_operand.hbm [shape: f32[2,8,32], index: 17, kind: output, shape index: {}]  }
   0x1   :  { %3114 = sst [smem:[#allocation9_spill]] %s3094_s0 }
   0x2   :  { %3115 = sst [smem:[#allocation10_spill]] %s3095_s1 }
   0x3   :  { %s3116_s26 = sld [smem:[#allocation10_spill]]  ;;  %v2374_v1 = vmov 0.0   ;;  %vm2375_vm0 = vmmov 0   ;;  %vm77_vm1 = vcmask 261120  }
   0x4   :  { %2151 = vmatprep.subr.bf16.mxu0 %v2374_v1  ;;  %2159 = vmatprep.subr.bf16.mxu1 %v2374_v1  ;;  %s3117_s30 = sld [smem:[#allocation9_spill]] }
   0x5   :  { %2155 = vmatprep.mubr.msk.bf16.mxu0 %vm2375_vm0, %v2374_v1  ;;  %2167 = vmatprep.mubr.msk.bf16.mxu1 %vm2375_vm0, %v2374_v1 }
   0x9   :  { %v2218_v0 = vld [vmem:[%s3116_s26 + $0x8] sm:$0xff]   ;;  %v2219_v2 = vld [vmem:[%s3116_s26] sm:$0xff]  }
   0xa   :  { %2152 = vmatpush3.bf16.msra.mxu0 %v2218_v0  ;;  %v58_v3 = vld [vmem:[%s3117_s30] sm:$0xff]  ;;  %v59_v4 = vld [vmem:[%s3117_s30 + $0x8] sm:$0xff] }
   0xb   :  { %2153 = vmatprep.subr.bf16.mxu0 %v2374_v1  ;;  %v60_v5 = vpack.c.bf16 %v59_v4, %v58_v3 }
   0xe   :  { %2154 = vmatpush3.bf16.msra.mxu0 %v2219_v2 }
   0xf   :  { %2191 = vmatprep.subr.bf16.mxu0 %v2374_v1 }
  0x11   :  { %2156 = vmatmul.mubr.msk.bf16.vlgmr.msra.gmra.mxu0 %vm77_vm1, %v60_v5 }
  0x12   :  { %2207 = vmatprep.mubr.msk.bf16.mxu0 %vm2375_vm0, %v2374_v1 }
  0x13   :  { %22 = vsyncpa [#allocation7], 0  ;;  %v2220_v6 = vld [vmem:[%s3098_s4 + $0x18] sm:$0xff]   ;;  %v2221_v7 = vld [vmem:[%s3098_s4 + $0x10] sm:$0xff]   ;;  %v123_v10 = vlaneseq  ;;  %vm232_vm5 = vcmask 523264   ;;  %vm1600_vm10 = vcmask 1041409  }
  0x14   :  { %2160 = vmatpush3.bf16.msra.mxu1 %v2220_v6  ;;  %v2222_v8 = vld [vmem:[%s3098_s4 + $0x8] sm:$0xff]   ;;  %v2223_v9 = vld [vmem:[%s3098_s4] sm:$0xff]   ;;  %vm1602_vm11 = vcmask 1042434   ;;  %vm1604_vm12 = vcmask 1043459   ;;  %vm1606_vm13 = vcmask 1044484   ;;  %vm1608_vm14 = vcmask 1045509  }
  0x15   :  { %2161 = vmatprep.subr.bf16.mxu1 %v2374_v1  ;;  %v2510_v11 = vshrl.u32 %v123_v10, 7  ;;  %v122_v13 = vld [vmem:[%s3096_s2] sm:$0xf]  ;;  %vm1610_vm15 = vcmask 1046534   ;;  %s2378_s0 = smov [#allocation6]  }
  0x16   :  { %v2090_v45 = vld [vmem:[%s3097_s3] ss:$0 sm:$0xff]  ;;  %s2076_s18 = sshll.u32 %s2378_s0, 4  ;;  %s2077_s18 = int_to_ptr.vmem [resolvable:$true] %s2076_s18 }
  0x17   :  { %v2513_v12 = vsub.s32 3, %v2510_v11  ;;  %v2519_v14 = vsub.s32 2, %v2510_v11  ;;  %v2522_v15 = vsub.s32 1, %v2510_v11  ;;  %vm131_vm2 = vcmp.ge.s32.totalorder %v2510_v11, 1  ;;  %v2098_v2 = vld [vmem:[%s3099_s5] ss:$0 sm:$0xff]  ;;  %p2357_p1 = scmp.lt.s32.totalorder %s2077_s18, %s2077_s18 }
  0x18   :  { %2162 = vmatpush3.bf16.msra.mxu1 %v2221_v7  ;;  %vm142_vm3 = vcmp.ge.s32.totalorder %v2510_v11, 2  ;;  %v2531_v19 = vsub.s32 0, %v2510_v11  ;;  %vm153_vm4 = vcmp.ge.s32.totalorder %v2510_v11, 3  ;;  %v528_v10 = vsub.s32 4, %v2510_v11 }
  0x19   :  { %2163 = vmatprep.subr.bf16.mxu1 %v2374_v1  ;;  %v128_v16 = vrot.slane %v122_v13, %v2513_v12  ;;  %v138_v18 = vrot.slane %v122_v13, %v2519_v14  ;;  %v149_v23 = vrot.slane %v122_v13, %v2522_v15 }
  0x1a   :  { %v160_v29 = vrot.slane %v122_v13, %v2531_v19  ;;  %v540_v13 = vsub.s32 5, %v2510_v11 }
  0x1c   :  { %2164 = vmatpush3.bf16.msra.mxu1 %v2222_v8 }
  0x1d   :  { %2165 = vmatprep.subr.bf16.mxu1 %v2374_v1 }
  0x20   :  { %2166 = vmatpush3.bf16.msra.mxu1 %v2223_v9 }
  0x21   :  { %2171 = vmatprep.subr.bf16.mxu1 %v2374_v1 }
  0xd1   :  { %v2525_v17 = vpop.f32.mrf.mxu0 }
  0xd2   :  { %v130_v20 = vrot.slane %v2525_v17, 7  ;;  %v141_v21 = vrot.slane %v2525_v17, 6  ;;  %v152_v22 = vrot.slane %v2525_v17, 5  ;;  %v129_v27 = vmul.f32 %v128_v16, %v2525_v17 }
  0xd3   :  { %v2157_v24 = vpop.f32.mrf.mxu0 }
  0xd4   :  { %v134_v25 = vsel %vm131_vm2, %v130_v20, 0.0  ;;  %v145_v26 = vsel %vm142_vm3, %v141_v21, 0.0  ;;  %v156_v31 = vsel %vm153_vm4, %v152_v22, 0.0  ;;  %v552_v21 = vsub.s32 6, %v2510_v11 }
  0xd5   :  { %v139_v28 = vmul.f32 %v138_v18, %v134_v25  ;;  %v2544_v30 = vpop.f32.mrf.mxu0  ;;  %v150_v36 = vmul.f32 %v149_v23, %v145_v26  ;;  %v161_v41 = vmul.f32 %v160_v29, %v156_v31 }
  0xd6   :  { %v164_v32 = vrot.slane %v2544_v30, 7  ;;  %v168_v33 = vrot.slane %v2544_v30, 6  ;;  %v172_v34 = vrot.slane %v2544_v30, 5  ;;  %v163_v42 = vmul.f32 %v128_v16, %v2544_v30 }
  0xd7   :  { %v140_v35 = vadd.f32 %v139_v28, %v129_v27  ;;  %v2158_v37 = vpop.f32.mrf.mxu0 }
  0xd8   :  { %v165_v38 = vsel %vm131_vm2, %v164_v32, 0.0  ;;  %v169_v39 = vsel %vm142_vm3, %v168_v33, 0.0  ;;  %v173_v44 = vsel %vm153_vm4, %v172_v34, 0.0  ;;  %vm1612_vm2 = vcmask 1047559  }
  0xd9   :  { %v151_v40 = vadd.f32 %v150_v36, %v140_v35  ;;  %v166_v43 = vmul.f32 %v165_v38, %v138_v18  ;;  %v170_v47 = vmul.f32 %v169_v39, %v149_v23  ;;  %v174_v50 = vmul.f32 %v173_v44, %v160_v29  ;;  %v314_v39 = vld [vmem:[%s3100_s6] sm:$0xff] }
  0xda   :  { %v564_v23 = vsub.s32 7, %v2510_v11  ;;  %v316_v44 = vmul.f32 1.442695, %v314_v39 }
  0xdb   :  { %v167_v46 = vadd.f32 %v166_v43, %v163_v42  ;;  %v162_v48 = vadd.f32 %v161_v41, %v151_v40  ;;  %v315_v42 = vld [vmem:[%s3100_s6 + $0x8] sm:$0xff]  ;;  %s2377_s6 = smov 64  }
  0xdd   :  { %v171_v49 = vadd.f32 %v170_v47, %v167_v46  ;;  %v183_v51 = vadd.f32 %v2090_v45, %v162_v48  ;;  %v2376_v46 = vmov 1966171168  }
  0xde   :  { %v327_v47 = vunpack.c.l.s4 %v2376_v46 }
  0xdf   :  { %v175_v52 = vadd.f32 %v174_v50, %v171_v49  ;;  %v2091_v53 = vmul.f32 -1.442695, %v183_v51 }
  0xe0   :  { %v328_v49 = vunpack.c.0.s8 %v327_v47 }
  0xe1   :  { %v184_v54 = vadd.f32 %v2090_v45, %v175_v52  ;;  %2238 = vpow2.f32 %v2091_v53  ;;  %v318_v45 = vmul.f32 1.442695, %v315_v42 }
  0xe3   :  { %v2092_v55 = vmul.f32 -1.442695, %v184_v54 }
  0xe5   :  { %2240 = vpow2.f32 %v2092_v55 }
  0xee   :  { %v2239_v56 = vpop.eup %2238 }
  0xef   :  { %v191_v57 = vadd.f32 1.0, %v2239_v56 }
  0xf1   :  { %2242 = vrcp.f32 %v191_v57 }
  0xf2   :  { %v2241_v58 = vpop.eup %2240 }
  0xf3   :  { %v192_v59 = vadd.f32 1.0, %v2241_v58 }
  0xf5   :  { %2244 = vrcp.f32 %v192_v59 }
  0xfe   :  { %v2243_v60 = vpop.eup %2242 }
  0xff   :  { %v2561_v62 = vmul.f32 %v2243_v60, %v183_v51 }
 0x102   :  { %v2245_v61 = vpop.eup %2244 }
 0x103   :  { %v2563_v63 = vmul.f32 %v2245_v61, %v184_v54  ;;  %v2645_v54 = vsub.s32 %v328_v49, %v2510_v11 }
 0x105   :  { %v199_v0 = vpack.c.bf16 %v2563_v63, %v2561_v62 }
 0x107   :  { %2168 = vmatmul.mubr.msk.bf16.vlgmr.msra.gmra.mxu1 %vm232_vm5, %v199_v0 }
 0x108   :  { %2179 = vmatprep.mubr.msk.bf16.mxu1 %vm2375_vm0, %v2374_v1 }
 0x1c7   :  { %v270_v3 = vpop.f32.mrf.mxu1 }
 0x1c8   :  { %v2573_v4 = vadd.f32 %v2098_v2, %v270_v3  ;;  %v2576_v5 = vrot.slane %v270_v3, %v2522_v15  ;;  %v2579_v6 = vrot.slane %v270_v3, %v2531_v19  ;;  %v2592_v20 = vrot.slane %v270_v3, %v2519_v14 }
 0x1c9   :  { %v2169_v7 = vpop.f32.mrf.mxu1  ;;  %v2612_v31 = vrot.slane %v270_v3, %v2513_v12  ;;  %v2616_v32 = vrot.slane %v270_v3, %v528_v10  ;;  %v2620_v33 = vrot.slane %v270_v3, %v540_v13  ;;  %v2624_v36 = vrot.slane %v270_v3, %v552_v21 }
 0x1ca   :  { %v286_v8 = vmin.f32 %v2573_v4, 20.0  ;;  %500 = vbcast.lane.b32.xlu1 %v2576_v5, 328  ;;  %484 = vbcast.lane.b32.xlu0 %v2579_v6, 320  ;;  %v2631_v41 = vrot.slane %v270_v3, %v564_v23  ;;  %vm310_vm7 = vcmp.gt.f32.partialorder %v2573_v4, 20.0 }
 0x1cb   :  { %v2584_v9 = vpop.f32.mrf.mxu1 }
 0x1cc   :  { %v288_v16 = vmul.f32 1.442695, %v286_v8  ;;  %v2589_v18 = vadd.f32 %v2098_v2, %v2584_v9  ;;  %v2597_v24 = vrot.slane %v2584_v9, %v528_v10  ;;  %v2600_v25 = vrot.slane %v2584_v9, %v540_v13 }
 0x1cd   :  { %v2170_v22 = vpop.f32.mrf.mxu1  ;;  %v2606_v27 = vrot.slane %v2584_v9, %v552_v21  ;;  %v2609_v28 = vrot.slane %v2584_v9, %v564_v23 }
 0x1ce   :  { %2246 = vpow2.f32 %v288_v16  ;;  %v287_v26 = vmin.f32 %v2589_v18, 20.0  ;;  %512 = vbcast.lane.b32.xlu1 %v2592_v20, 328  ;;  %488 = vbcast.lane.b32.xlu0 %v2579_v6, 328  ;;  %vm311_vm9 = vcmp.gt.f32.partialorder %v2589_v18, 20.0 }
 0x1d0   :  { %v290_v29 = vmul.f32 1.442695, %v287_v26 }
 0x1d2   :  { %2248 = vpow2.f32 %v290_v29  ;;  %524 = vbcast.lane.b32.xlu1 %v2612_v31, 328  ;;  %496 = vbcast.lane.b32.xlu0 %v2576_v5, 320 }
 0x1d6   :  { %536 = vbcast.lane.b32.xlu1 %v2616_v32, 328  ;;  %508 = vbcast.lane.b32.xlu0 %v2592_v20, 320 }
 0x1da   :  { %548 = vbcast.lane.b32.xlu1 %v2620_v33, 328  ;;  %520 = vbcast.lane.b32.xlu0 %v2612_v31, 320 }
 0x1db   :  { %v2247_v34 = vpop.eup %2246 }
 0x1dc   :  { %v292_v35 = vadd.f32 1.0, %v2247_v34 }
 0x1de   :  { %2250 = vlog2.f32 %v292_v35  ;;  %v2099_v37 = vadd.f32 -1.0, %v292_v35  ;;  %560 = vbcast.lane.b32.xlu1 %v2624_v36, 328  ;;  %532 = vbcast.lane.b32.xlu0 %v2616_v32, 320  ;;  %vm294_vm6 = vcmp.eq.f32.partialorder %v292_v35, 1.0 }
 0x1df   :  { %v2249_v38 = vpop.eup %2248 }
 0x1e0   :  { %2252 = vrcp.f32 %v2099_v37  ;;  %v293_v40 = vadd.f32 1.0, %v2249_v38 }
 0x1e2   :  { %v2100_v43 = vadd.f32 -1.0, %v293_v40  ;;  %572 = vbcast.lane.b32.xlu1 %v2631_v41, 328  ;;  %544 = vbcast.lane.b32.xlu0 %v2620_v33, 320  ;;  %2254 = vlog2.f32 %v293_v40  ;;  %vm295_vm8 = vcmp.eq.f32.partialorder %v293_v40, 1.0 }
 0x1e4   :  { %2256 = vrcp.f32 %v2100_v43 }
 0x1e5   :  { %2258 = vpow2.f32 %v316_v44 }
 0x1e6   :  { %1262 = vbcast.lane.b32.xlu1 %v2579_v6, 344  ;;  %556 = vbcast.lane.b32.xlu0 %v2624_v36, 320  ;;  %2260 = vpow2.f32 %v318_v45 }
 0x1ea   :  { %1270 = vbcast.lane.b32.xlu1 %v2576_v5, 344  ;;  %568 = vbcast.lane.b32.xlu0 %v2631_v41, 320 }
 0x1eb   :  { %v2251_v48 = vpop.eup %2250 }
 0x1ec   :  { %v297_v51 = vmul.f32 0.6931472, %v2251_v48  ;;  %v2692_v48 = vrot.slane %v2584_v9, %v2531_v19 }
 0x1ed   :  { %v2253_v50 = vpop.eup %2252 }
 0x1ee   :  { %v303_v52 = vmul.f32 %v2253_v50, %v2247_v34  ;;  %1278 = vbcast.lane.b32.xlu1 %v2592_v20, 344  ;;  %1258 = vbcast.lane.b32.xlu0 %v2579_v6, 336 }
 0x1ef   :  { %v2255_v53 = vpop.eup %2254 }
 0x1f0   :  { %v306_v55 = vmul.f32 %v303_v52, %v297_v51  ;;  %v299_v60 = vmul.f32 0.6931472, %v2255_v53 }
 0x1f1   :  { %v2257_v56 = vpop.eup %2256 }
 0x1f2   :  { %v308_v57 = vsel %vm294_vm6, %v2247_v34, %v306_v55  ;;  %v305_v58 = vmul.f32 %v2257_v56, %v2249_v38  ;;  %1286 = vbcast.lane.b32.xlu1 %v2612_v31, 344  ;;  %1266 = vbcast.lane.b32.xlu0 %v2576_v5, 336  ;;  %v2259_v61 = vpop.eup %2258 }
 0x1f3   :  { %v2651_v59 = vsel %vm310_vm7, %v2573_v4, %v308_v57  ;;  %v2261_v3 = vpop.eup %2260  ;;  %v2660_v5 = vsub.f32 0.0, %v2259_v61 }
 0x1f4   :  { %v325_v11 = vcombine.high %v2651_v59, %v2651_v59  ;;  %v332_v0 = vrot.slane %v2651_v59, %v2645_v54  ;;  %v307_v2 = vmul.f32 %v305_v58, %v299_v60  ;;  %v2665_v21 = vsub.f32 0.0, %v2261_v3 }
 0x1f6   :  { %v339_v6 = vrot.slane %v325_v11, %v2645_v54  ;;  %v340_v7 = vcombine.high %v332_v0, %v332_v0  ;;  %v348_v8 = vrot.slane %v332_v0, %v2645_v54  ;;  %1294 = vbcast.lane.b32.xlu1 %v2616_v32, 344  ;;  %1274 = vbcast.lane.b32.xlu0 %v2592_v20, 336 }
 0x1f7   :  { %v309_v23 = vsel %vm295_vm8, %v2249_v38, %v307_v2 }
 0x1f8   :  { %v341_v4 = vcombine.high %v339_v6, %v339_v6  ;;  %v355_v10 = vrot.slane %v339_v6, %v2645_v54  ;;  %v362_v13 = vrot.slane %v340_v7, %v2645_v54  ;;  %v370_v16 = vcombine.high %v348_v8, %v348_v8 }
 0x1f9   :  { %v377_v22 = vrot.slane %v348_v8, %v2531_v19  ;;  %v2677_v38 = vsel %vm311_vm9, %v2589_v18, %v309_v23 }
 0x1fa   :  { %v369_v26 = vrot.slane %v341_v4, %v2645_v54  ;;  %v372_v29 = vcombine.high %v362_v13, %v362_v13  ;;  %v381_v34 = vrot.slane %v362_v13, %v2531_v19  ;;  %1302 = vbcast.lane.b32.xlu1 %v2620_v33, 344  ;;  %v385_v20 = vrot.slane %v370_v16, %v2531_v19 }
 0x1fb   :  { %1282 = vbcast.lane.b32.xlu0 %v2612_v31, 336  ;;  %v371_v35 = vcombine.high %v355_v10, %v355_v10  ;;  %v414_v39 = vmul.f32 %v377_v22, %v2660_v5  ;;  %v415_v40 = vmul.f32 %v377_v22, %v2665_v21  ;;  %v393_v45 = vrot.slane %v355_v10, %v2531_v19 }
 0x1fc   :  { %v389_v37 = vrot.slane %v372_v29, %v2531_v19  ;;  %v416_v42 = vmul.f32 %v381_v34, %v2660_v5  ;;  %v417_v43 = vmul.f32 %v381_v34, %v2665_v21  ;;  %v373_v44 = vcombine.high %v369_v26, %v369_v26 }
 0x1fd   :  { %v418_v46 = vmul.f32 %v385_v20, %v2660_v5  ;;  %v397_v31 = vrot.slane %v369_v26, %v2531_v19  ;;  %v419_v47 = vmul.f32 %v385_v20, %v2665_v21  ;;  %v697_v18 = vcombine.high %v2677_v38, %v2677_v38 }
 0x1fe   :  { %1310 = vbcast.lane.b32.xlu1 %v2624_v36, 344  ;;  %v401_v49 = vrot.slane %v371_v35, %v2531_v19  ;;  %v420_v50 = vmul.f32 %v389_v37, %v2660_v5  ;;  %v430_v51 = vmul.f32 1.442695, %v414_v39  ;;  %v704_v52 = vrot.slane %v2677_v38, %v2645_v54 }
 0x1ff   :  { %1290 = vbcast.lane.b32.xlu0 %v2616_v32, 336  ;;  %v421_v53 = vmul.f32 %v389_v37, %v2665_v21  ;;  %v432_v55 = vmul.f32 1.442695, %v415_v40  ;;  %v434_v56 = vmul.f32 1.442695, %v416_v42  ;;  %v405_v58 = vrot.slane %v373_v44, %v2531_v19 }
 0x200   :  { %v436_v57 = vmul.f32 1.442695, %v417_v43  ;;  %v422_v32 = vmul.f32 %v393_v45, %v2660_v5  ;;  %2262 = vpow2.f32 %v430_v51  ;;  %v438_v60 = vmul.f32 1.442695, %v418_v46 }
 0x201   :  { %v423_v61 = vmul.f32 %v393_v45, %v2665_v21  ;;  %v424_v11 = vmul.f32 %v397_v31, %v2660_v5  ;;  %2264 = vpow2.f32 %v432_v55  ;;  %v440_v0 = vmul.f32 1.442695, %v419_v47 }
 0x202   :  { %v425_v2 = vmul.f32 %v397_v31, %v2665_v21  ;;  %v426_v3 = vmul.f32 %v401_v49, %v2660_v5  ;;  %2266 = vpow2.f32 %v434_v56  ;;  %v442_v6 = vmul.f32 1.442695, %v420_v50  ;;  %1318 = vbcast.lane.b32.xlu1 %v2631_v41, 344 }
 0x203   :  { %v427_v7 = vmul.f32 %v401_v49, %v2665_v21  ;;  %2268 = vpow2.f32 %v436_v57  ;;  %v444_v8 = vmul.f32 1.442695, %v421_v53  ;;  %v711_v4 = vrot.slane %v697_v18, %v2645_v54  ;;  %1298 = vbcast.lane.b32.xlu0 %v2620_v33, 336 }
 0x204   :  { %2270 = vpow2.f32 %v438_v60  ;;  %v446_v10 = vmul.f32 1.442695, %v422_v32  ;;  %v712_v13 = vcombine.high %v704_v52, %v704_v52  ;;  %v720_v16 = vrot.slane %v704_v52, %v2645_v54 }
 0x205   :  { %v428_v22 = vmul.f32 %v405_v58, %v2660_v5  ;;  %v429_v23 = vmul.f32 %v405_v58, %v2665_v21  ;;  %2272 = vpow2.f32 %v440_v0  ;;  %v448_v26 = vmul.f32 1.442695, %v423_v61 }
 0x206   :  { %2274 = vpow2.f32 %v442_v6  ;;  %v450_v29 = vmul.f32 1.442695, %v424_v11  ;;  %v734_v34 = vrot.slane %v712_v13, %v2645_v54  ;;  %v742_v20 = vcombine.high %v720_v16, %v720_v16  ;;  %856 = vbcast.lane.b32.xlu1 %v2692_v48, 320 }
 0x207   :  { %2276 = vpow2.f32 %v444_v8  ;;  %v452_v35 = vmul.f32 1.442695, %v425_v2  ;;  %v454_v37 = vmul.f32 1.442695, %v426_v3  ;;  %v713_v39 = vcombine.high %v711_v4, %v711_v4  ;;  %1306 = vbcast.lane.b32.xlu0 %v2624_v36, 336 }
 0x208   :  { %2278 = vpow2.f32 %v446_v10  ;;  %v744_v40 = vcombine.high %v734_v34, %v734_v34  ;;  %v749_v42 = vrot.slane %v720_v16, %v2531_v19  ;;  %v753_v33 = vrot.slane %v734_v34, %v2531_v19 }
 0x209   :  { %2280 = vpow2.f32 %v448_v26  ;;  %v456_v43 = vmul.f32 1.442695, %v427_v7  ;;  %v727_v44 = vrot.slane %v711_v4, %v2645_v54  ;;  %v458_v45 = vmul.f32 1.442695, %v428_v22 }
 0x20a   :  { %2282 = vpow2.f32 %v450_v29  ;;  %v757_v46 = vrot.slane %v742_v20, %v2531_v19  ;;  %v460_v31 = vmul.f32 1.442695, %v429_v23  ;;  %v741_v47 = vrot.slane %v713_v39, %v2645_v54  ;;  %860 = vbcast.lane.b32.xlu1 %v2692_v48, 328 }
 0x20b   :  { %2284 = vpow2.f32 %v452_v35  ;;  %v761_v18 = vrot.slane %v744_v40, %v2531_v19  ;;  %v786_v49 = vmul.f32 %v749_v42, %v2660_v5  ;;  %v787_v36 = vmul.f32 %v749_v42, %v2665_v21  ;;  %1314 = vbcast.lane.b32.xlu0 %v2631_v41, 336 }
 0x20c   :  { %2286 = vpow2.f32 %v454_v37  ;;  %v788_v50 = vmul.f32 %v753_v33, %v2660_v5  ;;  %v743_v52 = vcombine.high %v727_v44, %v727_v44  ;;  %v789_v53 = vmul.f32 %v753_v33, %v2665_v21 }
 0x20d   :  { %v2263_v51 = vpop.eup %2262  ;;  %2288 = vpow2.f32 %v456_v43  ;;  %v765_v56 = vrot.slane %v727_v44, %v2531_v19  ;;  %v790_v57 = vmul.f32 %v757_v46, %v2660_v5  ;;  %v745_v41 = vcombine.high %v741_v47, %v741_v47 }
 0x20e   :  { %v2265_v55 = vpop.eup %2264  ;;  %2290 = vpow2.f32 %v458_v45  ;;  %462 = vst.msk [vmem:[#allocation2] sm:$0xff] %vm232_vm5, %v2263_v51  ;;  %v769_v32 = vrot.slane %v741_v47, %v2531_v19  ;;  %v791_v60 = vmul.f32 %v757_v46, %v2665_v21  ;;  %v792_v11 = vmul.f32 %v761_v18, %v2660_v5 }
 0x20f   :  { %v2267_v58 = vpop.eup %2266  ;;  %2292 = vpow2.f32 %v460_v31  ;;  %463 = vst.msk [vmem:[#allocation2 + $0x8] sm:$0xff] %vm232_vm5, %v2265_v55  ;;  %v802_v0 = vmul.f32 1.442695, %v786_v49  ;;  %v804_v2 = vmul.f32 1.442695, %v787_v36  ;;  %v773_v7 = vrot.slane %v743_v52, %v2531_v19 }
 0x210   :  { %v2269_v61 = vpop.eup %2268  ;;  %464 = vst.msk [vmem:[#allocation2 + $0x10] sm:$0xff] %vm232_vm5, %v2267_v58  ;;  %v806_v3 = vmul.f32 1.442695, %v788_v50  ;;  %v793_v8 = vmul.f32 %v761_v18, %v2665_v21  ;;  %v808_v4 = vmul.f32 1.442695, %v789_v53  ;;  %v794_v13 = vmul.f32 %v765_v56, %v2660_v5 }
 0x211   :  { %v2271_v6 = vpop.eup %2270  ;;  %465 = vst.msk [vmem:[#allocation2 + $0x18] sm:$0xff] %vm232_vm5, %v2269_v61  ;;  %2294 = vpow2.f32 %v802_v0  ;;  %v810_v16 = vmul.f32 1.442695, %v790_v57  ;;  %v795_v23 = vmul.f32 %v765_v56, %v2665_v21  ;;  %v812_v26 = vmul.f32 1.442695, %v791_v60 }
 0x212   :  { %v2273_v10 = vpop.eup %2272  ;;  %466 = vst.msk [vmem:[#allocation2 + $0x20] sm:$0xff] %vm232_vm5, %v2271_v6  ;;  %2296 = vpow2.f32 %v804_v2  ;;  %v2744_v29 = vrot.slane %v2584_v9, %v2522_v15  ;;  %v777_v20 = vrot.slane %v745_v41, %v2531_v19  ;;  %v796_v35 = vmul.f32 %v769_v32, %v2660_v5 }
 0x213   :  { %v2275_v22 = vpop.eup %2274  ;;  %467 = vst.msk [vmem:[#allocation2 + $0x28] sm:$0xff] %vm232_vm5, %v2273_v10  ;;  %2298 = vpow2.f32 %v806_v3  ;;  %v814_v37 = vmul.f32 1.442695, %v792_v11  ;;  %v797_v40 = vmul.f32 %v769_v32, %v2665_v21  ;;  %v798_v42 = vmul.f32 %v773_v7, %v2660_v5 }
 0x214   :  { %v2277_v34 = vpop.eup %2276  ;;  %468 = vst.msk [vmem:[#allocation2 + $0x30] sm:$0xff] %vm232_vm5, %v2275_v22  ;;  %2300 = vpow2.f32 %v808_v4  ;;  %v816_v33 = vmul.f32 1.442695, %v793_v8  ;;  %868 = vbcast.lane.b32.xlu0 %v2744_v29, 320  ;;  %872 = vbcast.lane.b32.xlu1 %v2744_v29, 328  ;;  %v799_v43 = vmul.f32 %v773_v7, %v2665_v21  ;;  %v323_v45 = vmul.f32 %v2677_v38, %v2563_v63 }
 0x215   :  { %v2279_v39 = vpop.eup %2278  ;;  %469 = vst.msk [vmem:[#allocation2 + $0x38] sm:$0xff] %vm232_vm5, %v2277_v34  ;;  %2302 = vpow2.f32 %v810_v16  ;;  %v818_v44 = vmul.f32 1.442695, %v794_v13  ;;  %v820_v31 = vmul.f32 1.442695, %v795_v23  ;;  %v2761_v47 = vrot.slane %v2584_v9, %v2519_v14 }
 0x216   :  { %v2281_v15 = vpop.eup %2280  ;;  %470 = vst.msk [vmem:[#allocation2 + $0x40] sm:$0xff] %vm232_vm5, %v2279_v39  ;;  %2304 = vpow2.f32 %v812_v26  ;;  %v800_v49 = vmul.f32 %v777_v20, %v2660_v5  ;;  %v822_v36 = vmul.f32 1.442695, %v796_v35  ;;  %v954_v50 = vrot.slane %v323_v45, %v2645_v54 }
 0x217   :  { %v2283_v46 = vpop.eup %2282  ;;  %471 = vst.msk [vmem:[#allocation2 + $0x48] sm:$0xff] %vm232_vm5, %v2281_v15  ;;  %2306 = vpow2.f32 %v814_v37  ;;  %v801_v38 = vmul.f32 %v777_v20, %v2665_v21  ;;  %v824_v52 = vmul.f32 1.442695, %v797_v40  ;;  %v947_v14 = vcombine.high %v323_v45, %v323_v45 }
 0x218   :  { %v2285_v18 = vpop.eup %2284  ;;  %472 = vst.msk [vmem:[#allocation2 + $0x50] sm:$0xff] %vm232_vm5, %v2283_v46  ;;  %2308 = vpow2.f32 %v816_v33  ;;  %880 = vbcast.lane.b32.xlu0 %v2761_v47, 320  ;;  %884 = vbcast.lane.b32.xlu1 %v2761_v47, 328  ;;  %v826_v5 = vmul.f32 1.442695, %v798_v42  ;;  %v2773_v56 = vrot.slane %v2584_v9, %v2513_v12  ;;  %v2777_v21 = vrot.slane %v954_v50, %v2645_v54 }
 0x219   :  { %v2287_v51 = vpop.eup %2286  ;;  %473 = vst.msk [vmem:[#allocation2 + $0x58] sm:$0xff] %vm232_vm5, %v2285_v18  ;;  %2310 = vpow2.f32 %v818_v44  ;;  %v828_v55 = vmul.f32 1.442695, %v799_v43  ;;  %v962_v58 = vcombine.high %v954_v50, %v954_v50  ;;  %v961_v41 = vrot.slane %v947_v14, %v2645_v54 }
 0x21a   :  { %v2289_v53 = vpop.eup %2288  ;;  %474 = vst.msk [vmem:[#allocation2 + $0x60] sm:$0xff] %vm232_vm5, %v2287_v51  ;;  %2312 = vpow2.f32 %v820_v31  ;;  %v830_v60 = vmul.f32 1.442695, %v800_v49  ;;  %v832_v12 = vmul.f32 1.442695, %v801_v38  ;;  %v322_v20 = vmul.f32 %v2651_v59, %v2561_v62 }
 0x21b   :  { %v2291_v57 = vpop.eup %2290  ;;  %475 = vst.msk [vmem:[#allocation2 + $0x68] sm:$0xff] %vm232_vm5, %v2289_v53  ;;  %2314 = vpow2.f32 %v822_v36  ;;  %v2785_v9 = vrot.slane %v962_v58, %v2645_v54  ;;  %v2788_v61 = vrot.slane %v961_v41, %v2645_v54  ;;  %v963_v11 = vcombine.high %v961_v41, %v961_v41  ;;  %v1068_v58 = vld [vmem:[#allocation2] sm:$0xff] }
 0x21c   :  { %v2293_v32 = vpop.eup %2292  ;;  %476 = vst.msk [vmem:[#allocation2 + $0x70] sm:$0xff] %vm232_vm5, %v2291_v57  ;;  %2316 = vpow2.f32 %v824_v52  ;;  %892 = vbcast.lane.b32.xlu0 %v2773_v56, 320  ;;  %896 = vbcast.lane.b32.xlu1 %v2773_v56, 328  ;;  %v2102_v13 = vmul.f32 -1.442695, %v2525_v17  ;;  %v582_v42 = vrot.slane %v322_v20, %v2645_v54  ;;  %v575_v46 = vcombine.high %v322_v20, %v322_v20 }
 0x21d   :  { %477 = vst.msk [vmem:[#allocation2 + $0x78] sm:$0xff] %vm232_vm5, %v2293_v32  ;;  %2318 = vpow2.f32 %v826_v5  ;;  %v2792_v3 = vrot.slane %v963_v11, %v2645_v54  ;;  %v2103_v22 = vmul.f32 -1.442695, %v2544_v30  ;;  %v1070_v11 = vmul.f32 0.0, %v1068_v58 }
 0x21e   :  { %v2295_v0 = vpop.eup %2294  ;;  %2320 = vpow2.f32 %v828_v55  ;;  %v590_v33 = vcombine.high %v582_v42, %v582_v42  ;;  %v598_v43 = vrot.slane %v582_v42, %v2645_v54  ;;  %v589_v14 = vrot.slane %v575_v46, %v2645_v54 }
 0x21f   :  { %v2297_v2 = vpop.eup %2296  ;;  %2322 = vpow2.f32 %v830_v60  ;;  %834 = vst.msk [vmem:[#allocation3] sm:$0xff] %vm232_vm5, %v2295_v0 }
 0x220   :  { %v2299_v6 = vpop.eup %2298  ;;  %2324 = vpow2.f32 %v832_v12  ;;  %835 = vst.msk [vmem:[#allocation3 + $0x8] sm:$0xff] %vm232_vm5, %v2297_v2  ;;  %904 = vbcast.lane.b32.xlu0 %v2597_v24, 320  ;;  %908 = vbcast.lane.b32.xlu1 %v2597_v24, 328  ;;  %v612_v15 = vrot.slane %v590_v33, %v2645_v54  ;;  %v620_v49 = vcombine.high %v598_v43, %v598_v43 }
 0x221   :  { %v2301_v7 = vpop.eup %2300  ;;  %836 = vst.msk [vmem:[#allocation3 + $0x10] sm:$0xff] %vm232_vm5, %v2299_v6  ;;  %2326 = vpow2.f32 %v2102_v13  ;;  %v605_v41 = vrot.slane %v589_v14, %v2645_v54  ;;  %v591_v32 = vcombine.high %v589_v14, %v589_v14 }
 0x222   :  { %v2303_v8 = vpop.eup %2302  ;;  %837 = vst.msk [vmem:[#allocation3 + $0x18] sm:$0xff] %vm232_vm5, %v2301_v7  ;;  %2328 = vpow2.f32 %v2103_v22  ;;  %v631_v18 = vrot.slane %v612_v15, %v2531_v19  ;;  %v622_v52 = vcombine.high %v612_v15, %v612_v15  ;;  %v1069_v7 = vld [vmem:[#allocation2 + $0x8] sm:$0xff] }
 0x223   :  { %v2305_v4 = vpop.eup %2304  ;;  %838 = vst.msk [vmem:[#allocation3 + $0x20] sm:$0xff] %vm232_vm5, %v2303_v8 }
 0x224   :  { %v2307_v10 = vpop.eup %2306  ;;  %839 = vst.msk [vmem:[#allocation3 + $0x28] sm:$0xff] %vm232_vm5, %v2305_v4  ;;  %916 = vbcast.lane.b32.xlu0 %v2600_v25, 320  ;;  %920 = vbcast.lane.b32.xlu1 %v2600_v25, 328  ;;  %v619_v4 = vrot.slane %v591_v32, %v2645_v54 }
 0x225   :  { %v2309_v16 = vpop.eup %2308  ;;  %840 = vst.msk [vmem:[#allocation3 + $0x30] sm:$0xff] %vm232_vm5, %v2307_v10 }
 0x226   :  { %v2311_v23 = vpop.eup %2310  ;;  %841 = vst.msk [vmem:[#allocation3 + $0x38] sm:$0xff] %vm232_vm5, %v2309_v16  ;;  %v1071_v16 = vmul.f32 0.0, %v1069_v7  ;;  %v1162_v7 = vld [vmem:[#allocation2 + $0x48] sm:$0xff] }
 0x227   :  { %v2313_v26 = vpop.eup %2312  ;;  %842 = vst.msk [vmem:[#allocation3 + $0x40] sm:$0xff] %vm232_vm5, %v2311_v23 }
 0x228   :  { %v2315_v34 = vpop.eup %2314  ;;  %843 = vst.msk [vmem:[#allocation3 + $0x48] sm:$0xff] %vm232_vm5, %v2313_v26  ;;  %928 = vbcast.lane.b32.xlu0 %v2606_v27, 320  ;;  %932 = vbcast.lane.b32.xlu1 %v2606_v27, 328 }
 0x229   :  { %v2317_v35 = vpop.eup %2316  ;;  %844 = vst.msk [vmem:[#allocation3 + $0x50] sm:$0xff] %vm232_vm5, %v2315_v34  ;;  %v621_v34 = vcombine.high %v605_v41, %v605_v41 }
 0x22a   :  { %v2319_v37 = vpop.eup %2318  ;;  %845 = vst.msk [vmem:[#allocation3 + $0x58] sm:$0xff] %vm232_vm5, %v2317_v35  ;;  %v1090_v35 = vld [vmem:[#allocation2 + $0x18] sm:$0xff] }
 0x22b   :  { %v2321_v39 = vpop.eup %2320  ;;  %846 = vst.msk [vmem:[#allocation3 + $0x60] sm:$0xff] %vm232_vm5, %v2319_v37  ;;  %v1089_v37 = vld [vmem:[#allocation2 + $0x10] sm:$0xff] }
 0x22c   :  { %v2323_v40 = vpop.eup %2322  ;;  %847 = vst.msk [vmem:[#allocation3 + $0x68] sm:$0xff] %vm232_vm5, %v2321_v39  ;;  %940 = vbcast.lane.b32.xlu0 %v2609_v28, 320  ;;  %944 = vbcast.lane.b32.xlu1 %v2609_v28, 328 }
 0x22d   :  { %v2325_v59 = vpop.eup %2324  ;;  %848 = vst.msk [vmem:[#allocation3 + $0x70] sm:$0xff] %vm232_vm5, %v2323_v40 }
 0x22e   :  { %849 = vst.msk [vmem:[#allocation3 + $0x78] sm:$0xff] %vm232_vm5, %v2325_v59  ;;  %v2327_v44 = vpop.eup %2326 }
 0x22f   :  { %v2329_v45 = vpop.eup %2328  ;;  %v1648_v31 = vadd.f32 1.0, %v2327_v44 }
 0x230   :  { %1426 = vbcast.lane.b32.xlu0 %v2692_v48, 336  ;;  %1430 = vbcast.lane.b32.xlu1 %v2692_v48, 344  ;;  %v627_v48 = vrot.slane %v598_v43, %v2531_v19  ;;  %v1649_v36 = vadd.f32 1.0, %v2329_v45  ;;  %v651_v45 = vrot.slane %v621_v34, %v2531_v19  ;;  %v2225_v34 = vld [vmem:[%s3102_s8 + $0x10] sm:$0xff]  }
 0x231   :  { %2330 = vrcp.f32 %v1648_v31 }
 0x232   :  { %2332 = vrcp.f32 %v1649_v36 }
 0x234   :  { %1434 = vbcast.lane.b32.xlu0 %v2744_v29, 336  ;;  %1438 = vbcast.lane.b32.xlu1 %v2744_v29, 344 }
 0x238   :  { %1442 = vbcast.lane.b32.xlu0 %v2761_v47, 336  ;;  %1446 = vbcast.lane.b32.xlu1 %v2761_v47, 344  ;;  %v635_v47 = vrot.slane %v620_v49, %v2531_v19  ;;  %v1113_v49 = vld [vmem:[#allocation2 + $0x20] sm:$0xff] }
 0x23c   :  { %v501_v50 = vpop.permute.xlu1 %500  ;;  %v485_v29 = vpop.permute.xlu0 %484  ;;  %1450 = vbcast.lane.b32.xlu0 %v2773_v56, 336  ;;  %1454 = vbcast.lane.b32.xlu1 %v2773_v56, 344  ;;  %v639_v56 = vrot.slane %v622_v52, %v2531_v19 }
 0x23d   :  { %v667_v51 = vmul.f32 %v631_v18, %v501_v50  ;;  %v664_v38 = vmul.f32 %v627_v48, %v485_v29 }
 0x23e   :  { %v2331_v54 = vpop.eup %2330 }
 0x23f   :  { %683 = vst.msk [vmem:[#allocation4 + $0x18] sm:$0xff] %vm232_vm5, %v667_v51  ;;  %680 = vst.msk [vmem:[#allocation4] sm:$0xff] %vm232_vm5, %v664_v38  ;;  %v2333_v42 = vpop.eup %2332  ;;  %v1654_v36 = vmul.f32 %v2331_v54, %v2525_v17  ;;  %v1186_v54 = vld [vmem:[#allocation2 + $0x58] sm:$0xff] }
 0x240   :  { %v513_v53 = vpop.permute.xlu1 %512  ;;  %v489_v5 = vpop.permute.xlu0 %488  ;;  %1458 = vbcast.lane.b32.xlu0 %v2597_v24, 336  ;;  %1462 = vbcast.lane.b32.xlu1 %v2597_v24, 344  ;;  %v643_v24 = vrot.slane %v605_v41, %v2531_v19  ;;  %v1655_v50 = vmul.f32 %v2333_v42, %v2544_v30  ;;  %v1138_v30 = vld [vmem:[#allocation2 + $0x38] sm:$0xff] }
 0x241   :  { %v669_v55 = vmul.f32 %v635_v47, %v513_v53  ;;  %v665_v57 = vmul.f32 %v627_v48, %v489_v5  ;;  %v1114_v48 = vld [vmem:[#allocation2 + $0x28] sm:$0xff] }
 0x243   :  { %685 = vst.msk [vmem:[#allocation4 + $0x28] sm:$0xff] %vm232_vm5, %v669_v55  ;;  %681 = vst.msk [vmem:[#allocation4 + $0x8] sm:$0xff] %vm232_vm5, %v665_v57  ;;  %v1137_v57 = vld [vmem:[#allocation2 + $0x30] sm:$0xff] }
 0x244   :  { %v525_v60 = vpop.permute.xlu1 %524  ;;  %v497_v12 = vpop.permute.xlu0 %496  ;;  %1466 = vbcast.lane.b32.xlu0 %v2600_v25, 336  ;;  %1470 = vbcast.lane.b32.xlu1 %v2600_v25, 344  ;;  %v647_v25 = vrot.slane %v619_v4, %v2531_v19 }
 0x245   :  { %v671_v0 = vmul.f32 %v639_v56, %v525_v60  ;;  %v666_v2 = vmul.f32 %v631_v18, %v497_v12  ;;  %v623_v18 = vcombine.high %v619_v4, %v619_v4 }
 0x246   :  { %v1072_v6 = vld [vmem:[#allocation4] sm:$0xff]  ;;  %v1095_v44 = vld [vmem:[#allocation4 + $0x18] sm:$0xff] }
 0x247   :  { %v1074_v8 = vadd.f32 %v1072_v6, %v1070_v11  ;;  %687 = vst.msk [vmem:[#allocation4 + $0x38] sm:$0xff] %vm232_vm5, %v671_v0  ;;  %682 = vst.msk [vmem:[#allocation4 + $0x10] sm:$0xff] %vm232_vm5, %v666_v2  ;;  %v655_v17 = vrot.slane %v623_v18, %v2531_v19  ;;  %v1209_v18 = vld [vmem:[#allocation2 + $0x60] sm:$0xff] }
 0x248   :  { %v537_v10 = vpop.permute.xlu1 %536  ;;  %v509_v13 = vpop.permute.xlu0 %508  ;;  %1474 = vbcast.lane.b32.xlu0 %v2606_v27, 336  ;;  %1478 = vbcast.lane.b32.xlu1 %v2606_v27, 344 }
 0x249   :  { %1076 = vst.msk [vmem:[#allocation4] sm:$0xff] %vm232_vm5, %v1074_v8  ;;  %v673_v22 = vmul.f32 %v643_v24, %v537_v10  ;;  %v668_v23 = vmul.f32 %v635_v47, %v509_v13  ;;  %v1091_v33 = vmul.f32 %v1089_v37, %v1074_v8  ;;  %v1161_v8 = vld [vmem:[#allocation2 + $0x40] sm:$0xff]  ;;  %v2224_v10 = vld [vmem:[%s3102_s8 + $0x18] sm:$0xff]  }
 0x24a   :  { %v1073_v26 = vld [vmem:[#allocation4 + $0x8] sm:$0xff]  ;;  %2172 = vmatpush3.bf16.msra.mxu1 %v2224_v10 }
 0x24b   :  { %v1075_v20 = vadd.f32 %v1073_v26, %v1071_v16  ;;  %689 = vst.msk [vmem:[#allocation4 + $0x48] sm:$0xff] %vm232_vm5, %v673_v22  ;;  %684 = vst.msk [vmem:[#allocation4 + $0x20] sm:$0xff] %vm232_vm5, %v668_v23  ;;  %v1119_v14 = vld [vmem:[#allocation4 + $0x28] sm:$0xff]  ;;  %2173 = vmatprep.subr.bf16.mxu1 %v2374_v1 }
 0x24c   :  { %v549_v39 = vpop.permute.xlu1 %548  ;;  %v521_v40 = vpop.permute.xlu0 %520  ;;  %1482 = vbcast.lane.b32.xlu0 %v2609_v28, 336  ;;  %1486 = vbcast.lane.b32.xlu1 %v2609_v28, 344 }
 0x24d   :  { %1077 = vst.msk [vmem:[#allocation4 + $0x8] sm:$0xff] %vm232_vm5, %v1075_v20  ;;  %v1092_v59 = vmul.f32 %v1090_v35, %v1075_v20  ;;  %v675_v15 = vmul.f32 %v647_v25, %v549_v39  ;;  %v670_v43 = vmul.f32 %v639_v56, %v521_v40  ;;  %v1185_v35 = vld [vmem:[#allocation2 + $0x50] sm:$0xff] }
 0x24e   :  { %v1094_v27 = vld [vmem:[#allocation4 + $0x10] sm:$0xff]  ;;  %v1143_v11 = vld [vmem:[#allocation4 + $0x38] sm:$0xff]  ;;  %2174 = vmatpush3.bf16.msra.mxu1 %v2225_v34 }
 0x24f   :  { %v1097_v46 = vadd.f32 %v1095_v44, %v1092_v59  ;;  %v1096_v31 = vadd.f32 %v1094_v27, %v1091_v33  ;;  %691 = vst.msk [vmem:[#allocation4 + $0x58] sm:$0xff] %vm232_vm5, %v675_v15  ;;  %686 = vst.msk [vmem:[#allocation4 + $0x30] sm:$0xff] %vm232_vm5, %v670_v43  ;;  %v2226_v27 = vld [vmem:[%s3102_s8 + $0x8] sm:$0xff]   ;;  %2175 = vmatprep.subr.bf16.mxu1 %v2374_v1 }
 0x250   :  { %v561_v29 = vpop.permute.xlu1 %560  ;;  %v533_v51 = vpop.permute.xlu0 %532  ;;  %1658 = vrot.lane.b32.xlu0 %v1654_v36, %s2377_s6  ;;  %1660 = vrot.lane.b32.xlu1 %v1655_v50, %s2377_s6  ;;  %v1320_v36 = vld [vmem:[#allocation4] sm:$0xff] }
 0x251   :  { %1099 = vst.msk [vmem:[#allocation4 + $0x18] sm:$0xff] %vm232_vm5, %v1097_v46  ;;  %v1116_v38 = vmul.f32 %v1114_v48, %v1097_v46  ;;  %1098 = vst.msk [vmem:[#allocation4 + $0x10] sm:$0xff] %vm232_vm5, %v1096_v31  ;;  %v1115_v47 = vmul.f32 %v1113_v49, %v1096_v31  ;;  %v677_v28 = vmul.f32 %v651_v45, %v561_v29  ;;  %v1210_v31 = vld [vmem:[#allocation2 + $0x68] sm:$0xff] }
 0x252   :  { %v672_v52 = vmul.f32 %v643_v24, %v533_v51  ;;  %v1118_v53 = vld [vmem:[#allocation4 + $0x20] sm:$0xff]  ;;  %v1167_v23 = vld [vmem:[#allocation4 + $0x48] sm:$0xff]  ;;  %2176 = vmatpush3.bf16.msra.mxu1 %v2226_v27 }
 0x253   :  { %v1121_v5 = vadd.f32 %v1119_v14, %v1116_v38  ;;  %v1120_v55 = vadd.f32 %v1118_v53, %v1115_v47  ;;  %693 = vst.msk [vmem:[#allocation4 + $0x68] sm:$0xff] %vm232_vm5, %v677_v28  ;;  %v2227_v14 = vld [vmem:[%s3102_s8] sm:$0xff]   ;;  %2177 = vmatprep.subr.bf16.mxu1 %v2374_v1 }
 0x254   :  { %688 = vst.msk [vmem:[#allocation4 + $0x40] sm:$0xff] %vm232_vm5, %v672_v52  ;;  %v573_v58 = vpop.permute.xlu1 %572  ;;  %v545_v56 = vpop.permute.xlu0 %544  ;;  %v1321_v59 = vld [vmem:[#allocation4 + $0x8] sm:$0xff] }
 0x255   :  { %1123 = vst.msk [vmem:[#allocation4 + $0x28] sm:$0xff] %vm232_vm5, %v1121_v5  ;;  %v1140_v41 = vmul.f32 %v1138_v30, %v1121_v5  ;;  %1122 = vst.msk [vmem:[#allocation4 + $0x20] sm:$0xff] %vm232_vm5, %v1120_v55  ;;  %v1139_v32 = vmul.f32 %v1137_v57, %v1120_v55  ;;  %v679_v60 = vmul.f32 %v655_v17, %v573_v58  ;;  %v1234_v30 = vld [vmem:[#allocation2 + $0x78] sm:$0xff]  ;;  %v1233_v57 = vld [vmem:[#allocation2 + $0x70] sm:$0xff] }
 0x256   :  { %v674_v12 = vmul.f32 %v647_v25, %v545_v56  ;;  %v1142_v0 = vld [vmem:[#allocation4 + $0x30] sm:$0xff]  ;;  %v1191_v15 = vld [vmem:[#allocation4 + $0x58] sm:$0xff]  ;;  %2178 = vmatpush3.bf16.msra.mxu1 %v2227_v14 }
 0x257   :  { %v1145_v2 = vadd.f32 %v1143_v11, %v1140_v41  ;;  %v1144_v6 = vadd.f32 %v1142_v0, %v1139_v32  ;;  %695 = vst.msk [vmem:[#allocation4 + $0x78] sm:$0xff] %vm232_vm5, %v679_v60  ;;  %2183 = vmatprep.subr.bf16.mxu1 %v2374_v1 }
 0x258   :  { %690 = vst.msk [vmem:[#allocation4 + $0x50] sm:$0xff] %vm232_vm5, %v674_v12  ;;  %v1263_v24 = vpop.permute.xlu1 %1262  ;;  %v557_v4 = vpop.permute.xlu0 %556  ;;  %v1323_v51 = vld [vmem:[#allocation4 + $0x18] sm:$0xff]  ;;  %v1322_v32 = vld [vmem:[#allocation4 + $0x10] sm:$0xff] }
 0x259   :  { %1147 = vst.msk [vmem:[#allocation4 + $0x38] sm:$0xff] %vm232_vm5, %v1145_v2  ;;  %v1164_v13 = vmul.f32 %v1162_v7, %v1145_v2  ;;  %1146 = vst.msk [vmem:[#allocation4 + $0x30] sm:$0xff] %vm232_vm5, %v1144_v6  ;;  %v1163_v16 = vmul.f32 %v1161_v8, %v1144_v6  ;;  %v676_v22 = vmul.f32 %v651_v45, %v557_v4 }
 0x25a   :  { %v1337_v44 = vmul.f32 %v1321_v59, %v1263_v24  ;;  %v1215_v47 = vld [vmem:[#allocation4 + $0x68] sm:$0xff] }
 0x25b   :  { %v1166_v26 = vld [vmem:[#allocation4 + $0x40] sm:$0xff]  ;;  %v1169_v20 = vadd.f32 %v1167_v23, %v1164_v13  ;;  %692 = vst.msk [vmem:[#allocation4 + $0x60] sm:$0xff] %vm232_vm5, %v676_v22 }
 0x25c   :  { %v1168_v25 = vadd.f32 %v1166_v26, %v1163_v16  ;;  %v1271_v37 = vpop.permute.xlu1 %1270  ;;  %v569_v39 = vpop.permute.xlu0 %568  ;;  %v1353_v28 = vsel %vm232_vm5, %v1337_v44, 0.0  ;;  %v1325_v4 = vld [vmem:[#allocation4 + $0x28] sm:$0xff]  ;;  %v1324_v34 = vld [vmem:[#allocation4 + $0x20] sm:$0xff] }
 0x25d   :  { %1171 = vst.msk [vmem:[#allocation4 + $0x48] sm:$0xff] %vm232_vm5, %v1169_v20  ;;  %v1188_v40 = vmul.f32 %v1186_v54, %v1169_v20  ;;  %v678_v33 = vmul.f32 %v655_v17, %v569_v39  ;;  %v1339_v55 = vmul.f32 %v1323_v51, %v1271_v37 }
 0x25e   :  { %1170 = vst.msk [vmem:[#allocation4 + $0x40] sm:$0xff] %vm232_vm5, %v1168_v25  ;;  %v1187_v42 = vmul.f32 %v1185_v35, %v1168_v25  ;;  %v1239_v0 = vld [vmem:[#allocation4 + $0x78] sm:$0xff] }
 0x25f   :  { %v1190_v43 = vld [vmem:[#allocation4 + $0x50] sm:$0xff]  ;;  %v1193_v45 = vadd.f32 %v1191_v15, %v1188_v40  ;;  %694 = vst.msk [vmem:[#allocation4 + $0x70] sm:$0xff] %vm232_vm5, %v678_v33  ;;  %v1362_v8 = vsel %vm232_vm5, %v1339_v55, 0.0 }
 0x260   :  { %v1192_v46 = vadd.f32 %v1190_v43, %v1187_v42  ;;  %v1279_v48 = vpop.permute.xlu1 %1278  ;;  %v1259_v49 = vpop.permute.xlu0 %1258  ;;  %v1327_v25 = vld [vmem:[#allocation4 + $0x38] sm:$0xff]  ;;  %v1326_v44 = vld [vmem:[#allocation4 + $0x30] sm:$0xff] }
 0x261   :  { %1195 = vst.msk [vmem:[#allocation4 + $0x58] sm:$0xff] %vm232_vm5, %v1193_v45  ;;  %v1212_v50 = vmul.f32 %v1210_v31, %v1193_v45  ;;  %v1336_v38 = vmul.f32 %v1320_v36, %v1259_v49  ;;  %v1341_v13 = vmul.f32 %v1325_v4, %v1279_v48 }
 0x262   :  { %1194 = vst.msk [vmem:[#allocation4 + $0x50] sm:$0xff] %vm232_vm5, %v1192_v46  ;;  %v1211_v29 = vmul.f32 %v1209_v18, %v1192_v46  ;;  %v1214_v52 = vld [vmem:[#allocation4 + $0x60] sm:$0xff] }
 0x263   :  { %v1217_v53 = vadd.f32 %v1215_v47, %v1212_v50  ;;  %v1352_v17 = vsel %vm232_vm5, %v1336_v38, 0.0  ;;  %v1371_v39 = vsel %vm232_vm5, %v1341_v13, 0.0 }
 0x264   :  { %v1216_v5 = vadd.f32 %v1214_v52, %v1211_v29  ;;  %v1354_v58 = vadd.f32 %v1353_v28, %v1352_v17  ;;  %v1287_v56 = vpop.permute.xlu1 %1286  ;;  %v1267_v41 = vpop.permute.xlu0 %1266  ;;  %v1329_v31 = vld [vmem:[#allocation4 + $0x48] sm:$0xff] }
 0x265   :  { %1219 = vst.msk [vmem:[#allocation4 + $0x68] sm:$0xff] %vm232_vm5, %v1217_v53  ;;  %v1236_v60 = vmul.f32 %v1234_v30, %v1217_v53  ;;  %v1338_v11 = vmul.f32 %v1322_v32, %v1267_v41  ;;  %v1343_v37 = vmul.f32 %v1327_v25, %v1287_v56  ;;  %v1328_v47 = vld [vmem:[#allocation4 + $0x40] sm:$0xff] }
 0x266   :  { %1218 = vst.msk [vmem:[#allocation4 + $0x60] sm:$0xff] %vm232_vm5, %v1216_v5  ;;  %v1235_v12 = vmul.f32 %v1233_v57, %v1216_v5  ;;  %v1238_v2 = vld [vmem:[#allocation4 + $0x70] sm:$0xff]  ;;  %v1355_v6 = vrot.slane %v1354_v58, 4 }
 0x267   :  { %v1241_v7 = vadd.f32 %v1239_v0, %v1236_v60  ;;  %v1361_v10 = vsel %vm232_vm5, %v1338_v11, 0.0  ;;  %v1380_v46 = vsel %vm232_vm5, %v1343_v37, 0.0 }
 0x268   :  { %v1240_v24 = vadd.f32 %v1238_v2, %v1235_v12  ;;  %v1356_v16 = vadd.f32 %v1355_v6, %v1354_v58  ;;  %v1363_v22 = vadd.f32 %v1362_v8, %v1361_v10  ;;  %v1295_v23 = vpop.permute.xlu1 %1294  ;;  %v1275_v26 = vpop.permute.xlu0 %1274  ;;  %v1331_v12 = vld [vmem:[#allocation4 + $0x58] sm:$0xff] }
 0x269   :  { %1243 = vst.msk [vmem:[#allocation4 + $0x78] sm:$0xff] %vm232_vm5, %v1241_v7  ;;  %v1340_v35 = vmul.f32 %v1324_v34, %v1275_v26  ;;  %v1345_v36 = vmul.f32 %v1329_v31, %v1295_v23  ;;  %v1330_v13 = vld [vmem:[#allocation4 + $0x50] sm:$0xff] }
 0x26a   :  { %1242 = vst.msk [vmem:[#allocation4 + $0x70] sm:$0xff] %vm232_vm5, %v1240_v24  ;;  %v1357_v20 = vrot.slane %v1356_v16, 2  ;;  %v1364_v54 = vrot.slane %v1363_v22, 4 }
 0x26b   :  { %v1370_v59 = vsel %vm232_vm5, %v1340_v35, 0.0  ;;  %v1389_v30 = vsel %vm232_vm5, %v1345_v36, 0.0 }
 0x26c   :  { %v1358_v40 = vadd.f32 %v1357_v20, %v1356_v16  ;;  %v1365_v42 = vadd.f32 %v1364_v54, %v1363_v22  ;;  %v1303_v33 = vpop.permute.xlu1 %1302  ;;  %v1372_v15 = vadd.f32 %v1371_v39, %v1370_v59  ;;  %v1333_v4 = vld [vmem:[#allocation4 + $0x68] sm:$0xff]  ;;  %v999_v39 = vrot.slane %v2777_v21, %v2531_v19 }
 0x26d   :  { %v1283_v43 = vpop.permute.xlu0 %1282  ;;  %v1347_v2 = vmul.f32 %v1331_v12, %v1303_v33  ;;  %v1332_v35 = vld [vmem:[#allocation4 + $0x60] sm:$0xff] }
 0x26e   :  { %v1366_v27 = vrot.slane %v1365_v42, 2  ;;  %v1342_v45 = vmul.f32 %v1326_v44, %v1283_v43  ;;  %v1373_v18 = vrot.slane %v1372_v15, 4  ;;  %v1359_v48 = vrot.slane %v1358_v40, 1 }
 0x26f   :  { %v1398_v20 = vsel %vm232_vm5, %v1347_v2, 0.0 }
 0x270   :  { %v1367_v49 = vadd.f32 %v1366_v27, %v1365_v42  ;;  %v1379_v50 = vsel %vm232_vm5, %v1342_v45, 0.0  ;;  %v1374_v29 = vadd.f32 %v1373_v18, %v1372_v15  ;;  %v1311_v52 = vpop.permute.xlu1 %1310  ;;  %v1360_v55 = vadd.f32 %v1359_v48, %v1358_v40  ;;  %v1335_v59 = vld [vmem:[#allocation4 + $0x78] sm:$0xff] }
 0x271   :  { %v1381_v51 = vadd.f32 %v1380_v46, %v1379_v50  ;;  %v1291_v38 = vpop.permute.xlu0 %1290  ;;  %v1349_v16 = vmul.f32 %v1333_v4, %v1311_v52  ;;  %v1334_v36 = vld [vmem:[#allocation4 + $0x70] sm:$0xff] }
 0x272   :  { %v1368_v28 = vrot.slane %v1367_v49, 1  ;;  %v1344_v14 = vmul.f32 %v1328_v47, %v1291_v38  ;;  %v1375_v53 = vrot.slane %v1374_v29, 2 }
 0x273   :  { %v1382_v5 = vrot.slane %v1381_v51, 4  ;;  %v1407_v43 = vsel %vm232_vm5, %v1349_v16, 0.0 }
 0x274   :  { %v1369_v17 = vadd.f32 %v1368_v28, %v1367_v49  ;;  %v1388_v57 = vsel %vm232_vm5, %v1344_v14, 0.0  ;;  %v1376_v58 = vadd.f32 %v1375_v53, %v1374_v29  ;;  %v1319_v6 = vpop.permute.xlu1 %1318  ;;  %v1078_v53 = vld [vmem:[#allocation3] sm:$0xff] }
 0x275   :  { %v1383_v56 = vadd.f32 %v1382_v5, %v1381_v51  ;;  %v1390_v41 = vadd.f32 %v1389_v30, %v1388_v57  ;;  %v1299_v7 = vpop.permute.xlu0 %1298  ;;  %v1351_v44 = vmul.f32 %v1335_v59, %v1319_v6 }
 0x276   :  { %v1601_v32 = vsel %vm1600_vm10, %v1369_v17, %v1360_v55  ;;  %v1377_v60 = vrot.slane %v1376_v58, 1  ;;  %v1346_v22 = vmul.f32 %v1330_v13, %v1299_v7 }
 0x277   :  { %v1384_v11 = vrot.slane %v1383_v56, 2  ;;  %v1391_v0 = vrot.slane %v1390_v41, 4  ;;  %v1416_v52 = vsel %vm232_vm5, %v1351_v44, 0.0  ;;  %v1101_v44 = vld [vmem:[#allocation3 + $0x10] sm:$0xff] }
 0x278   :  { %v1378_v8 = vadd.f32 %v1377_v60, %v1376_v58  ;;  %v1397_v25 = vsel %vm232_vm5, %v1346_v22, 0.0  ;;  %v857_v37 = vpop.permute.xlu1 %856 }
 0x279   :  { %v1385_v24 = vadd.f32 %v1384_v11, %v1383_v56  ;;  %v1392_v10 = vadd.f32 %v1391_v0, %v1390_v41  ;;  %v1307_v54 = vpop.permute.xlu0 %1306  ;;  %v1399_v33 = vadd.f32 %v1398_v20, %v1397_v25  ;;  %v1036_v27 = vmul.f32 %v999_v39, %v857_v37 }
 0x27a   :  { %v1603_v23 = vsel %vm1602_vm11, %v1378_v8, %v1601_v32  ;;  %v1348_v15 = vmul.f32 %v1332_v35, %v1307_v54  ;;  %v1080_v56 = vmul.f32 0.0, %v1078_v53  ;;  %v1079_v32 = vld [vmem:[#allocation3 + $0x8] sm:$0xff]  ;;  %v1003_v11 = vrot.slane %v2785_v9, %v2531_v19 }
 0x27b   :  { %v1386_v26 = vrot.slane %v1385_v24, 1  ;;  %v1393_v34 = vrot.slane %v1392_v10, 2  ;;  %v1400_v46 = vrot.slane %v1399_v33, 4  ;;  %1052 = vst.msk [vmem:[#allocation5] sm:$0xff] %vm232_vm5, %v1036_v27  ;;  %v992_v0 = vcombine.high %v2777_v21, %v2777_v21  ;;  %v1126_v53 = vld [vmem:[#allocation3 + $0x28] sm:$0xff] }
 0x27c   :  { %v1406_v31 = vsel %vm232_vm5, %v1348_v15, 0.0  ;;  %v861_v50 = vpop.permute.xlu1 %860  ;;  %v994_v35 = vcombine.high %v2785_v9, %v2785_v9  ;;  %v1102_v15 = vld [vmem:[#allocation3 + $0x18] sm:$0xff] }
 0x27d   :  { %v1387_v40 = vadd.f32 %v1386_v26, %v1385_v24  ;;  %v1394_v42 = vadd.f32 %v1393_v34, %v1392_v10  ;;  %v1408_v48 = vadd.f32 %v1407_v43, %v1406_v31  ;;  %v1315_v49 = vpop.permute.xlu0 %1314  ;;  %v1401_v51 = vadd.f32 %v1400_v46, %v1399_v33 }
 0x27e   :  { %v1350_v38 = vmul.f32 %v1334_v36, %v1315_v49  ;;  %v1037_v47 = vmul.f32 %v999_v39, %v861_v50  ;;  %v1081_v24 = vmul.f32 0.0, %v1079_v32  ;;  %v1007_v54 = vrot.slane %v992_v0, %v2531_v19 }
 0x27f   :  { %v1395_v45 = vrot.slane %v1394_v42, 1  ;;  %v1605_v18 = vsel %vm1604_vm12, %v1387_v40, %v1603_v23  ;;  %v1409_v28 = vrot.slane %v1408_v48, 4  ;;  %v1402_v14 = vrot.slane %v1401_v51, 2 }
 0x280   :  { %v1415_v5 = vsel %vm232_vm5, %v1350_v38, 0.0  ;;  %1053 = vst.msk [vmem:[#allocation5 + $0x8] sm:$0xff] %vm232_vm5, %v1037_v47  ;;  %v1011_v43 = vrot.slane %v994_v35, %v2531_v19  ;;  %v1125_v47 = vld [vmem:[#allocation3 + $0x20] sm:$0xff] }
 0x281   :  { %v1396_v29 = vadd.f32 %v1395_v45, %v1394_v42  ;;  %v1410_v17 = vadd.f32 %v1409_v28, %v1408_v48  ;;  %v1417_v30 = vadd.f32 %v1416_v52, %v1415_v5  ;;  %v1403_v57 = vadd.f32 %v1402_v14, %v1401_v51 }
 0x282   :  { %v1082_v12 = vld [vmem:[#allocation5] sm:$0xff]  ;;  %v1015_v51 = vrot.slane %v2788_v61, %v2531_v19 }
 0x283   :  { %v1607_v55 = vsel %vm1606_vm13, %v1396_v29, %v1605_v18  ;;  %v1411_v58 = vrot.slane %v1410_v17, 2  ;;  %v1418_v41 = vrot.slane %v1417_v30, 4  ;;  %v1404_v60 = vrot.slane %v1403_v57, 1 }
 0x284   :  { %v1084_v6 = vadd.f32 %v1082_v12, %v1080_v56  ;;  %v1019_v56 = vrot.slane %v2792_v3, %v2531_v19 }
 0x285   :  { %v1412_v2 = vadd.f32 %v1411_v58, %v1410_v17  ;;  %v1419_v7 = vadd.f32 %v1418_v41, %v1417_v30  ;;  %v1405_v8 = vadd.f32 %v1404_v60, %v1403_v57  ;;  %v993_v41 = vcombine.high %v2788_v61, %v2788_v61  ;;  %v1149_v60 = vld [vmem:[#allocation3 + $0x30] sm:$0xff] }
 0x286   :  { %v869_v4 = vpop.permute.xlu0 %868  ;;  %v873_v10 = vpop.permute.xlu1 %872  ;;  %1086 = vst.msk [vmem:[#allocation5] sm:$0xff] %vm232_vm5, %v1084_v6  ;;  %v1103_v31 = vmul.f32 %v1101_v44, %v1084_v6 }
 0x287   :  { %v1413_v13 = vrot.slane %v1412_v2, 1  ;;  %v1420_v16 = vrot.slane %v1419_v7, 2  ;;  %v1083_v22 = vld [vmem:[#allocation5 + $0x8] sm:$0xff]  ;;  %v1038_v23 = vmul.f32 %v1003_v11, %v869_v4  ;;  %v1039_v34 = vmul.f32 %v1003_v11, %v873_v10 }
 0x288   :  { %v1085_v26 = vadd.f32 %v1083_v22, %v1081_v24  ;;  %v1609_v20 = vsel %vm1608_vm14, %v1405_v8, %v1607_v55  ;;  %v1023_v61 = vrot.slane %v993_v41, %v2531_v19  ;;  %v1173_v22 = vld [vmem:[#allocation3 + $0x40] sm:$0xff] }
 0x289   :  { %v1414_v21 = vadd.f32 %v1413_v13, %v1412_v2  ;;  %v1421_v25 = vadd.f32 %v1420_v16, %v1419_v7  ;;  %1054 = vst.msk [vmem:[#allocation5 + $0x10] sm:$0xff] %vm232_vm5, %v1038_v23  ;;  %1055 = vst.msk [vmem:[#allocation5 + $0x18] sm:$0xff] %vm232_vm5, %v1039_v34  ;;  %v1150_v2 = vld [vmem:[#allocation3 + $0x38] sm:$0xff]  ;;  %v995_v13 = vcombine.high %v2792_v3, %v2792_v3 }
 0x28a   :  { %1087 = vst.msk [vmem:[#allocation5 + $0x8] sm:$0xff] %vm232_vm5, %v1085_v26  ;;  %v881_v37 = vpop.permute.xlu0 %880  ;;  %v885_v39 = vpop.permute.xlu1 %884  ;;  %v1104_v27 = vmul.f32 %v1102_v15, %v1085_v26 }
 0x28b   :  { %v1422_v40 = vrot.slane %v1421_v25, 1  ;;  %v1040_v42 = vmul.f32 %v1007_v54, %v881_v37  ;;  %v1041_v59 = vmul.f32 %v1007_v54, %v885_v39  ;;  %v1611_v33 = vsel %vm1610_vm15, %v1414_v21, %v1609_v20  ;;  %v1174_v20 = vld [vmem:[#allocation3 + $0x48] sm:$0xff] }
 0x28c   :  { %v1027_v3 = vrot.slane %v995_v13, %v2531_v19 }
 0x28d   :  { %1056 = vst.msk [vmem:[#allocation5 + $0x20] sm:$0xff] %vm232_vm5, %v1040_v42  ;;  %1057 = vst.msk [vmem:[#allocation5 + $0x28] sm:$0xff] %vm232_vm5, %v1041_v59  ;;  %v1423_v9 = vadd.f32 %v1422_v40, %v1421_v25  ;;  %v1197_v42 = vld [vmem:[#allocation3 + $0x50] sm:$0xff] }
 0x28e   :  { %v893_v45 = vpop.permute.xlu0 %892  ;;  %v897_v46 = vpop.permute.xlu1 %896 }
 0x28f   :  { %v1042_v18 = vmul.f32 %v1011_v43, %v893_v45  ;;  %v1043_v48 = vmul.f32 %v1011_v43, %v897_v46  ;;  %v2942_v49 = vsel %vm1612_vm2, %v1423_v9, %v1611_v33  ;;  %v1198_v43 = vld [vmem:[#allocation3 + $0x58] sm:$0xff] }
 0x290   :  { %v1106_v36 = vld [vmem:[#allocation5 + $0x10] sm:$0xff]  ;;  %v1107_v29 = vld [vmem:[#allocation5 + $0x18] sm:$0xff] }
 0x291   :  { %v1108_v50 = vadd.f32 %v1106_v36, %v1103_v31  ;;  %1058 = vst.msk [vmem:[#allocation5 + $0x30] sm:$0xff] %vm232_vm5, %v1042_v18  ;;  %1059 = vst.msk [vmem:[#allocation5 + $0x38] sm:$0xff] %vm232_vm5, %v1043_v48  ;;  %v1109_v38 = vadd.f32 %v1107_v29, %v1104_v27  ;;  %v1221_v18 = vld [vmem:[#allocation3 + $0x60] sm:$0xff]  ;;  %v1222_v29 = vld [vmem:[#allocation3 + $0x68] sm:$0xff] }
 0x292   :  { %v905_v28 = vpop.permute.xlu0 %904  ;;  %v909_v52 = vpop.permute.xlu1 %908 }
 0x293   :  { %1110 = vst.msk [vmem:[#allocation5 + $0x10] sm:$0xff] %vm232_vm5, %v1108_v50  ;;  %v1127_v14 = vmul.f32 %v1125_v47, %v1108_v50  ;;  %v1044_v5 = vmul.f32 %v1015_v51, %v905_v28  ;;  %v1045_v55 = vmul.f32 %v1015_v51, %v909_v52  ;;  %1111 = vst.msk [vmem:[#allocation5 + $0x18] sm:$0xff] %vm232_vm5, %v1109_v38 }
 0x294   :  { %v1130_v17 = vld [vmem:[#allocation5 + $0x20] sm:$0xff]  ;;  %v1128_v30 = vmul.f32 %v1126_v53, %v1109_v38  ;;  %v1131_v57 = vld [vmem:[#allocation5 + $0x28] sm:$0xff] }
 0x295   :  { %v1132_v58 = vadd.f32 %v1130_v17, %v1127_v14  ;;  %1060 = vst.msk [vmem:[#allocation5 + $0x40] sm:$0xff] %vm232_vm5, %v1044_v5  ;;  %1061 = vst.msk [vmem:[#allocation5 + $0x48] sm:$0xff] %vm232_vm5, %v1045_v55  ;;  %v1245_v14 = vld [vmem:[#allocation3 + $0x70] sm:$0xff] }
 0x296   :  { %v1133_v32 = vadd.f32 %v1131_v57, %v1128_v30  ;;  %v917_v12 = vpop.permute.xlu0 %916  ;;  %v921_v11 = vpop.permute.xlu1 %920  ;;  %v1246_v57 = vld [vmem:[#allocation3 + $0x78] sm:$0xff] }
 0x297   :  { %1134 = vst.msk [vmem:[#allocation5 + $0x20] sm:$0xff] %vm232_vm5, %v1132_v58  ;;  %v1151_v0 = vmul.f32 %v1149_v60, %v1132_v58  ;;  %v1046_v6 = vmul.f32 %v1019_v56, %v917_v12  ;;  %v1047_v7 = vmul.f32 %v1019_v56, %v921_v11  ;;  %v1488_v58 = vld [vmem:[#allocation5] sm:$0xff]  ;;  %v1489_v11 = vld [vmem:[#allocation5 + $0x8] sm:$0xff] }
 0x298   :  { %1135 = vst.msk [vmem:[#allocation5 + $0x28] sm:$0xff] %vm232_vm5, %v1133_v32  ;;  %v1154_v8 = vld [vmem:[#allocation5 + $0x30] sm:$0xff]  ;;  %v1152_v24 = vmul.f32 %v1150_v2, %v1133_v32  ;;  %v1155_v4 = vld [vmem:[#allocation5 + $0x38] sm:$0xff] }
 0x299   :  { %v1156_v10 = vadd.f32 %v1154_v8, %v1151_v0  ;;  %1062 = vst.msk [vmem:[#allocation5 + $0x50] sm:$0xff] %vm232_vm5, %v1046_v6  ;;  %1063 = vst.msk [vmem:[#allocation5 + $0x58] sm:$0xff] %vm232_vm5, %v1047_v7 }
 0x29a   :  { %v1157_v16 = vadd.f32 %v1155_v4, %v1152_v24  ;;  %v929_v23 = vpop.permute.xlu0 %928  ;;  %v933_v26 = vpop.permute.xlu1 %932  ;;  %v1490_v5 = vld [vmem:[#allocation5 + $0x10] sm:$0xff]  ;;  %v1491_v17 = vld [vmem:[#allocation5 + $0x18] sm:$0xff] }
 0x29b   :  { %1158 = vst.msk [vmem:[#allocation5 + $0x30] sm:$0xff] %vm232_vm5, %v1156_v10  ;;  %v1175_v34 = vmul.f32 %v1173_v22, %v1156_v10  ;;  %v1048_v21 = vmul.f32 %v1023_v61, %v929_v23  ;;  %v1049_v25 = vmul.f32 %v1023_v61, %v933_v26 }
 0x29c   :  { %1159 = vst.msk [vmem:[#allocation5 + $0x38] sm:$0xff] %vm232_vm5, %v1157_v16  ;;  %v1178_v54 = vld [vmem:[#allocation5 + $0x40] sm:$0xff]  ;;  %v1176_v35 = vmul.f32 %v1174_v20, %v1157_v16  ;;  %v1179_v37 = vld [vmem:[#allocation5 + $0x48] sm:$0xff] }
 0x29d   :  { %v1180_v39 = vadd.f32 %v1178_v54, %v1175_v34  ;;  %1064 = vst.msk [vmem:[#allocation5 + $0x60] sm:$0xff] %vm232_vm5, %v1048_v21  ;;  %1065 = vst.msk [vmem:[#allocation5 + $0x68] sm:$0xff] %vm232_vm5, %v1049_v25 }
 0x29e   :  { %v1181_v40 = vadd.f32 %v1179_v37, %v1176_v35  ;;  %v941_v59 = vpop.permute.xlu0 %940  ;;  %v945_v33 = vpop.permute.xlu1 %944  ;;  %v1492_v24 = vld [vmem:[#allocation5 + $0x20] sm:$0xff] }
 0x29f   :  { %1182 = vst.msk [vmem:[#allocation5 + $0x40] sm:$0xff] %vm232_vm5, %v1180_v39  ;;  %v1199_v15 = vmul.f32 %v1197_v42, %v1180_v39  ;;  %v1050_v9 = vmul.f32 %v1027_v3, %v941_v59  ;;  %v1051_v44 = vmul.f32 %v1027_v3, %v945_v33  ;;  %v1493_v10 = vld [vmem:[#allocation5 + $0x28] sm:$0xff] }
 0x2a0   :  { %1183 = vst.msk [vmem:[#allocation5 + $0x48] sm:$0xff] %vm232_vm5, %v1181_v40  ;;  %v1202_v27 = vld [vmem:[#allocation5 + $0x50] sm:$0xff]  ;;  %v1200_v45 = vmul.f32 %v1198_v43, %v1181_v40  ;;  %v1203_v46 = vld [vmem:[#allocation5 + $0x58] sm:$0xff] }
 0x2a1   :  { %v1204_v31 = vadd.f32 %v1202_v27, %v1199_v15  ;;  %1066 = vst.msk [vmem:[#allocation5 + $0x70] sm:$0xff] %vm232_vm5, %v1050_v9  ;;  %1067 = vst.msk [vmem:[#allocation5 + $0x78] sm:$0xff] %vm232_vm5, %v1051_v44 }
 0x2a2   :  { %v1205_v19 = vadd.f32 %v1203_v46, %v1200_v45  ;;  %v1427_v48 = vpop.permute.xlu0 %1426  ;;  %v1431_v36 = vpop.permute.xlu1 %1430  ;;  %v1494_v54 = vld [vmem:[#allocation5 + $0x30] sm:$0xff] }
 0x2a3   :  { %1206 = vst.msk [vmem:[#allocation5 + $0x50] sm:$0xff] %vm232_vm5, %v1204_v31  ;;  %v1223_v50 = vmul.f32 %v1221_v18, %v1204_v31  ;;  %v1504_v2 = vmul.f32 %v1488_v58, %v1427_v48  ;;  %v1505_v6 = vmul.f32 %v1489_v11, %v1431_v36  ;;  %v1495_v37 = vld [vmem:[#allocation5 + $0x38] sm:$0xff] }
 0x2a4   :  { %1207 = vst.msk [vmem:[#allocation5 + $0x58] sm:$0xff] %vm232_vm5, %v1205_v19  ;;  %v1226_v51 = vld [vmem:[#allocation5 + $0x60] sm:$0xff]  ;;  %v1224_v38 = vmul.f32 %v1222_v29, %v1205_v19  ;;  %v1227_v47 = vld [vmem:[#allocation5 + $0x68] sm:$0xff] }
 0x2a5   :  { %v1228_v28 = vadd.f32 %v1226_v51, %v1223_v50  ;;  %v1520_v23 = vsel %vm232_vm5, %v1504_v2, 0.0  ;;  %v1521_v26 = vsel %vm232_vm5, %v1505_v6, 0.0 }
 0x2a6   :  { %v1229_v52 = vadd.f32 %v1227_v47, %v1224_v38  ;;  %v1435_v53 = vpop.permute.xlu0 %1434  ;;  %v1439_v55 = vpop.permute.xlu1 %1438  ;;  %v1522_v42 = vadd.f32 %v1521_v26, %v1520_v23  ;;  %v1496_v44 = vld [vmem:[#allocation5 + $0x40] sm:$0xff] }
 0x2a7   :  { %1230 = vst.msk [vmem:[#allocation5 + $0x60] sm:$0xff] %vm232_vm5, %v1228_v28  ;;  %v1247_v30 = vmul.f32 %v1245_v14, %v1228_v28  ;;  %v1506_v56 = vmul.f32 %v1490_v5, %v1435_v53  ;;  %v1507_v41 = vmul.f32 %v1491_v17, %v1439_v55  ;;  %v1497_v45 = vld [vmem:[#allocation5 + $0x48] sm:$0xff] }
 0x2a8   :  { %1231 = vst.msk [vmem:[#allocation5 + $0x68] sm:$0xff] %vm232_vm5, %v1229_v52  ;;  %v1250_v32 = vld [vmem:[#allocation5 + $0x70] sm:$0xff]  ;;  %v1248_v60 = vmul.f32 %v1246_v57, %v1229_v52  ;;  %v1251_v12 = vld [vmem:[#allocation5 + $0x78] sm:$0xff]  ;;  %v1523_v18 = vrot.slane %v1522_v42, 4 }
 0x2a9   :  { %v1252_v0 = vadd.f32 %v1250_v32, %v1247_v30  ;;  %v1529_v61 = vsel %vm232_vm5, %v1506_v56, 0.0  ;;  %v1530_v13 = vsel %vm232_vm5, %v1507_v41, 0.0 }
 0x2aa   :  { %v1253_v7 = vadd.f32 %v1251_v12, %v1248_v60  ;;  %v1443_v8 = vpop.permute.xlu0 %1442  ;;  %v1447_v4 = vpop.permute.xlu1 %1446  ;;  %v1531_v21 = vadd.f32 %v1530_v13, %v1529_v61  ;;  %v1498_v47 = vld [vmem:[#allocation5 + $0x50] sm:$0xff]  ;;  %v1524_v55 = vadd.f32 %v1523_v18, %v1522_v42 }
 0x2ab   :  { %1254 = vst.msk [vmem:[#allocation5 + $0x70] sm:$0xff] %vm232_vm5, %v1252_v0  ;;  %v1508_v16 = vmul.f32 %v1492_v24, %v1443_v8  ;;  %v1509_v22 = vmul.f32 %v1493_v10, %v1447_v4  ;;  %v1499_v52 = vld [vmem:[#allocation5 + $0x58] sm:$0xff] }
 0x2ac   :  { %1255 = vst.msk [vmem:[#allocation5 + $0x78] sm:$0xff] %vm232_vm5, %v1253_v7  ;;  %v1532_v15 = vrot.slane %v1531_v21, 4  ;;  %v1525_v8 = vrot.slane %v1524_v55, 2 }
 0x2ad   :  { %v1538_v34 = vsel %vm232_vm5, %v1508_v16, 0.0  ;;  %v1539_v20 = vsel %vm232_vm5, %v1509_v22, 0.0 }
 0x2ae   :  { %v1451_v25 = vpop.permute.xlu0 %1450  ;;  %v1455_v35 = vpop.permute.xlu1 %1454  ;;  %v1540_v39 = vadd.f32 %v1539_v20, %v1538_v34  ;;  %v1533_v29 = vadd.f32 %v1532_v15, %v1531_v21  ;;  %v1500_v12 = vld [vmem:[#allocation5 + $0x60] sm:$0xff] }
 0x2af   :  { %v1510_v3 = vmul.f32 %v1494_v54, %v1451_v25  ;;  %v1511_v40 = vmul.f32 %v1495_v37, %v1455_v35  ;;  %v1501_v0 = vld [vmem:[#allocation5 + $0x68] sm:$0xff]  ;;  %v1526_v37 = vadd.f32 %v1525_v8, %v1524_v55 }
 0x2b0   :  { %v1541_v46 = vrot.slane %v1540_v39, 4  ;;  %v1534_v56 = vrot.slane %v1533_v29, 2 }
 0x2b1   :  { %v1547_v59 = vsel %vm232_vm5, %v1510_v3, 0.0  ;;  %v1548_v33 = vsel %vm232_vm5, %v1511_v40, 0.0 }
 0x2b2   :  { %v1549_v43 = vadd.f32 %v1548_v33, %v1547_v59  ;;  %v1459_v9 = vpop.permute.xlu0 %1458  ;;  %v1463_v27 = vpop.permute.xlu1 %1462  ;;  %v1542_v14 = vadd.f32 %v1541_v46, %v1540_v39  ;;  %v1535_v16 = vadd.f32 %v1534_v56, %v1533_v29  ;;  %v1502_v34 = vld [vmem:[#allocation5 + $0x70] sm:$0xff] }
 0x2b3   :  { %v1512_v31 = vmul.f32 %v1496_v44, %v1459_v9  ;;  %v1513_v19 = vmul.f32 %v1497_v45, %v1463_v27  ;;  %v1503_v21 = vld [vmem:[#allocation5 + $0x78] sm:$0xff]  ;;  %v1527_v45 = vrot.slane %v1526_v37, 1 }
 0x2b4   :  { %v1550_v48 = vrot.slane %v1549_v43, 4  ;;  %v1543_v2 = vrot.slane %v1542_v14, 2  ;;  %v1536_v15 = vrot.slane %v1535_v16, 1 }
 0x2b5   :  { %v1556_v36 = vsel %vm232_vm5, %v1512_v31, 0.0  ;;  %v1557_v50 = vsel %vm232_vm5, %v1513_v19, 0.0 }
 0x2b6   :  { %v1558_v51 = vadd.f32 %v1557_v50, %v1556_v36  ;;  %v1467_v38 = vpop.permute.xlu0 %1466  ;;  %v1471_v28 = vpop.permute.xlu1 %1470  ;;  %v1551_v17 = vadd.f32 %v1550_v48, %v1549_v43  ;;  %v1544_v25 = vadd.f32 %v1543_v2, %v1542_v14  ;;  %v1537_v48 = vadd.f32 %v1536_v15, %v1535_v16  ;;  %v2229_v15 = vld [vmem:[%s3105_s11] sm:$0xff]  }
 0x2b7   :  { %v1514_v53 = vmul.f32 %v1498_v47, %v1467_v38  ;;  %v1515_v5 = vmul.f32 %v1499_v52, %v1471_v28  ;;  %v1528_v38 = vadd.f32 %v1527_v45, %v1526_v37 }
 0x2b8   :  { %v1559_v30 = vrot.slane %v1558_v51, 4  ;;  %v1552_v24 = vrot.slane %v1551_v17, 2  ;;  %v1545_v27 = vrot.slane %v1544_v25, 1 }
 0x2b9   :  { %v1565_v57 = vsel %vm232_vm5, %v1514_v53, 0.0  ;;  %v1566_v58 = vsel %vm232_vm5, %v1515_v5, 0.0  ;;  %v1623_v53 = vsel %vm1600_vm10, %v1537_v48, %v1528_v38 }
 0x2ba   :  { %v1560_v41 = vadd.f32 %v1559_v30, %v1558_v51  ;;  %v1567_v32 = vadd.f32 %v1566_v58, %v1565_v57  ;;  %v1475_v60 = vpop.permute.xlu0 %1474  ;;  %v1479_v11 = vpop.permute.xlu1 %1478  ;;  %v1553_v39 = vadd.f32 %v1552_v24, %v1551_v17  ;;  %v1546_v51 = vadd.f32 %v1545_v27, %v1544_v25  ;;  %v2101_v58 = vld [vmem:[%s3101_s7] ss:$0 sm:$0xff] }
 0x2bb   :  { %v1516_v6 = vmul.f32 %v1500_v12, %v1475_v60  ;;  %v1517_v7 = vmul.f32 %v1501_v0, %v1479_v11  ;;  %v1638_v12 = vmul.f32 %v2101_v58, %v2561_v62  ;;  %v1639_v11 = vmul.f32 %v2101_v58, %v2563_v63  ;;  %v2350_v63 = vld [vmem:[%s3117_s30] sm:$0xff] }
 0x2bc   :  { %v1568_v4 = vrot.slane %v1567_v32, 4  ;;  %v1561_v10 = vrot.slane %v1560_v41, 2  ;;  %v1554_v46 = vrot.slane %v1553_v39, 1  ;;  %v1624_v17 = vsel %vm1602_vm11, %v1546_v51, %v1623_v53  ;;  %v2232_v53 = vld [vmem:[%s3107_s13 + $0x28] sm:$0xff]   ;;  %v2111_v58 = vld [vmem:[%s3106_s12] ss:$0 sm:$0xff] }
 0x2bd   :  { %v1574_v61 = vsel %vm232_vm5, %v1516_v6, 0.0  ;;  %v1575_v13 = vsel %vm232_vm5, %v1517_v7, 0.0  ;;  %v1640_v7 = vadd.f32 %v1638_v12, %v2942_v49 }
 0x2be   :  { %v1569_v22 = vadd.f32 %v1568_v4, %v1567_v32  ;;  %v1576_v23 = vadd.f32 %v1575_v13, %v1574_v61  ;;  %v1483_v26 = vpop.permute.xlu0 %1482  ;;  %v1487_v20 = vpop.permute.xlu1 %1486  ;;  %v1562_v42 = vadd.f32 %v1561_v10, %v1560_v41  ;;  %v1555_v47 = vadd.f32 %v1554_v46, %v1553_v39 }
 0x2bf   :  { %v1518_v54 = vmul.f32 %v1502_v34, %v1483_v26  ;;  %v1519_v35 = vmul.f32 %v1503_v21, %v1487_v20 }
 0x2c0   :  { %v1570_v3 = vrot.slane %v1569_v22, 2  ;;  %v1577_v40 = vrot.slane %v1576_v23, 4  ;;  %v1563_v18 = vrot.slane %v1562_v42, 1  ;;  %v1625_v56 = vsel %vm1604_vm12, %v1555_v47, %v1624_v17  ;;  %v2235_v17 = vld [vmem:[%s3107_s13 + $0x10] sm:$0xff]  }
 0x2c1   :  { %v1583_v59 = vsel %vm232_vm5, %v1518_v54, 0.0  ;;  %v1584_v33 = vsel %vm232_vm5, %v1519_v35, 0.0 }
 0x2c2   :  { %v1571_v43 = vadd.f32 %v1570_v3, %v1569_v22  ;;  %v1578_v9 = vadd.f32 %v1577_v40, %v1576_v23  ;;  %v1585_v44 = vadd.f32 %v1584_v33, %v1583_v59  ;;  %v1564_v14 = vadd.f32 %v1563_v18, %v1562_v42  ;;  %v1659_v2 = vpop.permute.xlu0 %1658  ;;  %v1661_v24 = vpop.permute.xlu1 %1660  ;;  %v2351_v23 = vld [vmem:[%s3117_s30 + $0x8] sm:$0xff]  ;;  %v2109_v18 = vld [vmem:[%s3103_s9] ss:$0 sm:$0xff] }
 0x2c3   :  { %v1664_v4 = vmul.f32 %v1659_v2, %v1640_v7  ;;  %v2228_v33 = vld [vmem:[%s3105_s11 + $0x8] sm:$0xff]   ;;  %s2352_s11 = scalar_lea.vmem %s2077_s18, 256 }
 0x2c4   :  { %v1579_v31 = vrot.slane %v1578_v9, 2  ;;  %v1586_v19 = vrot.slane %v1585_v44, 4  ;;  %v1572_v36 = vrot.slane %v1571_v43, 1  ;;  %v1626_v41 = vsel %vm1606_vm13, %v1564_v14, %v1625_v56  ;;  %v2231_v14 = vld [vmem:[%s3107_s13 + $0x30] sm:$0xff]   ;;  %p2353_p0 = scmp.ne.s32.totalorder %s2077_s18, %s2352_s11  ;;  %p2358_p2 = scmp.lt.s32.totalorder %s2352_s11, %s2352_s11 }
 0x2c6   :  { %v1580_v50 = vadd.f32 %v1579_v31, %v1578_v9  ;;  %v1587_v29 = vadd.f32 %v1586_v19, %v1585_v44  ;;  %v1573_v5 = vadd.f32 %v1572_v36, %v1571_v43  ;;  %p2359_p3 = por %p2358_p2, %p2357_p1 }
 0x2c8   :  { %v1581_v28 = vrot.slane %v1580_v50, 1  ;;  %v1588_v52 = vrot.slane %v1587_v29, 2  ;;  %v1627_v60 = vsel %vm1608_vm14, %v1573_v5, %v1626_v41  ;;  %v2233_v5 = vld [vmem:[%s3107_s13 + $0x20] sm:$0xff]   ;;  %p2360_p4 = pnand %p2359_p3, %p2353_p0 }
 0x2ca   :  { %v1589_v55 = vadd.f32 %v1588_v52, %v1587_v29  ;;  %v1582_v30 = vadd.f32 %v1581_v28, %v1580_v50  ;;  %v2110_v29 = vld [vmem:[%s3104_s10] ss:$0 sm:$0xff]  ;;  %v2230_v52 = vld [vmem:[%s3107_s13 + $0x38] sm:$0xff]  }
 0x2cb   :  { %2192 = vmatpush3.bf16.msra.mxu0 %v2230_v52 }
 0x2cc   :  { %v1590_v57 = vrot.slane %v1589_v55, 1  ;;  %v1628_v0 = vsel %vm1610_vm15, %v1582_v30, %v1627_v60  ;;  %2193 = vmatprep.subr.bf16.mxu0 %v2374_v1  ;;  %v2236_v30 = vld [vmem:[%s3107_s13 + $0x8] sm:$0xff]  }
 0x2ce   :  { %v1591_v32 = vadd.f32 %v1590_v57, %v1589_v55  ;;  %v2234_v55 = vld [vmem:[%s3107_s13 + $0x18] sm:$0xff]   ;;  %v2237_v57 = vld [vmem:[%s3107_s13] sm:$0xff]  }
 0x2cf   :  { %2194 = vmatpush3.bf16.msra.mxu0 %v2231_v14 }
 0x2d0   :  { %v1629_v6 = vsel %vm1612_vm2, %v1591_v32, %v1628_v0  ;;  %2195 = vmatprep.subr.bf16.mxu0 %v2374_v1 }
 0x2d1   :  { %v1641_v8 = vadd.f32 %v1639_v11, %v1629_v6 }
 0x2d3   :  { %v1665_v10 = vmul.f32 %v1661_v24, %v1641_v8  ;;  %2196 = vmatpush3.bf16.msra.mxu0 %v2232_v53 }
 0x2d4   :  { %2197 = vmatprep.subr.bf16.mxu0 %v2374_v1 }
 0x2d5   :  { %v1666_v61 = vpack.c.bf16 %v1665_v10, %v1664_v4 }
 0x2d7   :  { %2180 = vmatmul.mubr.msk.bf16.vlgmr.msra.gmra.mxu1 %vm232_vm5, %v1666_v61  ;;  %2198 = vmatpush3.bf16.msra.mxu0 %v2233_v5 }
 0x2d8   :  { %2187 = vmatprep.mubr.msk.bf16.mxu1 %vm2375_vm0, %v2374_v1  ;;  %2184 = vmatpush3.bf16.msra.mxu1 %v2228_v33 }
 0x2d9   :  { %2185 = vmatprep.subr.bf16.mxu1 %v2374_v1  ;;  %2199 = vmatprep.subr.bf16.mxu0 %v2374_v1 }
 0x2db   :  { %2200 = vmatpush3.bf16.msra.mxu0 %v2234_v55  ;;  %v2115_v55 = vld [vmem:[%s3108_s14] ss:$0 sm:$0xff] }
 0x2dc   :  { %2186 = vmatpush3.bf16.msra.mxu1 %v2229_v15  ;;  %2201 = vmatprep.subr.bf16.mxu0 %v2374_v1 }
 0x2df   :  { %2202 = vmatpush3.bf16.msra.mxu0 %v2235_v17 }
 0x2e0   :  { %2203 = vmatprep.subr.bf16.mxu0 %v2374_v1 }
 0x2e3   :  { %2204 = vmatpush3.bf16.msra.mxu0 %v2236_v30 }
 0x2e4   :  { %2205 = vmatprep.subr.bf16.mxu0 %v2374_v1 }
 0x2e7   :  { %2206 = vmatpush3.bf16.msra.mxu0 %v2237_v57 }
 0x397   :  { %v1736_v62 = vpop.f32.mrf.mxu1 }
 0x398   :  { %v1737_v13 = vadd.f32 %v2350_v63, %v1736_v62 }
 0x399   :  { %v2181_v16 = vpop.f32.mrf.mxu1 }
 0x39a   :  { %v1745_v22 = vsel %vm77_vm1, %v1737_v13, 0.0 }
 0x39b   :  { %1746 = vadd.xlane.f32.xlu0 %v1745_v22  ;;  %v1739_v49 = vpop.f32.mrf.mxu1 }
 0x39c   :  { %v1740_v26 = vadd.f32 %v2351_v23, %v1739_v49 }
 0x39d   :  { %v2182_v34 = vpop.f32.mrf.mxu1 }
 0x39e   :  { %v1748_v20 = vsel %vm77_vm1, %v1740_v26, 0.0 }
 0x39f   :  { %1749 = vadd.xlane.f32.xlu1 %v1748_v20 }
 0x424   :  { %v1747_v21 = vpop.xlane.xlu0 %1746 }
 0x425   :  { %v1752_v25 = vmul.f32 0.03125, %v1747_v21 }
 0x427   :  { %v1754_v54 = vsub.f32 %v1737_v13, %v1752_v25 }
 0x428   :  { %v1750_v35 = vpop.xlane.xlu1 %1749 }
 0x429   :  { %v1753_v37 = vmul.f32 0.03125, %v1750_v35  ;;  %v1756_v39 = vmul.f32 %v1754_v54, %v1754_v54 }
 0x42b   :  { %v1755_v3 = vsub.f32 %v1740_v26, %v1753_v37  ;;  %v1758_v40 = vsel %vm77_vm1, %v1756_v39, 0.0 }
 0x42c   :  { %1759 = vadd.xlane.f32.xlu0 %v1758_v40 }
 0x42d   :  { %v1757_v42 = vmul.f32 %v1755_v3, %v1755_v3 }
 0x42f   :  { %v1761_v59 = vsel %vm77_vm1, %v1757_v42, 0.0 }
 0x430   :  { %1762 = vadd.xlane.f32.xlu0 %v1761_v59 }
 0x4b5   :  { %v1760_v43 = vpop.xlane.xlu0 %1759 }
 0x4b6   :  { %v1764_v9 = vmul.f32 0.03125, %v1760_v43 }
 0x4b8   :  { %v1766_v44 = vadd.f32 1e-12, %v1764_v9 }
 0x4b9   :  { %v1763_v27 = vpop.xlane.xlu0 %1762 }
 0x4ba   :  { %2334 = vrsqrt.f32 %v1766_v44  ;;  %v1765_v45 = vmul.f32 0.03125, %v1763_v27 }
 0x4bc   :  { %v1767_v46 = vadd.f32 1e-12, %v1765_v45 }
 0x4be   :  { %2336 = vrsqrt.f32 %v1767_v46 }
 0x4c7   :  { %v2335_v31 = vpop.eup %2334 }
 0x4c8   :  { %v1770_v19 = vmul.f32 %v2335_v31, %v1754_v54 }
 0x4ca   :  { %v1778_v50 = vmul.f32 %v2109_v18, %v1770_v19 }
 0x4cb   :  { %v2337_v48 = vpop.eup %2336 }
 0x4cc   :  { %v1771_v36 = vmul.f32 %v2337_v48, %v1755_v3  ;;  %v3033_v38 = vadd.f32 %v2110_v29, %v1778_v50 }
 0x4ce   :  { %v1779_v51 = vmul.f32 %v2109_v18, %v1771_v36 }
 0x4d0   :  { %v3035_v47 = vadd.f32 %v2110_v29, %v1779_v51 }
 0x4d2   :  { %v1788_v28 = vpack.c.bf16 %v3035_v47, %v3033_v38 }
 0x4d4   :  { %2188 = vmatmul.mubr.msk.bf16.vlgmr.msra.gmra.mxu1 %vm77_vm1, %v1788_v28 }
 0x594   :  { %v1849_v56 = vpop.f32.mrf.mxu1 }
 0x595   :  { %v1850_v41 = vadd.f32 %v2111_v58, %v1849_v56 }
 0x596   :  { %v2189_v32 = vpop.f32.mrf.mxu1 }
 0x597   :  { %v1858_v60 = vmul.f32 0.70710677, %v1850_v41  ;;  %v1856_v51 = vmul.f32 0.5, %v1850_v41 }
 0x598   :  { %v1852_v12 = vpop.f32.mrf.mxu1 }
 0x599   :  { %v1860_v11 = vand.u32 2147483647, %v1858_v60  ;;  %v1853_v0 = vadd.f32 %v2111_v58, %v1852_v12  ;;  %vm1900_vm0 = vcmp.ge.f32.partialorder %v1858_v60, 0.0 }
 0x59a   :  { %v2190_v2 = vpop.f32.mrf.mxu1 }
 0x59b   :  { %v1862_v6 = vmul.f32 0.3275911, %v1860_v11  ;;  %v1859_v7 = vmul.f32 0.70710677, %v1853_v0  ;;  %v1888_v10 = vsub.f32 0.0, %v1860_v11  ;;  %v1857_v28 = vmul.f32 0.5, %v1853_v0 }
 0x59d   :  { %v1864_v8 = vadd.f32 1.0, %v1862_v6  ;;  %v1861_v24 = vand.u32 2147483647, %v1859_v7  ;;  %v1890_v61 = vmul.f32 %v1888_v10, %v1860_v11  ;;  %vm1901_vm3 = vcmp.ge.f32.partialorder %v1859_v7, 0.0 }
 0x59f   :  { %2338 = vrcp.f32 %v1864_v8  ;;  %v1863_v4 = vmul.f32 0.3275911, %v1861_v24  ;;  %v1889_v62 = vsub.f32 0.0, %v1861_v24  ;;  %v1892_v16 = vmul.f32 1.442695, %v1890_v61 }
 0x5a1   :  { %v1865_v1 = vadd.f32 1.0, %v1863_v4  ;;  %v1891_v22 = vmul.f32 %v1889_v62, %v1861_v24 }
 0x5a3   :  { %2340 = vrcp.f32 %v1865_v1  ;;  %v1894_v20 = vmul.f32 1.442695, %v1891_v22 }
 0x5a4   :  { %2342 = vpow2.f32 %v1892_v16 }
 0x5a5   :  { %2344 = vpow2.f32 %v1894_v20 }
 0x5ac   :  { %v2339_v63 = vpop.eup %2338 }
 0x5ad   :  { %v1870_v13 = vmul.f32 1.0614054, %v2339_v63 }
 0x5af   :  { %v1872_v49 = vadd.f32 -1.4531521, %v1870_v13 }
 0x5b0   :  { %v2341_v23 = vpop.eup %2340 }
 0x5b1   :  { %v1874_v26 = vmul.f32 %v2339_v63, %v1872_v49  ;;  %v1871_v34 = vmul.f32 1.0614054, %v2341_v23  ;;  %v2343_v43 = vpop.eup %2342  ;;  %v2124_v49 = vld [vmem:[%s3109_s15] ss:$0 sm:$0xff] }
 0x5b2   :  { %v2345_v46 = vpop.eup %2344 }
 0x5b3   :  { %v1876_v21 = vadd.f32 1.4214138, %v1874_v26  ;;  %v1873_v25 = vadd.f32 -1.4531521, %v1871_v34  ;;  %v2125_v26 = vld [vmem:[%s3110_s16] ss:$0 sm:$0xff] }
 0x5b5   :  { %v1878_v54 = vmul.f32 %v2339_v63, %v1876_v21  ;;  %v1875_v35 = vmul.f32 %v2341_v23, %v1873_v25 }
 0x5b7   :  { %v1880_v37 = vadd.f32 -0.28449672, %v1878_v54  ;;  %v1877_v39 = vadd.f32 1.4214138, %v1875_v35 }
 0x5b9   :  { %v1882_v3 = vmul.f32 %v2339_v63, %v1880_v37  ;;  %v1879_v40 = vmul.f32 %v2341_v23, %v1877_v39 }
 0x5bb   :  { %v1884_v42 = vadd.f32 0.2548296, %v1882_v3  ;;  %v1881_v59 = vadd.f32 -0.28449672, %v1879_v40 }
 0x5bd   :  { %v1886_v33 = vmul.f32 %v2339_v63, %v1884_v42  ;;  %v1883_v15 = vmul.f32 %v2341_v23, %v1881_v59 }
 0x5bf   :  { %v1896_v9 = vmul.f32 %v2343_v43, %v1886_v33  ;;  %v1885_v44 = vadd.f32 0.2548296, %v1883_v15 }
 0x5c1   :  { %v1898_v27 = vsub.f32 1.0, %v1896_v9  ;;  %v1887_v45 = vmul.f32 %v2341_v23, %v1885_v44 }
 0x5c3   :  { %v1902_v31 = vsub.f32 0.0, %v1898_v27  ;;  %v1897_v19 = vmul.f32 %v2345_v46, %v1887_v45 }
 0x5c5   :  { %v1904_v18 = vsel %vm1900_vm0, %v1898_v27, %v1902_v31  ;;  %v1899_v48 = vsub.f32 1.0, %v1897_v19 }
 0x5c6   :  { %v1906_v50 = vadd.f32 1.0, %v1904_v18 }
 0x5c7   :  { %v1903_v36 = vsub.f32 0.0, %v1899_v48 }
 0x5c8   :  { %v1908_v14 = vmul.f32 %v1906_v50, %v1856_v51 }
 0x5c9   :  { %v1905_v29 = vsel %vm1901_vm3, %v1899_v48, %v1903_v36 }
 0x5ca   :  { %v1907_v52 = vadd.f32 1.0, %v1905_v29 }
 0x5cc   :  { %v1909_v53 = vmul.f32 %v1907_v52, %v1857_v28 }
 0x5ce   :  { %v1910_v5 = vpack.c.bf16 %v1909_v53, %v1908_v14 }
 0x5d0   :  { %2208 = vmatmul.mubr.bf16.vlgmr.msra.gmra.mxu0 %v1910_v5 }
 0x690   :  { %v2016_v17 = vpop.f32.mrf.mxu0 }
 0x691   :  { %v2017_v30 = vadd.f32 %v2115_v55, %v2016_v17 }
 0x692   :  { %v2209_v57 = vpop.f32.mrf.mxu0 }
 0x693   :  { %v2023_v58 = vadd.f32 %v2017_v30, %v3033_v38 }
 0x694   :  { %v2019_v56 = vpop.f32.mrf.mxu0 }
 0x695   :  { %v2020_v32 = vadd.f32 %v2115_v55, %v2019_v56  ;;  %v2027_v60 = vsel %vm77_vm1, %v2023_v58, 0.0 }
 0x696   :  { %2028 = vadd.xlane.f32.xlu1 %v2027_v60  ;;  %v2210_v41 = vpop.f32.mrf.mxu0 }
 0x697   :  { %v2024_v12 = vadd.f32 %v2020_v32, %v3035_v47 }
 0x699   :  { %v2030_v11 = vsel %vm77_vm1, %v2024_v12, 0.0 }
 0x69a   :  { %2031 = vadd.xlane.f32.xlu0 %v2030_v11 }
 0x71f   :  { %v2029_v0 = vpop.xlane.xlu1 %2028 }
 0x720   :  { %v2033_v2 = vmul.f32 0.03125, %v2029_v0 }
 0x722   :  { %v2035_v6 = vsub.f32 %v2023_v58, %v2033_v2 }
 0x723   :  { %v2032_v7 = vpop.xlane.xlu0 %2031 }
 0x724   :  { %v2034_v8 = vmul.f32 0.03125, %v2032_v7  ;;  %v2037_v24 = vmul.f32 %v2035_v6, %v2035_v6 }
 0x726   :  { %v2036_v4 = vsub.f32 %v2024_v12, %v2034_v8  ;;  %v2039_v38 = vsel %vm77_vm1, %v2037_v24, 0.0 }
 0x727   :  { %2040 = vadd.xlane.f32.xlu1 %v2039_v38 }
 0x728   :  { %v2038_v1 = vmul.f32 %v2036_v4, %v2036_v4 }
 0x72a   :  { %v2042_v10 = vsel %vm77_vm1, %v2038_v1, 0.0 }
 0x72b   :  { %2043 = vadd.xlane.f32.xlu0 %v2042_v10 }
 0x7b0   :  { %v2041_v61 = vpop.xlane.xlu1 %2040 }
 0x7b1   :  { %v2045_v62 = vmul.f32 0.03125, %v2041_v61 }
 0x7b3   :  { %v2047_v47 = vadd.f32 1e-12, %v2045_v62 }
 0x7b4   :  { %v2044_v63 = vpop.xlane.xlu0 %2043 }
 0x7b5   :  { %2346 = vrsqrt.f32 %v2047_v47  ;;  %v2046_v13 = vmul.f32 0.03125, %v2044_v63 }
 0x7b7   :  { %v2048_v16 = vadd.f32 1e-12, %v2046_v13 }
 0x7b9   :  { %2348 = vrsqrt.f32 %v2048_v16 }
 0x7c2   :  { %v2347_v22 = vpop.eup %2346 }
 0x7c3   :  { %v2051_v23 = vmul.f32 %v2347_v22, %v2035_v6 }
 0x7c5   :  { %v2059_v34 = vmul.f32 %v2124_v49, %v2051_v23 }
 0x7c6   :  { %v2349_v20 = vpop.eup %2348 }
 0x7c7   :  { %v2052_v21 = vmul.f32 %v2349_v20, %v2036_v4  ;;  %v2067_v25 = vadd.f32 %v2125_v26, %v2059_v34 }
 0x7c9   :  { %v2060_v54 = vmul.f32 %v2124_v49, %v2052_v21  ;;  %2069 = vst.msk [vmem:[#allocation6] sm:$0xff] %vm77_vm1, %v2067_v25 }
 0x7cb   :  { %v2068_v35 = vadd.f32 %v2125_v26, %v2060_v54 }
 0x7cd   :  { %2070 = vst.msk [vmem:[#allocation6 + $0x8] sm:$0xff] %vm77_vm1, %v2068_v35 }
 0x7ce   :  { %2363 = shalt.err (!%p2360_p4)
}
 0x7cf   :  { %s2379_s15 = smov 128   ;;  %s2380_s16 = smov 8  }
 0x7d0   :  { %2082 = dma.vmem_to_hbm [thread:$0]  %s2077_s18, 256, %s3111_s17, [#allocation7], %s2379_s15, %s2379_s15, %s2380_s16  }
 0x7d1   :  { %2372 = dma.done.wait [#allocation7], 256  }
 0x7d2   :  { %2373 = vsyncadd [#allocation7], 4294967040 }
 0x7d3   :  { %2086 = vsyncpa [#allocation7], 1 }

</bundles_post_ra>
